<compile_context>
chip_gen: v7x
topology: tpu7x:2x2x1
jax: 0.10.0
libtpu: 0.0.40
codegen_flags: <defaults>
</compile_context>

<pallas_src>
import numpy as np
import jax
import jax.numpy as jnp
from jax.experimental import pallas as pl
from jax.experimental.pallas import tpu as pltpu

F32 = jnp.float32


# ----------------------------------------------------------------------------
# Fused Pallas kernel
# ----------------------------------------------------------------------------

def _dot(a, b):
    return jnp.dot(a, b, preferred_element_type=jnp.float32)


def _relu(x):
    return jnp.maximum(x, 0.0)


def _layer_norm(x, g, b):
    mu = jnp.mean(x, axis=-1, keepdims=True)
    xc = x - mu
    var = jnp.mean(xc * xc, axis=-1, keepdims=True)
    return xc * jax.lax.rsqrt(var + 1e-5) * g + b


def fused_ensemble_kernel(
        x_ref,
        # --- MLP(42 -> 128 -> 64 -> 1)
        mw1, mb1, mw2, mb2, mw3, mb3,
        # --- TCN: conv weights stored (K, C_in, C_out), weight_norm folded
        cw0, cb0, cw1, cb1, cw2, cb2, cwf, cbf,
        # --- LSTM: embed(42->64), 4 layers with fused (64,192) i|g|o gates, fc(64->1)
        lwe, lbe, lwg, lbg, lwout, lbout,
        # --- Transformer: embed, 4 layers (fused attn linear + FFN + 2 LayerNorms), fc
        twe, tbe, twa, tba, tw1, tb1, tw2, tb2, tg1, tt1, tg2, tt2, twf, tbf,
        # --- Autoencoder encoder(42->64->32) + fc(32->1)
        aw1, ab1, aw2, ab2, awf, abf,
        # --- precomputed softmax ensemble weights (1, 5)
        ens_p,
        o_ref):
    x = x_ref[...]
    B = x.shape[0]

    # ------------------------------ MLP ------------------------------
    h = _relu(_dot(x, mw1[...]) + mb1[...])
    h = _relu(_dot(h, mw2[...]) + mb2[...])
    o_mlp = jax.nn.sigmoid(_dot(h, mw3[...]) + mb3[...])               # (B, 1)

    # ------------------------------ TCN ------------------------------
    # Conv1d over a length-1 sequence grown by symmetric padding (no chomp, per
    # the torch spec).  Time positions are static and unrolled; per layer all
    # (time x batch) rows are stacked on the sublane axis so each of the 3
    # kernel taps is exactly ONE matmul.
    def conv_block(h_list, w_ref, b_ref, dil, pad):
        L_in = len(h_list)
        L_out = L_in + 2 * pad - 2 * dil            # K=3, stride=1
        bias = b_ref[...]                           # (1, C_out)
        X = h_list[0] if L_in == 1 else jnp.concatenate(h_list, axis=0)
        Y = [_dot(X, w_ref[k]) for k in range(3)]   # 3 matmuls per layer
        out = []
        for t in range(L_out):
            acc = None
            for k in range(3):
                pos = t + k * dil - pad
                if 0 <= pos < L_in:
                    term = Y[k][pos * B:(pos + 1) * B, :]
                    acc = term if acc is None else acc + term
            if acc is None:
                acc = jnp.zeros((B, bias.shape[-1]), jnp.float32)
            out.append(_relu(acc + bias))           # ReLU; dropout = identity
        return out

    ht = conv_block([x], cw0, cb0, dil=1, pad=2)    # L: 1 -> 3
    ht = conv_block(ht, cw1, cb1, dil=2, pad=4)     # L: 3 -> 7
    ht = conv_block(ht, cw2, cb2, dil=4, pad=8)     # L: 7 -> 15
    m = sum(ht[1:], ht[0]) * (1.0 / float(len(ht)))                     # mean over time
    o_tcn = jax.nn.sigmoid(_dot(m, cwf[...]) + cbf[...])                # (B, 1)

    # ------------------------------ LSTM -----------------------------
    # seq_len == 1, h0 = c0 = 0  =>  W_hh terms and the forget gate vanish
    # (b_hh folded into biases).  i/g/o gates come from one fused matmul.
    h = _dot(x, lwe[...]) + lbe[...]
    for l in range(4):
        gates = _dot(h, lwg[l]) + lbg[l]            # (B, 192)
        gi = jax.nn.sigmoid(gates[:, 0:64])
        gg = jnp.tanh(gates[:, 64:128])
        go = jax.nn.sigmoid(gates[:, 128:192])
        h = go * jnp.tanh(gi * gg)
    o_lstm = jax.nn.sigmoid(_dot(h, lwout[...]) + lbout[...])           # (B, 1)

    # --------------------------- Transformer -------------------------
    # seq_len == 1 => softmax over a single key is 1, so the whole attention
    # block is the precomputed linear map (twa, tba).  Post-norm layers.
    xt = _dot(x, twe[...]) + tbe[...]
    for l in range(4):
        attn = _dot(xt, twa[l]) + tba[l]
        xt = _layer_norm(xt + attn, tg1[l], tt1[l])
        ffh = _relu(_dot(xt, tw1[l]) + tb1[l])
        ff = _dot(ffh, tw2[l]) + tb2[l]
        xt = _layer_norm(xt + ff, tg2[l], tt2[l])
    o_tr = jax.nn.sigmoid(_dot(xt, twf[...]) + tbf[...])                # (B, 1)

    # --------------------------- Autoencoder -------------------------
    h = _relu(_dot(x, aw1[...]) + ab1[...])
    latent = _dot(h, aw2[...]) + ab2[...]
    # TODO(synk): decoder output is computed-and-discarded by the torch forward; skipped.
    o_ae = jax.nn.sigmoid(_dot(latent, awf[...]) + abf[...])            # (B, 1)

    # --------------------- Ensemble epilogue (in VMEM) ---------------
    p = ens_p[...]                                                      # (1, 5) softmax'd
    o_ref[...] = (o_mlp * p[:, 0:1] + o_tcn * p[:, 1:2] + o_lstm * p[:, 2:3]
                  + o_tr * p[:, 3:4] + o_ae * p[:, 4:5])


# ----------------------------------------------------------------------------
# pallas_call wrapper: batch-tiled "parallel" grid, weights resident in VMEM
# ----------------------------------------------------------------------------

def _const_spec(shape):
    nd = len(shape)
    return pl.BlockSpec(shape, lambda i, _nd=nd: (0,) * _nd)


def ensemble_forward(x, params, tile_b=512):
    """x: (B, 42) f32 -> (B,) f32. tile_b must be a multiple of 8."""
    B, D = x.shape
    b8 = max(8, ((B + 7) // 8) * 8)
    tb = min(tile_b, b8)
    Bp = ((B + tb - 1) // tb) * tb
    if Bp != B:
        x = jnp.pad(x, ((0, Bp - B), (0, 0)))

    flat = params["flat"]
    in_specs = [pl.BlockSpec((tb, D), lambda i: (i, 0))] + \
               [_const_spec(a.shape) for a in flat]
    out_spec = pl.BlockSpec((tb, 1), lambda i: (i, 0))

    y = pl.pallas_call(
        fused_ensemble_kernel,
        out_shape=jax.ShapeDtypeStruct((Bp, 1), F32),
        grid_spec=pltpu.PrefetchScalarGridSpec(
            num_scalar_prefetch=0,
            grid=(Bp // tb,),
            in_specs=in_specs,
            out_specs=out_spec,
        ),
        compiler_params=pltpu.CompilerParams(
            dimension_semantics=("parallel",),
            vmem_limit_bytes=48 * 1024 * 1024,
        ),
    )(x, *flat)
    return y[:B, 0]


# ----------------------------------------------------------------------------
# Deterministic parameter construction (synthetic; mirrors module shapes)
# ----------------------------------------------------------------------------

class KeyGen:
    def __init__(self, key):
        self.key = key

    def __call__(self):
        self.key, k = jax.random.split(self.key)
        return k


def _uniform(key, shape, bound):
    return jax.random.uniform(key, shape, F32, minval=-bound, maxval=bound)


def linear_params(kg, fan_in, fan_out):
    b = 1.0 / np.sqrt(fan_in)
    # stored pre-transposed: (in, out)
    return _uniform(kg(), (fan_in, fan_out), b), _uniform(kg(), (1, fan_out), b)


def conv_params(kg, c_in, c_out, ksize=3):
    b = 1.0 / np.sqrt(c_in * ksize)
    # torch weight (C_out, C_in, K) stored as (K, C_in, C_out); weight_norm folded
    return _uniform(kg(), (ksize, c_in, c_out), b), _uniform(kg(), (1, c_out), b)


def build_params(seed, input_dim):
    kg = KeyGen(jax.random.PRNGKey(seed))
    flat = []

    # --- MLP(42 -> 128 -> 64 -> 1)
    flat += list(linear_params(kg, input_dim, 128))
    flat += list(linear_params(kg, 128, 64))
    flat += list(linear_params(kg, 64, 1))

    # --- TCN(42 -> 64 -> 64 -> 32) + fc(32 -> 1)
    flat += list(conv_params(kg, input_dim, 64))
    flat += list(conv_params(kg, 64, 64))
    flat += list(conv_params(kg, 64, 32))
    flat += list(linear_params(kg, 32, 1))

    # --- LSTM: embed(42->64), 4 layers hidden 64 (gates fused i|g|o), fc(64->1)
    we, be = linear_params(kg, input_dim, 64)
    hb = 1.0 / np.sqrt(64)
    wg_l, bg_l = [], []
    for _ in range(4):
        wi = _uniform(kg(), (64, 64), hb)
        wg = _uniform(kg(), (64, 64), hb)
        wo = _uniform(kg(), (64, 64), hb)
        bi = _uniform(kg(), (1, 64), hb) + _uniform(kg(), (1, 64), hb)   # b_ih + b_hh
        bg = _uniform(kg(), (1, 64), hb) + _uniform(kg(), (1, 64), hb)
        bo = _uniform(kg(), (1, 64), hb) + _uniform(kg(), (1, 64), hb)
        wg_l.append(jnp.concatenate([wi, wg, wo], axis=1))               # (64, 192)
        bg_l.append(jnp.concatenate([bi, bg, bo], axis=1))               # (1, 192)
    wout, bout = linear_params(kg, 64, 1)
    flat += [we, be, jnp.stack(wg_l), jnp.stack(bg_l), wout, bout]

    # --- Transformer: embed(42->64), 4 encoder layers (d=64, ff=128), fc(64->1)
    we, be = linear_params(kg, input_dim, 64)
    wa_l, ba_l, w1_l, b1_l, w2_l, b2_l = [], [], [], [], [], []
    g1_l, t1_l, g2_l, t2_l = [], [], [], []
    for _ in range(4):
        wv, bv = linear_params(kg, 64, 64)        # V projection
        wo, bo = linear_params(kg, 64, 64)        # out_proj
        wa_l.append(wv @ wo)                      # seq_len==1 attention fold
        ba_l.append(bv @ wo + bo)
        w1, b1 = linear_params(kg, 64, 128); w1_l.append(w1); b1_l.append(b1)
        w2, b2 = linear_params(kg, 128, 64); w2_l.append(w2); b2_l.append(b2)
        g1_l.append(jnp.ones((1, 64), F32)); t1_l.append(jnp.zeros((1, 64), F32))
        g2_l.append(jnp.ones((1, 64), F32)); t2_l.append(jnp.zeros((1, 64), F32))
    wf, bf = linear_params(kg, 64, 1)
    flat += [we, be, jnp.stack(wa_l), jnp.stack(ba_l),
             jnp.stack(w1_l), jnp.stack(b1_l), jnp.stack(w2_l), jnp.stack(b2_l),
             jnp.stack(g1_l), jnp.stack(t1_l), jnp.stack(g2_l), jnp.stack(t2_l),
             wf, bf]

    # --- Autoencoder: enc(42->64->32), fc(32->1)  (decoder unused)
    flat += list(linear_params(kg, input_dim, 64))
    flat += list(linear_params(kg, 64, 32))
    flat += list(linear_params(kg, 32, 1))

    # --- Ensemble weights: softmax(MotherNet_output.mean(dim=0)) precomputed
    mothernet_out = jnp.tanh(jax.random.normal(kg(), (4, 5), F32))
    w = jnp.mean(mothernet_out, axis=0).reshape(1, 5)
    flat.append(jax.nn.softmax(w, axis=-1))

    return {"flat": tuple(flat)}


# ----------------------------------------------------------------------------
# Demo
# ----------------------------------------------------------------------------

if __name__ == "__main__":
    B, INPUT_DIM = 8, 42
    key = jax.random.PRNGKey(0)
    x = jax.random.normal(key, (B, INPUT_DIM), F32)

    params = build_params(seed=0, input_dim=INPUT_DIM)
    y = jax.jit(lambda xx: ensemble_forward(xx, params))(x)
    y = jax.block_until_ready(y)

    assert y.shape == (B,)
    assert bool(jnp.all(jnp.isfinite(y)))
    print("KERNEL_OK")
</pallas_src>

<mosaic_0001>
module attributes {stable_mosaic.version = 11 : i64} {
  func.func @fused_ensemble_kernel(%arg0: i32, %arg1: memref<8x42xf32, #tpu.memory_space<vmem>>, %arg2: memref<42x128xf32, #tpu.memory_space<vmem>>, %arg3: memref<1x128xf32, #tpu.memory_space<vmem>>, %arg4: memref<128x64xf32, #tpu.memory_space<vmem>>, %arg5: memref<1x64xf32, #tpu.memory_space<vmem>>, %arg6: memref<64x1xf32, #tpu.memory_space<vmem>>, %arg7: memref<1x1xf32, #tpu.memory_space<vmem>>, %arg8: memref<3x42x64xf32, #tpu.memory_space<vmem>>, %arg9: memref<1x64xf32, #tpu.memory_space<vmem>>, %arg10: memref<3x64x64xf32, #tpu.memory_space<vmem>>, %arg11: memref<1x64xf32, #tpu.memory_space<vmem>>, %arg12: memref<3x64x32xf32, #tpu.memory_space<vmem>>, %arg13: memref<1x32xf32, #tpu.memory_space<vmem>>, %arg14: memref<32x1xf32, #tpu.memory_space<vmem>>, %arg15: memref<1x1xf32, #tpu.memory_space<vmem>>, %arg16: memref<42x64xf32, #tpu.memory_space<vmem>>, %arg17: memref<1x64xf32, #tpu.memory_space<vmem>>, %arg18: memref<4x64x192xf32, #tpu.memory_space<vmem>>, %arg19: memref<4x1x192xf32, #tpu.memory_space<vmem>>, %arg20: memref<64x1xf32, #tpu.memory_space<vmem>>, %arg21: memref<1x1xf32, #tpu.memory_space<vmem>>, %arg22: memref<42x64xf32, #tpu.memory_space<vmem>>, %arg23: memref<1x64xf32, #tpu.memory_space<vmem>>, %arg24: memref<4x64x64xf32, #tpu.memory_space<vmem>>, %arg25: memref<4x1x64xf32, #tpu.memory_space<vmem>>, %arg26: memref<4x64x128xf32, #tpu.memory_space<vmem>>, %arg27: memref<4x1x128xf32, #tpu.memory_space<vmem>>, %arg28: memref<4x128x64xf32, #tpu.memory_space<vmem>>, %arg29: memref<4x1x64xf32, #tpu.memory_space<vmem>>, %arg30: memref<4x1x64xf32, #tpu.memory_space<vmem>>, %arg31: memref<4x1x64xf32, #tpu.memory_space<vmem>>, %arg32: memref<4x1x64xf32, #tpu.memory_space<vmem>>, %arg33: memref<4x1x64xf32, #tpu.memory_space<vmem>>, %arg34: memref<64x1xf32, #tpu.memory_space<vmem>>, %arg35: memref<1x1xf32, #tpu.memory_space<vmem>>, %arg36: memref<42x64xf32, #tpu.memory_space<vmem>>, %arg37: memref<1x64xf32, #tpu.memory_space<vmem>>, %arg38: memref<64x32xf32, #tpu.memory_space<vmem>>, %arg39: memref<1x32xf32, #tpu.memory_space<vmem>>, %arg40: memref<32x1xf32, #tpu.memory_space<vmem>>, %arg41: memref<1x1xf32, #tpu.memory_space<vmem>>, %arg42: memref<1x5xf32, #tpu.memory_space<vmem>>, %arg43: memref<8x1xf32, #tpu.memory_space<vmem>>) attributes {dimension_semantics = [#tpu.dimension_semantics<parallel>], iteration_bounds = array<i64: 1>, scalar_prefetch = 0 : i64, scratch_operands = 0 : i64, tpu.core_type = #tpu.core_type<tc>, window_params = [{transform_indices = @transform_0, window_bounds = array<i64: 8, 42>}, {pipeline_mode = #tpu.pipeline_mode<synchronous>, transform_indices = @transform_1, window_bounds = array<i64: 42, 128>}, {pipeline_mode = #tpu.pipeline_mode<synchronous>, transform_indices = @transform_2, window_bounds = array<i64: 1, 128>}, {pipeline_mode = #tpu.pipeline_mode<synchronous>, transform_indices = @transform_3, window_bounds = array<i64: 128, 64>}, {pipeline_mode = #tpu.pipeline_mode<synchronous>, transform_indices = @transform_4, window_bounds = array<i64: 1, 64>}, {pipeline_mode = #tpu.pipeline_mode<synchronous>, transform_indices = @transform_5, window_bounds = array<i64: 64, 1>}, {pipeline_mode = #tpu.pipeline_mode<synchronous>, transform_indices = @transform_6, window_bounds = array<i64: 1, 1>}, {pipeline_mode = #tpu.pipeline_mode<synchronous>, transform_indices = @transform_7, window_bounds = array<i64: 3, 42, 64>}, {pipeline_mode = #tpu.pipeline_mode<synchronous>, transform_indices = @transform_8, window_bounds = array<i64: 1, 64>}, {pipeline_mode = #tpu.pipeline_mode<synchronous>, transform_indices = @transform_9, window_bounds = array<i64: 3, 64, 64>}, {pipeline_mode = #tpu.pipeline_mode<synchronous>, transform_indices = @transform_10, window_bounds = array<i64: 1, 64>}, {pipeline_mode = #tpu.pipeline_mode<synchronous>, transform_indices = @transform_11, window_bounds = array<i64: 3, 64, 32>}, {pipeline_mode = #tpu.pipeline_mode<synchronous>, transform_indices = @transform_12, window_bounds = array<i64: 1, 32>}, {pipeline_mode = #tpu.pipeline_mode<synchronous>, transform_indices = @transform_13, window_bounds = array<i64: 32, 1>}, {pipeline_mode = #tpu.pipeline_mode<synchronous>, transform_indices = @transform_14, window_bounds = array<i64: 1, 1>}, {pipeline_mode = #tpu.pipeline_mode<synchronous>, transform_indices = @transform_15, window_bounds = array<i64: 42, 64>}, {pipeline_mode = #tpu.pipeline_mode<synchronous>, transform_indices = @transform_16, window_bounds = array<i64: 1, 64>}, {pipeline_mode = #tpu.pipeline_mode<synchronous>, transform_indices = @transform_17, window_bounds = array<i64: 4, 64, 192>}, {pipeline_mode = #tpu.pipeline_mode<synchronous>, transform_indices = @transform_18, window_bounds = array<i64: 4, 1, 192>}, {pipeline_mode = #tpu.pipeline_mode<synchronous>, transform_indices = @transform_19, window_bounds = array<i64: 64, 1>}, {pipeline_mode = #tpu.pipeline_mode<synchronous>, transform_indices = @transform_20, window_bounds = array<i64: 1, 1>}, {pipeline_mode = #tpu.pipeline_mode<synchronous>, transform_indices = @transform_21, window_bounds = array<i64: 42, 64>}, {pipeline_mode = #tpu.pipeline_mode<synchronous>, transform_indices = @transform_22, window_bounds = array<i64: 1, 64>}, {pipeline_mode = #tpu.pipeline_mode<synchronous>, transform_indices = @transform_23, window_bounds = array<i64: 4, 64, 64>}, {pipeline_mode = #tpu.pipeline_mode<synchronous>, transform_indices = @transform_24, window_bounds = array<i64: 4, 1, 64>}, {pipeline_mode = #tpu.pipeline_mode<synchronous>, transform_indices = @transform_25, window_bounds = array<i64: 4, 64, 128>}, {pipeline_mode = #tpu.pipeline_mode<synchronous>, transform_indices = @transform_26, window_bounds = array<i64: 4, 1, 128>}, {pipeline_mode = #tpu.pipeline_mode<synchronous>, transform_indices = @transform_27, window_bounds = array<i64: 4, 128, 64>}, {pipeline_mode = #tpu.pipeline_mode<synchronous>, transform_indices = @transform_28, window_bounds = array<i64: 4, 1, 64>}, {pipeline_mode = #tpu.pipeline_mode<synchronous>, transform_indices = @transform_29, window_bounds = array<i64: 4, 1, 64>}, {pipeline_mode = #tpu.pipeline_mode<synchronous>, transform_indices = @transform_30, window_bounds = array<i64: 4, 1, 64>}, {pipeline_mode = #tpu.pipeline_mode<synchronous>, transform_indices = @transform_31, window_bounds = array<i64: 4, 1, 64>}, {pipeline_mode = #tpu.pipeline_mode<synchronous>, transform_indices = @transform_32, window_bounds = array<i64: 4, 1, 64>}, {pipeline_mode = #tpu.pipeline_mode<synchronous>, transform_indices = @transform_33, window_bounds = array<i64: 64, 1>}, {pipeline_mode = #tpu.pipeline_mode<synchronous>, transform_indices = @transform_34, window_bounds = array<i64: 1, 1>}, {pipeline_mode = #tpu.pipeline_mode<synchronous>, transform_indices = @transform_35, window_bounds = array<i64: 42, 64>}, {pipeline_mode = #tpu.pipeline_mode<synchronous>, transform_indices = @transform_36, window_bounds = array<i64: 1, 64>}, {pipeline_mode = #tpu.pipeline_mode<synchronous>, transform_indices = @transform_37, window_bounds = array<i64: 64, 32>}, {pipeline_mode = #tpu.pipeline_mode<synchronous>, transform_indices = @transform_38, window_bounds = array<i64: 1, 32>}, {pipeline_mode = #tpu.pipeline_mode<synchronous>, transform_indices = @transform_39, window_bounds = array<i64: 32, 1>}, {pipeline_mode = #tpu.pipeline_mode<synchronous>, transform_indices = @transform_40, window_bounds = array<i64: 1, 1>}, {pipeline_mode = #tpu.pipeline_mode<synchronous>, transform_indices = @transform_41, window_bounds = array<i64: 1, 5>}, {transform_indices = @transform_42, window_bounds = array<i64: 8, 1>}]} {
    %c0 = arith.constant 0 : index
    %c0_0 = arith.constant 0 : index
    %0 = vector.load %arg1[%c0, %c0_0] : memref<8x42xf32, #tpu.memory_space<vmem>>, vector<8x42xf32>
    %c0_1 = arith.constant 0 : index
    %c0_2 = arith.constant 0 : index
    %1 = vector.load %arg2[%c0_1, %c0_2] : memref<42x128xf32, #tpu.memory_space<vmem>>, vector<42x128xf32>
    %cst = arith.constant dense<0.000000e+00> : vector<8x128xf32>
    %2 = tpu.matmul %0, %1, %cst {dimension_numbers = #tpu.dot_dimension_numbers<[1], [0], [0], [1], [0, 0, 1, 1], [], []>} : vector<8x42xf32>, vector<42x128xf32>, vector<8x128xf32> -> vector<8x128xf32>
    %c0_3 = arith.constant 0 : index
    %c0_4 = arith.constant 0 : index
    %3 = vector.load %arg3[%c0_3, %c0_4] : memref<1x128xf32, #tpu.memory_space<vmem>>, vector<1x128xf32>
    %4 = vector.broadcast %3 : vector<1x128xf32> to vector<8x128xf32>
    %5 = arith.addf %2, %4 : vector<8x128xf32>
    %cst_5 = arith.constant 0.000000e+00 : f32
    %6 = vector.broadcast %cst_5 : f32 to vector<8x128xf32>
    %7 = arith.maximumf %5, %6 : vector<8x128xf32>
    %c0_6 = arith.constant 0 : index
    %c0_7 = arith.constant 0 : index
    %8 = vector.load %arg4[%c0_6, %c0_7] : memref<128x64xf32, #tpu.memory_space<vmem>>, vector<128x64xf32>
    %cst_8 = arith.constant dense<0.000000e+00> : vector<8x64xf32>
    %9 = tpu.matmul %7, %8, %cst_8 {dimension_numbers = #tpu.dot_dimension_numbers<[1], [0], [0], [1], [0, 0, 1, 1], [], []>} : vector<8x128xf32>, vector<128x64xf32>, vector<8x64xf32> -> vector<8x64xf32>
    %c0_9 = arith.constant 0 : index
    %c0_10 = arith.constant 0 : index
    %10 = vector.load %arg5[%c0_9, %c0_10] : memref<1x64xf32, #tpu.memory_space<vmem>>, vector<1x64xf32>
    %11 = vector.broadcast %10 : vector<1x64xf32> to vector<8x64xf32>
    %12 = arith.addf %9, %11 : vector<8x64xf32>
    %cst_11 = arith.constant 0.000000e+00 : f32
    %13 = vector.broadcast %cst_11 : f32 to vector<8x64xf32>
    %14 = arith.maximumf %12, %13 : vector<8x64xf32>
    %c0_12 = arith.constant 0 : index
    %c0_13 = arith.constant 0 : index
    %15 = vector.load %arg6[%c0_12, %c0_13] : memref<64x1xf32, #tpu.memory_space<vmem>>, vector<64x1xf32>
    %cst_14 = arith.constant dense<0.000000e+00> : vector<8x1xf32>
    %16 = tpu.matmul %14, %15, %cst_14 {dimension_numbers = #tpu.dot_dimension_numbers<[1], [0], [0], [1], [0, 0, 1, 1], [], []>} : vector<8x64xf32>, vector<64x1xf32>, vector<8x1xf32> -> vector<8x1xf32>
    %c0_15 = arith.constant 0 : index
    %c0_16 = arith.constant 0 : index
    %17 = vector.load %arg7[%c0_15, %c0_16] : memref<1x1xf32, #tpu.memory_space<vmem>>, vector<1x1xf32>
    %18 = vector.broadcast %17 : vector<1x1xf32> to vector<8x1xf32>
    %19 = arith.addf %16, %18 : vector<8x1xf32>
    %20 = arith.negf %19 : vector<8x1xf32>
    %21 = math.exp %20 : vector<8x1xf32>
    %cst_17 = arith.constant 1.000000e+00 : f32
    %22 = vector.broadcast %cst_17 : f32 to vector<8x1xf32>
    %23 = arith.addf %22, %21 : vector<8x1xf32>
    %24 = arith.divf %22, %23 : vector<8x1xf32>
    %c0_18 = arith.constant 0 : index
    %c0_19 = arith.constant 0 : index
    %25 = vector.load %arg9[%c0_18, %c0_19] : memref<1x64xf32, #tpu.memory_space<vmem>>, vector<1x64xf32>
    %c0_20 = arith.constant 0 : index
    %c0_21 = arith.constant 0 : index
    %c0_22 = arith.constant 0 : index
    %26 = vector.load %arg8[%c0_20, %c0_21, %c0_22] : memref<3x42x64xf32, #tpu.memory_space<vmem>>, vector<1x42x64xf32>
    %27 = vector.shape_cast %26 : vector<1x42x64xf32> to vector<42x64xf32>
    %cst_23 = arith.constant dense<0.000000e+00> : vector<8x64xf32>
    %28 = tpu.matmul %0, %27, %cst_23 {dimension_numbers = #tpu.dot_dimension_numbers<[1], [0], [0], [1], [0, 0, 1, 1], [], []>} : vector<8x42xf32>, vector<42x64xf32>, vector<8x64xf32> -> vector<8x64xf32>
    %c1 = arith.constant 1 : index
    %c0_24 = arith.constant 0 : index
    %c0_25 = arith.constant 0 : index
    %29 = vector.load %arg8[%c1, %c0_24, %c0_25] : memref<3x42x64xf32, #tpu.memory_space<vmem>>, vector<1x42x64xf32>
    %30 = vector.shape_cast %29 : vector<1x42x64xf32> to vector<42x64xf32>
    %cst_26 = arith.constant dense<0.000000e+00> : vector<8x64xf32>
    %31 = tpu.matmul %0, %30, %cst_26 {dimension_numbers = #tpu.dot_dimension_numbers<[1], [0], [0], [1], [0, 0, 1, 1], [], []>} : vector<8x42xf32>, vector<42x64xf32>, vector<8x64xf32> -> vector<8x64xf32>
    %c2 = arith.constant 2 : index
    %c0_27 = arith.constant 0 : index
    %c0_28 = arith.constant 0 : index
    %32 = vector.load %arg8[%c2, %c0_27, %c0_28] : memref<3x42x64xf32, #tpu.memory_space<vmem>>, vector<1x42x64xf32>
    %33 = vector.shape_cast %32 : vector<1x42x64xf32> to vector<42x64xf32>
    %cst_29 = arith.constant dense<0.000000e+00> : vector<8x64xf32>
    %34 = tpu.matmul %0, %33, %cst_29 {dimension_numbers = #tpu.dot_dimension_numbers<[1], [0], [0], [1], [0, 0, 1, 1], [], []>} : vector<8x42xf32>, vector<42x64xf32>, vector<8x64xf32> -> vector<8x64xf32>
    %35 = vector.broadcast %25 : vector<1x64xf32> to vector<8x64xf32>
    %36 = arith.addf %34, %35 : vector<8x64xf32>
    %cst_30 = arith.constant 0.000000e+00 : f32
    %37 = vector.broadcast %cst_30 : f32 to vector<8x64xf32>
    %38 = arith.maximumf %36, %37 : vector<8x64xf32>
    %39 = vector.broadcast %25 : vector<1x64xf32> to vector<8x64xf32>
    %40 = arith.addf %31, %39 : vector<8x64xf32>
    %cst_31 = arith.constant 0.000000e+00 : f32
    %41 = vector.broadcast %cst_31 : f32 to vector<8x64xf32>
    %42 = arith.maximumf %40, %41 : vector<8x64xf32>
    %43 = vector.broadcast %25 : vector<1x64xf32> to vector<8x64xf32>
    %44 = arith.addf %28, %43 : vector<8x64xf32>
    %cst_32 = arith.constant 0.000000e+00 : f32
    %45 = vector.broadcast %cst_32 : f32 to vector<8x64xf32>
    %46 = arith.maximumf %44, %45 : vector<8x64xf32>
    %c0_33 = arith.constant 0 : index
    %c0_34 = arith.constant 0 : index
    %47 = vector.load %arg11[%c0_33, %c0_34] : memref<1x64xf32, #tpu.memory_space<vmem>>, vector<1x64xf32>
    %48 = tpu.concatenate %38, %42, %46 in 0 : vector<8x64xf32>, vector<8x64xf32>, vector<8x64xf32> -> vector<24x64xf32>
    %c0_35 = arith.constant 0 : index
    %c0_36 = arith.constant 0 : index
    %c0_37 = arith.constant 0 : index
    %49 = vector.load %arg10[%c0_35, %c0_36, %c0_37] : memref<3x64x64xf32, #tpu.memory_space<vmem>>, vector<1x64x64xf32>
    %50 = vector.shape_cast %49 : vector<1x64x64xf32> to vector<64x64xf32>
    %cst_38 = arith.constant dense<0.000000e+00> : vector<24x64xf32>
    %51 = tpu.matmul %48, %50, %cst_38 {dimension_numbers = #tpu.dot_dimension_numbers<[1], [0], [0], [1], [0, 0, 1, 1], [], []>} : vector<24x64xf32>, vector<64x64xf32>, vector<24x64xf32> -> vector<24x64xf32>
    %c1_39 = arith.constant 1 : index
    %c0_40 = arith.constant 0 : index
    %c0_41 = arith.constant 0 : index
    %52 = vector.load %arg10[%c1_39, %c0_40, %c0_41] : memref<3x64x64xf32, #tpu.memory_space<vmem>>, vector<1x64x64xf32>
    %53 = vector.shape_cast %52 : vector<1x64x64xf32> to vector<64x64xf32>
    %cst_42 = arith.constant dense<0.000000e+00> : vector<24x64xf32>
    %54 = tpu.matmul %48, %53, %cst_42 {dimension_numbers = #tpu.dot_dimension_numbers<[1], [0], [0], [1], [0, 0, 1, 1], [], []>} : vector<24x64xf32>, vector<64x64xf32>, vector<24x64xf32> -> vector<24x64xf32>
    %c2_43 = arith.constant 2 : index
    %c0_44 = arith.constant 0 : index
    %c0_45 = arith.constant 0 : index
    %55 = vector.load %arg10[%c2_43, %c0_44, %c0_45] : memref<3x64x64xf32, #tpu.memory_space<vmem>>, vector<1x64x64xf32>
    %56 = vector.shape_cast %55 : vector<1x64x64xf32> to vector<64x64xf32>
    %cst_46 = arith.constant dense<0.000000e+00> : vector<24x64xf32>
    %57 = tpu.matmul %48, %56, %cst_46 {dimension_numbers = #tpu.dot_dimension_numbers<[1], [0], [0], [1], [0, 0, 1, 1], [], []>} : vector<24x64xf32>, vector<64x64xf32>, vector<24x64xf32> -> vector<24x64xf32>
    %58 = vector.extract_strided_slice %57 {offsets = [0, 0], sizes = [8, 64], strides = [1, 1]} : vector<24x64xf32> to vector<8x64xf32>
    %59 = vector.broadcast %47 : vector<1x64xf32> to vector<8x64xf32>
    %60 = arith.addf %58, %59 : vector<8x64xf32>
    %cst_47 = arith.constant 0.000000e+00 : f32
    %61 = vector.broadcast %cst_47 : f32 to vector<8x64xf32>
    %62 = arith.maximumf %60, %61 : vector<8x64xf32>
    %63 = vector.extract_strided_slice %57 {offsets = [8, 0], sizes = [8, 64], strides = [1, 1]} : vector<24x64xf32> to vector<8x64xf32>
    %64 = vector.broadcast %47 : vector<1x64xf32> to vector<8x64xf32>
    %65 = arith.addf %63, %64 : vector<8x64xf32>
    %cst_48 = arith.constant 0.000000e+00 : f32
    %66 = vector.broadcast %cst_48 : f32 to vector<8x64xf32>
    %67 = arith.maximumf %65, %66 : vector<8x64xf32>
    %68 = vector.extract_strided_slice %54 {offsets = [0, 0], sizes = [8, 64], strides = [1, 1]} : vector<24x64xf32> to vector<8x64xf32>
    %69 = vector.extract_strided_slice %57 {offsets = [16, 0], sizes = [8, 64], strides = [1, 1]} : vector<24x64xf32> to vector<8x64xf32>
    %70 = arith.addf %68, %69 : vector<8x64xf32>
    %71 = vector.broadcast %47 : vector<1x64xf32> to vector<8x64xf32>
    %72 = arith.addf %70, %71 : vector<8x64xf32>
    %cst_49 = arith.constant 0.000000e+00 : f32
    %73 = vector.broadcast %cst_49 : f32 to vector<8x64xf32>
    %74 = arith.maximumf %72, %73 : vector<8x64xf32>
    %75 = vector.extract_strided_slice %54 {offsets = [8, 0], sizes = [8, 64], strides = [1, 1]} : vector<24x64xf32> to vector<8x64xf32>
    %76 = vector.broadcast %47 : vector<1x64xf32> to vector<8x64xf32>
    %77 = arith.addf %75, %76 : vector<8x64xf32>
    %cst_50 = arith.constant 0.000000e+00 : f32
    %78 = vector.broadcast %cst_50 : f32 to vector<8x64xf32>
    %79 = arith.maximumf %77, %78 : vector<8x64xf32>
    %80 = vector.extract_strided_slice %51 {offsets = [0, 0], sizes = [8, 64], strides = [1, 1]} : vector<24x64xf32> to vector<8x64xf32>
    %81 = vector.extract_strided_slice %54 {offsets = [16, 0], sizes = [8, 64], strides = [1, 1]} : vector<24x64xf32> to vector<8x64xf32>
    %82 = arith.addf %80, %81 : vector<8x64xf32>
    %83 = vector.broadcast %47 : vector<1x64xf32> to vector<8x64xf32>
    %84 = arith.addf %82, %83 : vector<8x64xf32>
    %cst_51 = arith.constant 0.000000e+00 : f32
    %85 = vector.broadcast %cst_51 : f32 to vector<8x64xf32>
    %86 = arith.maximumf %84, %85 : vector<8x64xf32>
    %87 = vector.extract_strided_slice %51 {offsets = [8, 0], sizes = [8, 64], strides = [1, 1]} : vector<24x64xf32> to vector<8x64xf32>
    %88 = vector.broadcast %47 : vector<1x64xf32> to vector<8x64xf32>
    %89 = arith.addf %87, %88 : vector<8x64xf32>
    %cst_52 = arith.constant 0.000000e+00 : f32
    %90 = vector.broadcast %cst_52 : f32 to vector<8x64xf32>
    %91 = arith.maximumf %89, %90 : vector<8x64xf32>
    %92 = vector.extract_strided_slice %51 {offsets = [16, 0], sizes = [8, 64], strides = [1, 1]} : vector<24x64xf32> to vector<8x64xf32>
    %93 = vector.broadcast %47 : vector<1x64xf32> to vector<8x64xf32>
    %94 = arith.addf %92, %93 : vector<8x64xf32>
    %cst_53 = arith.constant 0.000000e+00 : f32
    %95 = vector.broadcast %cst_53 : f32 to vector<8x64xf32>
    %96 = arith.maximumf %94, %95 : vector<8x64xf32>
    %c0_54 = arith.constant 0 : index
    %c0_55 = arith.constant 0 : index
    %97 = vector.load %arg13[%c0_54, %c0_55] : memref<1x32xf32, #tpu.memory_space<vmem>>, vector<1x32xf32>
    %98 = tpu.concatenate %62, %67, %74, %79, %86, %91, %96 in 0 : vector<8x64xf32>, vector<8x64xf32>, vector<8x64xf32>, vector<8x64xf32>, vector<8x64xf32>, vector<8x64xf32>, vector<8x64xf32> -> vector<56x64xf32>
    %c0_56 = arith.constant 0 : index
    %c0_57 = arith.constant 0 : index
    %c0_58 = arith.constant 0 : index
    %99 = vector.load %arg12[%c0_56, %c0_57, %c0_58] : memref<3x64x32xf32, #tpu.memory_space<vmem>>, vector<1x64x32xf32>
    %100 = vector.shape_cast %99 : vector<1x64x32xf32> to vector<64x32xf32>
    %cst_59 = arith.constant dense<0.000000e+00> : vector<56x32xf32>
    %101 = tpu.matmul %98, %100, %cst_59 {dimension_numbers = #tpu.dot_dimension_numbers<[1], [0], [0], [1], [0, 0, 1, 1], [], []>} : vector<56x64xf32>, vector<64x32xf32>, vector<56x32xf32> -> vector<56x32xf32>
    %c1_60 = arith.constant 1 : index
    %c0_61 = arith.constant 0 : index
    %c0_62 = arith.constant 0 : index
    %102 = vector.load %arg12[%c1_60, %c0_61, %c0_62] : memref<3x64x32xf32, #tpu.memory_space<vmem>>, vector<1x64x32xf32>
    %103 = vector.shape_cast %102 : vector<1x64x32xf32> to vector<64x32xf32>
    %cst_63 = arith.constant dense<0.000000e+00> : vector<56x32xf32>
    %104 = tpu.matmul %98, %103, %cst_63 {dimension_numbers = #tpu.dot_dimension_numbers<[1], [0], [0], [1], [0, 0, 1, 1], [], []>} : vector<56x64xf32>, vector<64x32xf32>, vector<56x32xf32> -> vector<56x32xf32>
    %c2_64 = arith.constant 2 : index
    %c0_65 = arith.constant 0 : index
    %c0_66 = arith.constant 0 : index
    %105 = vector.load %arg12[%c2_64, %c0_65, %c0_66] : memref<3x64x32xf32, #tpu.memory_space<vmem>>, vector<1x64x32xf32>
    %106 = vector.shape_cast %105 : vector<1x64x32xf32> to vector<64x32xf32>
    %cst_67 = arith.constant dense<0.000000e+00> : vector<56x32xf32>
    %107 = tpu.matmul %98, %106, %cst_67 {dimension_numbers = #tpu.dot_dimension_numbers<[1], [0], [0], [1], [0, 0, 1, 1], [], []>} : vector<56x64xf32>, vector<64x32xf32>, vector<56x32xf32> -> vector<56x32xf32>
    %108 = vector.extract_strided_slice %107 {offsets = [0, 0], sizes = [8, 32], strides = [1, 1]} : vector<56x32xf32> to vector<8x32xf32>
    %109 = vector.broadcast %97 : vector<1x32xf32> to vector<8x32xf32>
    %110 = arith.addf %108, %109 : vector<8x32xf32>
    %cst_68 = arith.constant 0.000000e+00 : f32
    %111 = vector.broadcast %cst_68 : f32 to vector<8x32xf32>
    %112 = arith.maximumf %110, %111 : vector<8x32xf32>
    %113 = vector.extract_strided_slice %107 {offsets = [8, 0], sizes = [8, 32], strides = [1, 1]} : vector<56x32xf32> to vector<8x32xf32>
    %114 = vector.broadcast %97 : vector<1x32xf32> to vector<8x32xf32>
    %115 = arith.addf %113, %114 : vector<8x32xf32>
    %cst_69 = arith.constant 0.000000e+00 : f32
    %116 = vector.broadcast %cst_69 : f32 to vector<8x32xf32>
    %117 = arith.maximumf %115, %116 : vector<8x32xf32>
    %118 = vector.extract_strided_slice %107 {offsets = [16, 0], sizes = [8, 32], strides = [1, 1]} : vector<56x32xf32> to vector<8x32xf32>
    %119 = vector.broadcast %97 : vector<1x32xf32> to vector<8x32xf32>
    %120 = arith.addf %118, %119 : vector<8x32xf32>
    %cst_70 = arith.constant 0.000000e+00 : f32
    %121 = vector.broadcast %cst_70 : f32 to vector<8x32xf32>
    %122 = arith.maximumf %120, %121 : vector<8x32xf32>
    %123 = vector.extract_strided_slice %107 {offsets = [24, 0], sizes = [8, 32], strides = [1, 1]} : vector<56x32xf32> to vector<8x32xf32>
    %124 = vector.broadcast %97 : vector<1x32xf32> to vector<8x32xf32>
    %125 = arith.addf %123, %124 : vector<8x32xf32>
    %cst_71 = arith.constant 0.000000e+00 : f32
    %126 = vector.broadcast %cst_71 : f32 to vector<8x32xf32>
    %127 = arith.maximumf %125, %126 : vector<8x32xf32>
    %128 = vector.extract_strided_slice %104 {offsets = [0, 0], sizes = [8, 32], strides = [1, 1]} : vector<56x32xf32> to vector<8x32xf32>
    %129 = vector.extract_strided_slice %107 {offsets = [32, 0], sizes = [8, 32], strides = [1, 1]} : vector<56x32xf32> to vector<8x32xf32>
    %130 = arith.addf %128, %129 : vector<8x32xf32>
    %131 = vector.broadcast %97 : vector<1x32xf32> to vector<8x32xf32>
    %132 = arith.addf %130, %131 : vector<8x32xf32>
    %cst_72 = arith.constant 0.000000e+00 : f32
    %133 = vector.broadcast %cst_72 : f32 to vector<8x32xf32>
    %134 = arith.maximumf %132, %133 : vector<8x32xf32>
    %135 = vector.extract_strided_slice %104 {offsets = [8, 0], sizes = [8, 32], strides = [1, 1]} : vector<56x32xf32> to vector<8x32xf32>
    %136 = vector.extract_strided_slice %107 {offsets = [40, 0], sizes = [8, 32], strides = [1, 1]} : vector<56x32xf32> to vector<8x32xf32>
    %137 = arith.addf %135, %136 : vector<8x32xf32>
    %138 = vector.broadcast %97 : vector<1x32xf32> to vector<8x32xf32>
    %139 = arith.addf %137, %138 : vector<8x32xf32>
    %cst_73 = arith.constant 0.000000e+00 : f32
    %140 = vector.broadcast %cst_73 : f32 to vector<8x32xf32>
    %141 = arith.maximumf %139, %140 : vector<8x32xf32>
    %142 = vector.extract_strided_slice %104 {offsets = [16, 0], sizes = [8, 32], strides = [1, 1]} : vector<56x32xf32> to vector<8x32xf32>
    %143 = vector.extract_strided_slice %107 {offsets = [48, 0], sizes = [8, 32], strides = [1, 1]} : vector<56x32xf32> to vector<8x32xf32>
    %144 = arith.addf %142, %143 : vector<8x32xf32>
    %145 = vector.broadcast %97 : vector<1x32xf32> to vector<8x32xf32>
    %146 = arith.addf %144, %145 : vector<8x32xf32>
    %cst_74 = arith.constant 0.000000e+00 : f32
    %147 = vector.broadcast %cst_74 : f32 to vector<8x32xf32>
    %148 = arith.maximumf %146, %147 : vector<8x32xf32>
    %149 = vector.extract_strided_slice %104 {offsets = [24, 0], sizes = [8, 32], strides = [1, 1]} : vector<56x32xf32> to vector<8x32xf32>
    %150 = vector.broadcast %97 : vector<1x32xf32> to vector<8x32xf32>
    %151 = arith.addf %149, %150 : vector<8x32xf32>
    %cst_75 = arith.constant 0.000000e+00 : f32
    %152 = vector.broadcast %cst_75 : f32 to vector<8x32xf32>
    %153 = arith.maximumf %151, %152 : vector<8x32xf32>
    %154 = vector.extract_strided_slice %101 {offsets = [0, 0], sizes = [8, 32], strides = [1, 1]} : vector<56x32xf32> to vector<8x32xf32>
    %155 = vector.extract_strided_slice %104 {offsets = [32, 0], sizes = [8, 32], strides = [1, 1]} : vector<56x32xf32> to vector<8x32xf32>
    %156 = arith.addf %154, %155 : vector<8x32xf32>
    %157 = vector.broadcast %97 : vector<1x32xf32> to vector<8x32xf32>
    %158 = arith.addf %156, %157 : vector<8x32xf32>
    %cst_76 = arith.constant 0.000000e+00 : f32
    %159 = vector.broadcast %cst_76 : f32 to vector<8x32xf32>
    %160 = arith.maximumf %158, %159 : vector<8x32xf32>
    %161 = vector.extract_strided_slice %101 {offsets = [8, 0], sizes = [8, 32], strides = [1, 1]} : vector<56x32xf32> to vector<8x32xf32>
    %162 = vector.extract_strided_slice %104 {offsets = [40, 0], sizes = [8, 32], strides = [1, 1]} : vector<56x32xf32> to vector<8x32xf32>
    %163 = arith.addf %161, %162 : vector<8x32xf32>
    %164 = vector.broadcast %97 : vector<1x32xf32> to vector<8x32xf32>
    %165 = arith.addf %163, %164 : vector<8x32xf32>
    %cst_77 = arith.constant 0.000000e+00 : f32
    %166 = vector.broadcast %cst_77 : f32 to vector<8x32xf32>
    %167 = arith.maximumf %165, %166 : vector<8x32xf32>
    %168 = vector.extract_strided_slice %101 {offsets = [16, 0], sizes = [8, 32], strides = [1, 1]} : vector<56x32xf32> to vector<8x32xf32>
    %169 = vector.extract_strided_slice %104 {offsets = [48, 0], sizes = [8, 32], strides = [1, 1]} : vector<56x32xf32> to vector<8x32xf32>
    %170 = arith.addf %168, %169 : vector<8x32xf32>
    %171 = vector.broadcast %97 : vector<1x32xf32> to vector<8x32xf32>
    %172 = arith.addf %170, %171 : vector<8x32xf32>
    %cst_78 = arith.constant 0.000000e+00 : f32
    %173 = vector.broadcast %cst_78 : f32 to vector<8x32xf32>
    %174 = arith.maximumf %172, %173 : vector<8x32xf32>
    %175 = vector.extract_strided_slice %101 {offsets = [24, 0], sizes = [8, 32], strides = [1, 1]} : vector<56x32xf32> to vector<8x32xf32>
    %176 = vector.broadcast %97 : vector<1x32xf32> to vector<8x32xf32>
    %177 = arith.addf %175, %176 : vector<8x32xf32>
    %cst_79 = arith.constant 0.000000e+00 : f32
    %178 = vector.broadcast %cst_79 : f32 to vector<8x32xf32>
    %179 = arith.maximumf %177, %178 : vector<8x32xf32>
    %180 = vector.extract_strided_slice %101 {offsets = [32, 0], sizes = [8, 32], strides = [1, 1]} : vector<56x32xf32> to vector<8x32xf32>
    %181 = vector.broadcast %97 : vector<1x32xf32> to vector<8x32xf32>
    %182 = arith.addf %180, %181 : vector<8x32xf32>
    %cst_80 = arith.constant 0.000000e+00 : f32
    %183 = vector.broadcast %cst_80 : f32 to vector<8x32xf32>
    %184 = arith.maximumf %182, %183 : vector<8x32xf32>
    %185 = vector.extract_strided_slice %101 {offsets = [40, 0], sizes = [8, 32], strides = [1, 1]} : vector<56x32xf32> to vector<8x32xf32>
    %186 = vector.broadcast %97 : vector<1x32xf32> to vector<8x32xf32>
    %187 = arith.addf %185, %186 : vector<8x32xf32>
    %cst_81 = arith.constant 0.000000e+00 : f32
    %188 = vector.broadcast %cst_81 : f32 to vector<8x32xf32>
    %189 = arith.maximumf %187, %188 : vector<8x32xf32>
    %190 = vector.extract_strided_slice %101 {offsets = [48, 0], sizes = [8, 32], strides = [1, 1]} : vector<56x32xf32> to vector<8x32xf32>
    %191 = vector.broadcast %97 : vector<1x32xf32> to vector<8x32xf32>
    %192 = arith.addf %190, %191 : vector<8x32xf32>
    %cst_82 = arith.constant 0.000000e+00 : f32
    %193 = vector.broadcast %cst_82 : f32 to vector<8x32xf32>
    %194 = arith.maximumf %192, %193 : vector<8x32xf32>
    %195 = arith.addf %112, %117 : vector<8x32xf32>
    %196 = arith.addf %195, %122 : vector<8x32xf32>
    %197 = arith.addf %196, %127 : vector<8x32xf32>
    %198 = arith.addf %197, %134 : vector<8x32xf32>
    %199 = arith.addf %198, %141 : vector<8x32xf32>
    %200 = arith.addf %199, %148 : vector<8x32xf32>
    %201 = arith.addf %200, %153 : vector<8x32xf32>
    %202 = arith.addf %201, %160 : vector<8x32xf32>
    %203 = arith.addf %202, %167 : vector<8x32xf32>
    %204 = arith.addf %203, %174 : vector<8x32xf32>
    %205 = arith.addf %204, %179 : vector<8x32xf32>
    %206 = arith.addf %205, %184 : vector<8x32xf32>
    %207 = arith.addf %206, %189 : vector<8x32xf32>
    %208 = arith.addf %207, %194 : vector<8x32xf32>
    %cst_83 = arith.constant 0.0666666701 : f32
    %209 = vector.broadcast %cst_83 : f32 to vector<8x32xf32>
    %210 = arith.mulf %208, %209 : vector<8x32xf32>
    %c0_84 = arith.constant 0 : index
    %c0_85 = arith.constant 0 : index
    %211 = vector.load %arg14[%c0_84, %c0_85] : memref<32x1xf32, #tpu.memory_space<vmem>>, vector<32x1xf32>
    %cst_86 = arith.constant dense<0.000000e+00> : vector<8x1xf32>
    %212 = tpu.matmul %210, %211, %cst_86 {dimension_numbers = #tpu.dot_dimension_numbers<[1], [0], [0], [1], [0, 0, 1, 1], [], []>} : vector<8x32xf32>, vector<32x1xf32>, vector<8x1xf32> -> vector<8x1xf32>
    %c0_87 = arith.constant 0 : index
    %c0_88 = arith.constant 0 : index
    %213 = vector.load %arg15[%c0_87, %c0_88] : memref<1x1xf32, #tpu.memory_space<vmem>>, vector<1x1xf32>
    %214 = vector.broadcast %213 : vector<1x1xf32> to vector<8x1xf32>
    %215 = arith.addf %212, %214 : vector<8x1xf32>
    %216 = arith.negf %215 : vector<8x1xf32>
    %217 = math.exp %216 : vector<8x1xf32>
    %cst_89 = arith.constant 1.000000e+00 : f32
    %218 = vector.broadcast %cst_89 : f32 to vector<8x1xf32>
    %219 = arith.addf %218, %217 : vector<8x1xf32>
    %220 = arith.divf %218, %219 : vector<8x1xf32>
    %c0_90 = arith.constant 0 : index
    %c0_91 = arith.constant 0 : index
    %221 = vector.load %arg16[%c0_90, %c0_91] : memref<42x64xf32, #tpu.memory_space<vmem>>, vector<42x64xf32>
    %cst_92 = arith.constant dense<0.000000e+00> : vector<8x64xf32>
    %222 = tpu.matmul %0, %221, %cst_92 {dimension_numbers = #tpu.dot_dimension_numbers<[1], [0], [0], [1], [0, 0, 1, 1], [], []>} : vector<8x42xf32>, vector<42x64xf32>, vector<8x64xf32> -> vector<8x64xf32>
    %c0_93 = arith.constant 0 : index
    %c0_94 = arith.constant 0 : index
    %223 = vector.load %arg17[%c0_93, %c0_94] : memref<1x64xf32, #tpu.memory_space<vmem>>, vector<1x64xf32>
    %224 = vector.broadcast %223 : vector<1x64xf32> to vector<8x64xf32>
    %225 = arith.addf %222, %224 : vector<8x64xf32>
    %c0_95 = arith.constant 0 : index
    %c0_96 = arith.constant 0 : index
    %c0_97 = arith.constant 0 : index
    %226 = vector.load %arg18[%c0_95, %c0_96, %c0_97] : memref<4x64x192xf32, #tpu.memory_space<vmem>>, vector<1x64x192xf32>
    %227 = vector.shape_cast %226 : vector<1x64x192xf32> to vector<64x192xf32>
    %cst_98 = arith.constant dense<0.000000e+00> : vector<8x192xf32>
    %228 = tpu.matmul %225, %227, %cst_98 {dimension_numbers = #tpu.dot_dimension_numbers<[1], [0], [0], [1], [0, 0, 1, 1], [], []>} : vector<8x64xf32>, vector<64x192xf32>, vector<8x192xf32> -> vector<8x192xf32>
    %c0_99 = arith.constant 0 : index
    %c0_100 = arith.constant 0 : index
    %c0_101 = arith.constant 0 : index
    %229 = vector.load %arg19[%c0_99, %c0_100, %c0_101] : memref<4x1x192xf32, #tpu.memory_space<vmem>>, vector<1x1x192xf32>
    %230 = vector.shape_cast %229 : vector<1x1x192xf32> to vector<1x192xf32>
    %231 = vector.broadcast %230 : vector<1x192xf32> to vector<8x192xf32>
    %232 = arith.addf %228, %231 : vector<8x192xf32>
    %233 = vector.extract_strided_slice %232 {offsets = [0, 0], sizes = [8, 64], strides = [1, 1]} : vector<8x192xf32> to vector<8x64xf32>
    %234 = arith.negf %233 : vector<8x64xf32>
    %235 = math.exp %234 : vector<8x64xf32>
    %cst_102 = arith.constant 1.000000e+00 : f32
    %236 = vector.broadcast %cst_102 : f32 to vector<8x64xf32>
    %237 = arith.addf %236, %235 : vector<8x64xf32>
    %238 = arith.divf %236, %237 : vector<8x64xf32>
    %239 = vector.extract_strided_slice %232 {offsets = [0, 64], sizes = [8, 64], strides = [1, 1]} : vector<8x192xf32> to vector<8x64xf32>
    %240 = math.tanh %239 : vector<8x64xf32>
    %241 = vector.extract_strided_slice %232 {offsets = [0, 128], sizes = [8, 64], strides = [1, 1]} : vector<8x192xf32> to vector<8x64xf32>
    %242 = arith.negf %241 : vector<8x64xf32>
    %243 = math.exp %242 : vector<8x64xf32>
    %cst_103 = arith.constant 1.000000e+00 : f32
    %244 = vector.broadcast %cst_103 : f32 to vector<8x64xf32>
    %245 = arith.addf %244, %243 : vector<8x64xf32>
    %246 = arith.divf %244, %245 : vector<8x64xf32>
    %247 = arith.mulf %238, %240 : vector<8x64xf32>
    %248 = math.tanh %247 : vector<8x64xf32>
    %249 = arith.mulf %246, %248 : vector<8x64xf32>
    %c1_104 = arith.constant 1 : index
    %c0_105 = arith.constant 0 : index
    %c0_106 = arith.constant 0 : index
    %250 = vector.load %arg18[%c1_104, %c0_105, %c0_106] : memref<4x64x192xf32, #tpu.memory_space<vmem>>, vector<1x64x192xf32>
    %251 = vector.shape_cast %250 : vector<1x64x192xf32> to vector<64x192xf32>
    %cst_107 = arith.constant dense<0.000000e+00> : vector<8x192xf32>
    %252 = tpu.matmul %249, %251, %cst_107 {dimension_numbers = #tpu.dot_dimension_numbers<[1], [0], [0], [1], [0, 0, 1, 1], [], []>} : vector<8x64xf32>, vector<64x192xf32>, vector<8x192xf32> -> vector<8x192xf32>
    %c1_108 = arith.constant 1 : index
    %c0_109 = arith.constant 0 : index
    %c0_110 = arith.constant 0 : index
    %253 = vector.load %arg19[%c1_108, %c0_109, %c0_110] : memref<4x1x192xf32, #tpu.memory_space<vmem>>, vector<1x1x192xf32>
    %254 = vector.shape_cast %253 : vector<1x1x192xf32> to vector<1x192xf32>
    %255 = vector.broadcast %254 : vector<1x192xf32> to vector<8x192xf32>
    %256 = arith.addf %252, %255 : vector<8x192xf32>
    %257 = vector.extract_strided_slice %256 {offsets = [0, 0], sizes = [8, 64], strides = [1, 1]} : vector<8x192xf32> to vector<8x64xf32>
    %258 = arith.negf %257 : vector<8x64xf32>
    %259 = math.exp %258 : vector<8x64xf32>
    %cst_111 = arith.constant 1.000000e+00 : f32
    %260 = vector.broadcast %cst_111 : f32 to vector<8x64xf32>
    %261 = arith.addf %260, %259 : vector<8x64xf32>
    %262 = arith.divf %260, %261 : vector<8x64xf32>
    %263 = vector.extract_strided_slice %256 {offsets = [0, 64], sizes = [8, 64], strides = [1, 1]} : vector<8x192xf32> to vector<8x64xf32>
    %264 = math.tanh %263 : vector<8x64xf32>
    %265 = vector.extract_strided_slice %256 {offsets = [0, 128], sizes = [8, 64], strides = [1, 1]} : vector<8x192xf32> to vector<8x64xf32>
    %266 = arith.negf %265 : vector<8x64xf32>
    %267 = math.exp %266 : vector<8x64xf32>
    %cst_112 = arith.constant 1.000000e+00 : f32
    %268 = vector.broadcast %cst_112 : f32 to vector<8x64xf32>
    %269 = arith.addf %268, %267 : vector<8x64xf32>
    %270 = arith.divf %268, %269 : vector<8x64xf32>
    %271 = arith.mulf %262, %264 : vector<8x64xf32>
    %272 = math.tanh %271 : vector<8x64xf32>
    %273 = arith.mulf %270, %272 : vector<8x64xf32>
    %c2_113 = arith.constant 2 : index
    %c0_114 = arith.constant 0 : index
    %c0_115 = arith.constant 0 : index
    %274 = vector.load %arg18[%c2_113, %c0_114, %c0_115] : memref<4x64x192xf32, #tpu.memory_space<vmem>>, vector<1x64x192xf32>
    %275 = vector.shape_cast %274 : vector<1x64x192xf32> to vector<64x192xf32>
    %cst_116 = arith.constant dense<0.000000e+00> : vector<8x192xf32>
    %276 = tpu.matmul %273, %275, %cst_116 {dimension_numbers = #tpu.dot_dimension_numbers<[1], [0], [0], [1], [0, 0, 1, 1], [], []>} : vector<8x64xf32>, vector<64x192xf32>, vector<8x192xf32> -> vector<8x192xf32>
    %c2_117 = arith.constant 2 : index
    %c0_118 = arith.constant 0 : index
    %c0_119 = arith.constant 0 : index
    %277 = vector.load %arg19[%c2_117, %c0_118, %c0_119] : memref<4x1x192xf32, #tpu.memory_space<vmem>>, vector<1x1x192xf32>
    %278 = vector.shape_cast %277 : vector<1x1x192xf32> to vector<1x192xf32>
    %279 = vector.broadcast %278 : vector<1x192xf32> to vector<8x192xf32>
    %280 = arith.addf %276, %279 : vector<8x192xf32>
    %281 = vector.extract_strided_slice %280 {offsets = [0, 0], sizes = [8, 64], strides = [1, 1]} : vector<8x192xf32> to vector<8x64xf32>
    %282 = arith.negf %281 : vector<8x64xf32>
    %283 = math.exp %282 : vector<8x64xf32>
    %cst_120 = arith.constant 1.000000e+00 : f32
    %284 = vector.broadcast %cst_120 : f32 to vector<8x64xf32>
    %285 = arith.addf %284, %283 : vector<8x64xf32>
    %286 = arith.divf %284, %285 : vector<8x64xf32>
    %287 = vector.extract_strided_slice %280 {offsets = [0, 64], sizes = [8, 64], strides = [1, 1]} : vector<8x192xf32> to vector<8x64xf32>
    %288 = math.tanh %287 : vector<8x64xf32>
    %289 = vector.extract_strided_slice %280 {offsets = [0, 128], sizes = [8, 64], strides = [1, 1]} : vector<8x192xf32> to vector<8x64xf32>
    %290 = arith.negf %289 : vector<8x64xf32>
    %291 = math.exp %290 : vector<8x64xf32>
    %cst_121 = arith.constant 1.000000e+00 : f32
    %292 = vector.broadcast %cst_121 : f32 to vector<8x64xf32>
    %293 = arith.addf %292, %291 : vector<8x64xf32>
    %294 = arith.divf %292, %293 : vector<8x64xf32>
    %295 = arith.mulf %286, %288 : vector<8x64xf32>
    %296 = math.tanh %295 : vector<8x64xf32>
    %297 = arith.mulf %294, %296 : vector<8x64xf32>
    %c3 = arith.constant 3 : index
    %c0_122 = arith.constant 0 : index
    %c0_123 = arith.constant 0 : index
    %298 = vector.load %arg18[%c3, %c0_122, %c0_123] : memref<4x64x192xf32, #tpu.memory_space<vmem>>, vector<1x64x192xf32>
    %299 = vector.shape_cast %298 : vector<1x64x192xf32> to vector<64x192xf32>
    %cst_124 = arith.constant dense<0.000000e+00> : vector<8x192xf32>
    %300 = tpu.matmul %297, %299, %cst_124 {dimension_numbers = #tpu.dot_dimension_numbers<[1], [0], [0], [1], [0, 0, 1, 1], [], []>} : vector<8x64xf32>, vector<64x192xf32>, vector<8x192xf32> -> vector<8x192xf32>
    %c3_125 = arith.constant 3 : index
    %c0_126 = arith.constant 0 : index
    %c0_127 = arith.constant 0 : index
    %301 = vector.load %arg19[%c3_125, %c0_126, %c0_127] : memref<4x1x192xf32, #tpu.memory_space<vmem>>, vector<1x1x192xf32>
    %302 = vector.shape_cast %301 : vector<1x1x192xf32> to vector<1x192xf32>
    %303 = vector.broadcast %302 : vector<1x192xf32> to vector<8x192xf32>
    %304 = arith.addf %300, %303 : vector<8x192xf32>
    %305 = vector.extract_strided_slice %304 {offsets = [0, 0], sizes = [8, 64], strides = [1, 1]} : vector<8x192xf32> to vector<8x64xf32>
    %306 = arith.negf %305 : vector<8x64xf32>
    %307 = math.exp %306 : vector<8x64xf32>
    %cst_128 = arith.constant 1.000000e+00 : f32
    %308 = vector.broadcast %cst_128 : f32 to vector<8x64xf32>
    %309 = arith.addf %308, %307 : vector<8x64xf32>
    %310 = arith.divf %308, %309 : vector<8x64xf32>
    %311 = vector.extract_strided_slice %304 {offsets = [0, 64], sizes = [8, 64], strides = [1, 1]} : vector<8x192xf32> to vector<8x64xf32>
    %312 = math.tanh %311 : vector<8x64xf32>
    %313 = vector.extract_strided_slice %304 {offsets = [0, 128], sizes = [8, 64], strides = [1, 1]} : vector<8x192xf32> to vector<8x64xf32>
    %314 = arith.negf %313 : vector<8x64xf32>
    %315 = math.exp %314 : vector<8x64xf32>
    %cst_129 = arith.constant 1.000000e+00 : f32
    %316 = vector.broadcast %cst_129 : f32 to vector<8x64xf32>
    %317 = arith.addf %316, %315 : vector<8x64xf32>
    %318 = arith.divf %316, %317 : vector<8x64xf32>
    %319 = arith.mulf %310, %312 : vector<8x64xf32>
    %320 = math.tanh %319 : vector<8x64xf32>
    %321 = arith.mulf %318, %320 : vector<8x64xf32>
    %c0_130 = arith.constant 0 : index
    %c0_131 = arith.constant 0 : index
    %322 = vector.load %arg20[%c0_130, %c0_131] : memref<64x1xf32, #tpu.memory_space<vmem>>, vector<64x1xf32>
    %cst_132 = arith.constant dense<0.000000e+00> : vector<8x1xf32>
    %323 = tpu.matmul %321, %322, %cst_132 {dimension_numbers = #tpu.dot_dimension_numbers<[1], [0], [0], [1], [0, 0, 1, 1], [], []>} : vector<8x64xf32>, vector<64x1xf32>, vector<8x1xf32> -> vector<8x1xf32>
    %c0_133 = arith.constant 0 : index
    %c0_134 = arith.constant 0 : index
    %324 = vector.load %arg21[%c0_133, %c0_134] : memref<1x1xf32, #tpu.memory_space<vmem>>, vector<1x1xf32>
    %325 = vector.broadcast %324 : vector<1x1xf32> to vector<8x1xf32>
    %326 = arith.addf %323, %325 : vector<8x1xf32>
    %327 = arith.negf %326 : vector<8x1xf32>
    %328 = math.exp %327 : vector<8x1xf32>
    %cst_135 = arith.constant 1.000000e+00 : f32
    %329 = vector.broadcast %cst_135 : f32 to vector<8x1xf32>
    %330 = arith.addf %329, %328 : vector<8x1xf32>
    %331 = arith.divf %329, %330 : vector<8x1xf32>
    %c0_136 = arith.constant 0 : index
    %c0_137 = arith.constant 0 : index
    %332 = vector.load %arg22[%c0_136, %c0_137] : memref<42x64xf32, #tpu.memory_space<vmem>>, vector<42x64xf32>
    %cst_138 = arith.constant dense<0.000000e+00> : vector<8x64xf32>
    %333 = tpu.matmul %0, %332, %cst_138 {dimension_numbers = #tpu.dot_dimension_numbers<[1], [0], [0], [1], [0, 0, 1, 1], [], []>} : vector<8x42xf32>, vector<42x64xf32>, vector<8x64xf32> -> vector<8x64xf32>
    %c0_139 = arith.constant 0 : index
    %c0_140 = arith.constant 0 : index
    %334 = vector.load %arg23[%c0_139, %c0_140] : memref<1x64xf32, #tpu.memory_space<vmem>>, vector<1x64xf32>
    %335 = vector.broadcast %334 : vector<1x64xf32> to vector<8x64xf32>
    %336 = arith.addf %333, %335 : vector<8x64xf32>
    %c0_141 = arith.constant 0 : index
    %c0_142 = arith.constant 0 : index
    %c0_143 = arith.constant 0 : index
    %337 = vector.load %arg24[%c0_141, %c0_142, %c0_143] : memref<4x64x64xf32, #tpu.memory_space<vmem>>, vector<1x64x64xf32>
    %338 = vector.shape_cast %337 : vector<1x64x64xf32> to vector<64x64xf32>
    %cst_144 = arith.constant dense<0.000000e+00> : vector<8x64xf32>
    %339 = tpu.matmul %336, %338, %cst_144 {dimension_numbers = #tpu.dot_dimension_numbers<[1], [0], [0], [1], [0, 0, 1, 1], [], []>} : vector<8x64xf32>, vector<64x64xf32>, vector<8x64xf32> -> vector<8x64xf32>
    %c0_145 = arith.constant 0 : index
    %c0_146 = arith.constant 0 : index
    %c0_147 = arith.constant 0 : index
    %340 = vector.load %arg25[%c0_145, %c0_146, %c0_147] : memref<4x1x64xf32, #tpu.memory_space<vmem>>, vector<1x1x64xf32>
    %341 = vector.shape_cast %340 : vector<1x1x64xf32> to vector<1x64xf32>
    %342 = vector.broadcast %341 : vector<1x64xf32> to vector<8x64xf32>
    %343 = arith.addf %339, %342 : vector<8x64xf32>
    %344 = arith.addf %336, %343 : vector<8x64xf32>
    %c0_148 = arith.constant 0 : index
    %c0_149 = arith.constant 0 : index
    %c0_150 = arith.constant 0 : index
    %345 = vector.load %arg30[%c0_148, %c0_149, %c0_150] : memref<4x1x64xf32, #tpu.memory_space<vmem>>, vector<1x1x64xf32>
    %346 = vector.shape_cast %345 : vector<1x1x64xf32> to vector<1x64xf32>
    %c0_151 = arith.constant 0 : index
    %c0_152 = arith.constant 0 : index
    %c0_153 = arith.constant 0 : index
    %347 = vector.load %arg31[%c0_151, %c0_152, %c0_153] : memref<4x1x64xf32, #tpu.memory_space<vmem>>, vector<1x1x64xf32>
    %348 = vector.shape_cast %347 : vector<1x1x64xf32> to vector<1x64xf32>
    %cst_154 = arith.constant dense<0.000000e+00> : vector<8xf32>
    %349 = vector.multi_reduction <add>, %344, %cst_154 [1] : vector<8x64xf32> to vector<8xf32>
    %350 = vector.shape_cast %349 : vector<8xf32> to vector<8x1xf32>
    %cst_155 = arith.constant 6.400000e+01 : f32
    %351 = vector.broadcast %cst_155 : f32 to vector<8x1xf32>
    %352 = arith.divf %350, %351 : vector<8x1xf32>
    %353 = vector.broadcast %352 : vector<8x1xf32> to vector<8x64xf32>
    %354 = arith.subf %344, %353 : vector<8x64xf32>
    %355 = arith.mulf %354, %354 : vector<8x64xf32>
    %cst_156 = arith.constant dense<0.000000e+00> : vector<8xf32>
    %356 = vector.multi_reduction <add>, %355, %cst_156 [1] : vector<8x64xf32> to vector<8xf32>
    %357 = vector.shape_cast %356 : vector<8xf32> to vector<8x1xf32>
    %cst_157 = arith.constant 6.400000e+01 : f32
    %358 = vector.broadcast %cst_157 : f32 to vector<8x1xf32>
    %359 = arith.divf %357, %358 : vector<8x1xf32>
    %cst_158 = arith.constant 9.99999974E-6 : f32
    %360 = vector.broadcast %cst_158 : f32 to vector<8x1xf32>
    %361 = arith.addf %359, %360 : vector<8x1xf32>
    %362 = math.rsqrt %361 : vector<8x1xf32>
    %363 = vector.broadcast %362 : vector<8x1xf32> to vector<8x64xf32>
    %364 = arith.mulf %354, %363 : vector<8x64xf32>
    %365 = vector.broadcast %346 : vector<1x64xf32> to vector<8x64xf32>
    %366 = arith.mulf %364, %365 : vector<8x64xf32>
    %367 = vector.broadcast %348 : vector<1x64xf32> to vector<8x64xf32>
    %368 = arith.addf %366, %367 : vector<8x64xf32>
    %c0_159 = arith.constant 0 : index
    %c0_160 = arith.constant 0 : index
    %c0_161 = arith.constant 0 : index
    %369 = vector.load %arg26[%c0_159, %c0_160, %c0_161] : memref<4x64x128xf32, #tpu.memory_space<vmem>>, vector<1x64x128xf32>
    %370 = vector.shape_cast %369 : vector<1x64x128xf32> to vector<64x128xf32>
    %cst_162 = arith.constant dense<0.000000e+00> : vector<8x128xf32>
    %371 = tpu.matmul %368, %370, %cst_162 {dimension_numbers = #tpu.dot_dimension_numbers<[1], [0], [0], [1], [0, 0, 1, 1], [], []>} : vector<8x64xf32>, vector<64x128xf32>, vector<8x128xf32> -> vector<8x128xf32>
    %c0_163 = arith.constant 0 : index
    %c0_164 = arith.constant 0 : index
    %c0_165 = arith.constant 0 : index
    %372 = vector.load %arg27[%c0_163, %c0_164, %c0_165] : memref<4x1x128xf32, #tpu.memory_space<vmem>>, vector<1x1x128xf32>
    %373 = vector.shape_cast %372 : vector<1x1x128xf32> to vector<1x128xf32>
    %374 = vector.broadcast %373 : vector<1x128xf32> to vector<8x128xf32>
    %375 = arith.addf %371, %374 : vector<8x128xf32>
    %cst_166 = arith.constant 0.000000e+00 : f32
    %376 = vector.broadcast %cst_166 : f32 to vector<8x128xf32>
    %377 = arith.maximumf %375, %376 : vector<8x128xf32>
    %c0_167 = arith.constant 0 : index
    %c0_168 = arith.constant 0 : index
    %c0_169 = arith.constant 0 : index
    %378 = vector.load %arg28[%c0_167, %c0_168, %c0_169] : memref<4x128x64xf32, #tpu.memory_space<vmem>>, vector<1x128x64xf32>
    %379 = vector.shape_cast %378 : vector<1x128x64xf32> to vector<128x64xf32>
    %cst_170 = arith.constant dense<0.000000e+00> : vector<8x64xf32>
    %380 = tpu.matmul %377, %379, %cst_170 {dimension_numbers = #tpu.dot_dimension_numbers<[1], [0], [0], [1], [0, 0, 1, 1], [], []>} : vector<8x128xf32>, vector<128x64xf32>, vector<8x64xf32> -> vector<8x64xf32>
    %c0_171 = arith.constant 0 : index
    %c0_172 = arith.constant 0 : index
    %c0_173 = arith.constant 0 : index
    %381 = vector.load %arg29[%c0_171, %c0_172, %c0_173] : memref<4x1x64xf32, #tpu.memory_space<vmem>>, vector<1x1x64xf32>
    %382 = vector.shape_cast %381 : vector<1x1x64xf32> to vector<1x64xf32>
    %383 = vector.broadcast %382 : vector<1x64xf32> to vector<8x64xf32>
    %384 = arith.addf %380, %383 : vector<8x64xf32>
    %385 = arith.addf %368, %384 : vector<8x64xf32>
    %c0_174 = arith.constant 0 : index
    %c0_175 = arith.constant 0 : index
    %c0_176 = arith.constant 0 : index
    %386 = vector.load %arg32[%c0_174, %c0_175, %c0_176] : memref<4x1x64xf32, #tpu.memory_space<vmem>>, vector<1x1x64xf32>
    %387 = vector.shape_cast %386 : vector<1x1x64xf32> to vector<1x64xf32>
    %c0_177 = arith.constant 0 : index
    %c0_178 = arith.constant 0 : index
    %c0_179 = arith.constant 0 : index
    %388 = vector.load %arg33[%c0_177, %c0_178, %c0_179] : memref<4x1x64xf32, #tpu.memory_space<vmem>>, vector<1x1x64xf32>
    %389 = vector.shape_cast %388 : vector<1x1x64xf32> to vector<1x64xf32>
    %cst_180 = arith.constant dense<0.000000e+00> : vector<8xf32>
    %390 = vector.multi_reduction <add>, %385, %cst_180 [1] : vector<8x64xf32> to vector<8xf32>
    %391 = vector.shape_cast %390 : vector<8xf32> to vector<8x1xf32>
    %cst_181 = arith.constant 6.400000e+01 : f32
    %392 = vector.broadcast %cst_181 : f32 to vector<8x1xf32>
    %393 = arith.divf %391, %392 : vector<8x1xf32>
    %394 = vector.broadcast %393 : vector<8x1xf32> to vector<8x64xf32>
    %395 = arith.subf %385, %394 : vector<8x64xf32>
    %396 = arith.mulf %395, %395 : vector<8x64xf32>
    %cst_182 = arith.constant dense<0.000000e+00> : vector<8xf32>
    %397 = vector.multi_reduction <add>, %396, %cst_182 [1] : vector<8x64xf32> to vector<8xf32>
    %398 = vector.shape_cast %397 : vector<8xf32> to vector<8x1xf32>
    %cst_183 = arith.constant 6.400000e+01 : f32
    %399 = vector.broadcast %cst_183 : f32 to vector<8x1xf32>
    %400 = arith.divf %398, %399 : vector<8x1xf32>
    %cst_184 = arith.constant 9.99999974E-6 : f32
    %401 = vector.broadcast %cst_184 : f32 to vector<8x1xf32>
    %402 = arith.addf %400, %401 : vector<8x1xf32>
    %403 = math.rsqrt %402 : vector<8x1xf32>
    %404 = vector.broadcast %403 : vector<8x1xf32> to vector<8x64xf32>
    %405 = arith.mulf %395, %404 : vector<8x64xf32>
    %406 = vector.broadcast %387 : vector<1x64xf32> to vector<8x64xf32>
    %407 = arith.mulf %405, %406 : vector<8x64xf32>
    %408 = vector.broadcast %389 : vector<1x64xf32> to vector<8x64xf32>
    %409 = arith.addf %407, %408 : vector<8x64xf32>
    %c1_185 = arith.constant 1 : index
    %c0_186 = arith.constant 0 : index
    %c0_187 = arith.constant 0 : index
    %410 = vector.load %arg24[%c1_185, %c0_186, %c0_187] : memref<4x64x64xf32, #tpu.memory_space<vmem>>, vector<1x64x64xf32>
    %411 = vector.shape_cast %410 : vector<1x64x64xf32> to vector<64x64xf32>
    %cst_188 = arith.constant dense<0.000000e+00> : vector<8x64xf32>
    %412 = tpu.matmul %409, %411, %cst_188 {dimension_numbers = #tpu.dot_dimension_numbers<[1], [0], [0], [1], [0, 0, 1, 1], [], []>} : vector<8x64xf32>, vector<64x64xf32>, vector<8x64xf32> -> vector<8x64xf32>
    %c1_189 = arith.constant 1 : index
    %c0_190 = arith.constant 0 : index
    %c0_191 = arith.constant 0 : index
    %413 = vector.load %arg25[%c1_189, %c0_190, %c0_191] : memref<4x1x64xf32, #tpu.memory_space<vmem>>, vector<1x1x64xf32>
    %414 = vector.shape_cast %413 : vector<1x1x64xf32> to vector<1x64xf32>
    %415 = vector.broadcast %414 : vector<1x64xf32> to vector<8x64xf32>
    %416 = arith.addf %412, %415 : vector<8x64xf32>
    %417 = arith.addf %409, %416 : vector<8x64xf32>
    %c1_192 = arith.constant 1 : index
    %c0_193 = arith.constant 0 : index
    %c0_194 = arith.constant 0 : index
    %418 = vector.load %arg30[%c1_192, %c0_193, %c0_194] : memref<4x1x64xf32, #tpu.memory_space<vmem>>, vector<1x1x64xf32>
    %419 = vector.shape_cast %418 : vector<1x1x64xf32> to vector<1x64xf32>
    %c1_195 = arith.constant 1 : index
    %c0_196 = arith.constant 0 : index
    %c0_197 = arith.constant 0 : index
    %420 = vector.load %arg31[%c1_195, %c0_196, %c0_197] : memref<4x1x64xf32, #tpu.memory_space<vmem>>, vector<1x1x64xf32>
    %421 = vector.shape_cast %420 : vector<1x1x64xf32> to vector<1x64xf32>
    %cst_198 = arith.constant dense<0.000000e+00> : vector<8xf32>
    %422 = vector.multi_reduction <add>, %417, %cst_198 [1] : vector<8x64xf32> to vector<8xf32>
    %423 = vector.shape_cast %422 : vector<8xf32> to vector<8x1xf32>
    %cst_199 = arith.constant 6.400000e+01 : f32
    %424 = vector.broadcast %cst_199 : f32 to vector<8x1xf32>
    %425 = arith.divf %423, %424 : vector<8x1xf32>
    %426 = vector.broadcast %425 : vector<8x1xf32> to vector<8x64xf32>
    %427 = arith.subf %417, %426 : vector<8x64xf32>
    %428 = arith.mulf %427, %427 : vector<8x64xf32>
    %cst_200 = arith.constant dense<0.000000e+00> : vector<8xf32>
    %429 = vector.multi_reduction <add>, %428, %cst_200 [1] : vector<8x64xf32> to vector<8xf32>
    %430 = vector.shape_cast %429 : vector<8xf32> to vector<8x1xf32>
    %cst_201 = arith.constant 6.400000e+01 : f32
    %431 = vector.broadcast %cst_201 : f32 to vector<8x1xf32>
    %432 = arith.divf %430, %431 : vector<8x1xf32>
    %cst_202 = arith.constant 9.99999974E-6 : f32
    %433 = vector.broadcast %cst_202 : f32 to vector<8x1xf32>
    %434 = arith.addf %432, %433 : vector<8x1xf32>
    %435 = math.rsqrt %434 : vector<8x1xf32>
    %436 = vector.broadcast %435 : vector<8x1xf32> to vector<8x64xf32>
    %437 = arith.mulf %427, %436 : vector<8x64xf32>
    %438 = vector.broadcast %419 : vector<1x64xf32> to vector<8x64xf32>
    %439 = arith.mulf %437, %438 : vector<8x64xf32>
    %440 = vector.broadcast %421 : vector<1x64xf32> to vector<8x64xf32>
    %441 = arith.addf %439, %440 : vector<8x64xf32>
    %c1_203 = arith.constant 1 : index
    %c0_204 = arith.constant 0 : index
    %c0_205 = arith.constant 0 : index
    %442 = vector.load %arg26[%c1_203, %c0_204, %c0_205] : memref<4x64x128xf32, #tpu.memory_space<vmem>>, vector<1x64x128xf32>
    %443 = vector.shape_cast %442 : vector<1x64x128xf32> to vector<64x128xf32>
    %cst_206 = arith.constant dense<0.000000e+00> : vector<8x128xf32>
    %444 = tpu.matmul %441, %443, %cst_206 {dimension_numbers = #tpu.dot_dimension_numbers<[1], [0], [0], [1], [0, 0, 1, 1], [], []>} : vector<8x64xf32>, vector<64x128xf32>, vector<8x128xf32> -> vector<8x128xf32>
    %c1_207 = arith.constant 1 : index
    %c0_208 = arith.constant 0 : index
    %c0_209 = arith.constant 0 : index
    %445 = vector.load %arg27[%c1_207, %c0_208, %c0_209] : memref<4x1x128xf32, #tpu.memory_space<vmem>>, vector<1x1x128xf32>
    %446 = vector.shape_cast %445 : vector<1x1x128xf32> to vector<1x128xf32>
    %447 = vector.broadcast %446 : vector<1x128xf32> to vector<8x128xf32>
    %448 = arith.addf %444, %447 : vector<8x128xf32>
    %cst_210 = arith.constant 0.000000e+00 : f32
    %449 = vector.broadcast %cst_210 : f32 to vector<8x128xf32>
    %450 = arith.maximumf %448, %449 : vector<8x128xf32>
    %c1_211 = arith.constant 1 : index
    %c0_212 = arith.constant 0 : index
    %c0_213 = arith.constant 0 : index
    %451 = vector.load %arg28[%c1_211, %c0_212, %c0_213] : memref<4x128x64xf32, #tpu.memory_space<vmem>>, vector<1x128x64xf32>
    %452 = vector.shape_cast %451 : vector<1x128x64xf32> to vector<128x64xf32>
    %cst_214 = arith.constant dense<0.000000e+00> : vector<8x64xf32>
    %453 = tpu.matmul %450, %452, %cst_214 {dimension_numbers = #tpu.dot_dimension_numbers<[1], [0], [0], [1], [0, 0, 1, 1], [], []>} : vector<8x128xf32>, vector<128x64xf32>, vector<8x64xf32> -> vector<8x64xf32>
    %c1_215 = arith.constant 1 : index
    %c0_216 = arith.constant 0 : index
    %c0_217 = arith.constant 0 : index
    %454 = vector.load %arg29[%c1_215, %c0_216, %c0_217] : memref<4x1x64xf32, #tpu.memory_space<vmem>>, vector<1x1x64xf32>
    %455 = vector.shape_cast %454 : vector<1x1x64xf32> to vector<1x64xf32>
    %456 = vector.broadcast %455 : vector<1x64xf32> to vector<8x64xf32>
    %457 = arith.addf %453, %456 : vector<8x64xf32>
    %458 = arith.addf %441, %457 : vector<8x64xf32>
    %c1_218 = arith.constant 1 : index
    %c0_219 = arith.constant 0 : index
    %c0_220 = arith.constant 0 : index
    %459 = vector.load %arg32[%c1_218, %c0_219, %c0_220] : memref<4x1x64xf32, #tpu.memory_space<vmem>>, vector<1x1x64xf32>
    %460 = vector.shape_cast %459 : vector<1x1x64xf32> to vector<1x64xf32>
    %c1_221 = arith.constant 1 : index
    %c0_222 = arith.constant 0 : index
    %c0_223 = arith.constant 0 : index
    %461 = vector.load %arg33[%c1_221, %c0_222, %c0_223] : memref<4x1x64xf32, #tpu.memory_space<vmem>>, vector<1x1x64xf32>
    %462 = vector.shape_cast %461 : vector<1x1x64xf32> to vector<1x64xf32>
    %cst_224 = arith.constant dense<0.000000e+00> : vector<8xf32>
    %463 = vector.multi_reduction <add>, %458, %cst_224 [1] : vector<8x64xf32> to vector<8xf32>
    %464 = vector.shape_cast %463 : vector<8xf32> to vector<8x1xf32>
    %cst_225 = arith.constant 6.400000e+01 : f32
    %465 = vector.broadcast %cst_225 : f32 to vector<8x1xf32>
    %466 = arith.divf %464, %465 : vector<8x1xf32>
    %467 = vector.broadcast %466 : vector<8x1xf32> to vector<8x64xf32>
    %468 = arith.subf %458, %467 : vector<8x64xf32>
    %469 = arith.mulf %468, %468 : vector<8x64xf32>
    %cst_226 = arith.constant dense<0.000000e+00> : vector<8xf32>
    %470 = vector.multi_reduction <add>, %469, %cst_226 [1] : vector<8x64xf32> to vector<8xf32>
    %471 = vector.shape_cast %470 : vector<8xf32> to vector<8x1xf32>
    %cst_227 = arith.constant 6.400000e+01 : f32
    %472 = vector.broadcast %cst_227 : f32 to vector<8x1xf32>
    %473 = arith.divf %471, %472 : vector<8x1xf32>
    %cst_228 = arith.constant 9.99999974E-6 : f32
    %474 = vector.broadcast %cst_228 : f32 to vector<8x1xf32>
    %475 = arith.addf %473, %474 : vector<8x1xf32>
    %476 = math.rsqrt %475 : vector<8x1xf32>
    %477 = vector.broadcast %476 : vector<8x1xf32> to vector<8x64xf32>
    %478 = arith.mulf %468, %477 : vector<8x64xf32>
    %479 = vector.broadcast %460 : vector<1x64xf32> to vector<8x64xf32>
    %480 = arith.mulf %478, %479 : vector<8x64xf32>
    %481 = vector.broadcast %462 : vector<1x64xf32> to vector<8x64xf32>
    %482 = arith.addf %480, %481 : vector<8x64xf32>
    %c2_229 = arith.constant 2 : index
    %c0_230 = arith.constant 0 : index
    %c0_231 = arith.constant 0 : index
    %483 = vector.load %arg24[%c2_229, %c0_230, %c0_231] : memref<4x64x64xf32, #tpu.memory_space<vmem>>, vector<1x64x64xf32>
    %484 = vector.shape_cast %483 : vector<1x64x64xf32> to vector<64x64xf32>
    %cst_232 = arith.constant dense<0.000000e+00> : vector<8x64xf32>
    %485 = tpu.matmul %482, %484, %cst_232 {dimension_numbers = #tpu.dot_dimension_numbers<[1], [0], [0], [1], [0, 0, 1, 1], [], []>} : vector<8x64xf32>, vector<64x64xf32>, vector<8x64xf32> -> vector<8x64xf32>
    %c2_233 = arith.constant 2 : index
    %c0_234 = arith.constant 0 : index
    %c0_235 = arith.constant 0 : index
    %486 = vector.load %arg25[%c2_233, %c0_234, %c0_235] : memref<4x1x64xf32, #tpu.memory_space<vmem>>, vector<1x1x64xf32>
    %487 = vector.shape_cast %486 : vector<1x1x64xf32> to vector<1x64xf32>
    %488 = vector.broadcast %487 : vector<1x64xf32> to vector<8x64xf32>
    %489 = arith.addf %485, %488 : vector<8x64xf32>
    %490 = arith.addf %482, %489 : vector<8x64xf32>
    %c2_236 = arith.constant 2 : index
    %c0_237 = arith.constant 0 : index
    %c0_238 = arith.constant 0 : index
    %491 = vector.load %arg30[%c2_236, %c0_237, %c0_238] : memref<4x1x64xf32, #tpu.memory_space<vmem>>, vector<1x1x64xf32>
    %492 = vector.shape_cast %491 : vector<1x1x64xf32> to vector<1x64xf32>
    %c2_239 = arith.constant 2 : index
    %c0_240 = arith.constant 0 : index
    %c0_241 = arith.constant 0 : index
    %493 = vector.load %arg31[%c2_239, %c0_240, %c0_241] : memref<4x1x64xf32, #tpu.memory_space<vmem>>, vector<1x1x64xf32>
    %494 = vector.shape_cast %493 : vector<1x1x64xf32> to vector<1x64xf32>
    %cst_242 = arith.constant dense<0.000000e+00> : vector<8xf32>
    %495 = vector.multi_reduction <add>, %490, %cst_242 [1] : vector<8x64xf32> to vector<8xf32>
    %496 = vector.shape_cast %495 : vector<8xf32> to vector<8x1xf32>
    %cst_243 = arith.constant 6.400000e+01 : f32
    %497 = vector.broadcast %cst_243 : f32 to vector<8x1xf32>
    %498 = arith.divf %496, %497 : vector<8x1xf32>
    %499 = vector.broadcast %498 : vector<8x1xf32> to vector<8x64xf32>
    %500 = arith.subf %490, %499 : vector<8x64xf32>
    %501 = arith.mulf %500, %500 : vector<8x64xf32>
    %cst_244 = arith.constant dense<0.000000e+00> : vector<8xf32>
    %502 = vector.multi_reduction <add>, %501, %cst_244 [1] : vector<8x64xf32> to vector<8xf32>
    %503 = vector.shape_cast %502 : vector<8xf32> to vector<8x1xf32>
    %cst_245 = arith.constant 6.400000e+01 : f32
    %504 = vector.broadcast %cst_245 : f32 to vector<8x1xf32>
    %505 = arith.divf %503, %504 : vector<8x1xf32>
    %cst_246 = arith.constant 9.99999974E-6 : f32
    %506 = vector.broadcast %cst_246 : f32 to vector<8x1xf32>
    %507 = arith.addf %505, %506 : vector<8x1xf32>
    %508 = math.rsqrt %507 : vector<8x1xf32>
    %509 = vector.broadcast %508 : vector<8x1xf32> to vector<8x64xf32>
    %510 = arith.mulf %500, %509 : vector<8x64xf32>
    %511 = vector.broadcast %492 : vector<1x64xf32> to vector<8x64xf32>
    %512 = arith.mulf %510, %511 : vector<8x64xf32>
    %513 = vector.broadcast %494 : vector<1x64xf32> to vector<8x64xf32>
    %514 = arith.addf %512, %513 : vector<8x64xf32>
    %c2_247 = arith.constant 2 : index
    %c0_248 = arith.constant 0 : index
    %c0_249 = arith.constant 0 : index
    %515 = vector.load %arg26[%c2_247, %c0_248, %c0_249] : memref<4x64x128xf32, #tpu.memory_space<vmem>>, vector<1x64x128xf32>
    %516 = vector.shape_cast %515 : vector<1x64x128xf32> to vector<64x128xf32>
    %cst_250 = arith.constant dense<0.000000e+00> : vector<8x128xf32>
    %517 = tpu.matmul %514, %516, %cst_250 {dimension_numbers = #tpu.dot_dimension_numbers<[1], [0], [0], [1], [0, 0, 1, 1], [], []>} : vector<8x64xf32>, vector<64x128xf32>, vector<8x128xf32> -> vector<8x128xf32>
    %c2_251 = arith.constant 2 : index
    %c0_252 = arith.constant 0 : index
    %c0_253 = arith.constant 0 : index
    %518 = vector.load %arg27[%c2_251, %c0_252, %c0_253] : memref<4x1x128xf32, #tpu.memory_space<vmem>>, vector<1x1x128xf32>
    %519 = vector.shape_cast %518 : vector<1x1x128xf32> to vector<1x128xf32>
    %520 = vector.broadcast %519 : vector<1x128xf32> to vector<8x128xf32>
    %521 = arith.addf %517, %520 : vector<8x128xf32>
    %cst_254 = arith.constant 0.000000e+00 : f32
    %522 = vector.broadcast %cst_254 : f32 to vector<8x128xf32>
    %523 = arith.maximumf %521, %522 : vector<8x128xf32>
    %c2_255 = arith.constant 2 : index
    %c0_256 = arith.constant 0 : index
    %c0_257 = arith.constant 0 : index
    %524 = vector.load %arg28[%c2_255, %c0_256, %c0_257] : memref<4x128x64xf32, #tpu.memory_space<vmem>>, vector<1x128x64xf32>
    %525 = vector.shape_cast %524 : vector<1x128x64xf32> to vector<128x64xf32>
    %cst_258 = arith.constant dense<0.000000e+00> : vector<8x64xf32>
    %526 = tpu.matmul %523, %525, %cst_258 {dimension_numbers = #tpu.dot_dimension_numbers<[1], [0], [0], [1], [0, 0, 1, 1], [], []>} : vector<8x128xf32>, vector<128x64xf32>, vector<8x64xf32> -> vector<8x64xf32>
    %c2_259 = arith.constant 2 : index
    %c0_260 = arith.constant 0 : index
    %c0_261 = arith.constant 0 : index
    %527 = vector.load %arg29[%c2_259, %c0_260, %c0_261] : memref<4x1x64xf32, #tpu.memory_space<vmem>>, vector<1x1x64xf32>
    %528 = vector.shape_cast %527 : vector<1x1x64xf32> to vector<1x64xf32>
    %529 = vector.broadcast %528 : vector<1x64xf32> to vector<8x64xf32>
    %530 = arith.addf %526, %529 : vector<8x64xf32>
    %531 = arith.addf %514, %530 : vector<8x64xf32>
    %c2_262 = arith.constant 2 : index
    %c0_263 = arith.constant 0 : index
    %c0_264 = arith.constant 0 : index
    %532 = vector.load %arg32[%c2_262, %c0_263, %c0_264] : memref<4x1x64xf32, #tpu.memory_space<vmem>>, vector<1x1x64xf32>
    %533 = vector.shape_cast %532 : vector<1x1x64xf32> to vector<1x64xf32>
    %c2_265 = arith.constant 2 : index
    %c0_266 = arith.constant 0 : index
    %c0_267 = arith.constant 0 : index
    %534 = vector.load %arg33[%c2_265, %c0_266, %c0_267] : memref<4x1x64xf32, #tpu.memory_space<vmem>>, vector<1x1x64xf32>
    %535 = vector.shape_cast %534 : vector<1x1x64xf32> to vector<1x64xf32>
    %cst_268 = arith.constant dense<0.000000e+00> : vector<8xf32>
    %536 = vector.multi_reduction <add>, %531, %cst_268 [1] : vector<8x64xf32> to vector<8xf32>
    %537 = vector.shape_cast %536 : vector<8xf32> to vector<8x1xf32>
    %cst_269 = arith.constant 6.400000e+01 : f32
    %538 = vector.broadcast %cst_269 : f32 to vector<8x1xf32>
    %539 = arith.divf %537, %538 : vector<8x1xf32>
    %540 = vector.broadcast %539 : vector<8x1xf32> to vector<8x64xf32>
    %541 = arith.subf %531, %540 : vector<8x64xf32>
    %542 = arith.mulf %541, %541 : vector<8x64xf32>
    %cst_270 = arith.constant dense<0.000000e+00> : vector<8xf32>
    %543 = vector.multi_reduction <add>, %542, %cst_270 [1] : vector<8x64xf32> to vector<8xf32>
    %544 = vector.shape_cast %543 : vector<8xf32> to vector<8x1xf32>
    %cst_271 = arith.constant 6.400000e+01 : f32
    %545 = vector.broadcast %cst_271 : f32 to vector<8x1xf32>
    %546 = arith.divf %544, %545 : vector<8x1xf32>
    %cst_272 = arith.constant 9.99999974E-6 : f32
    %547 = vector.broadcast %cst_272 : f32 to vector<8x1xf32>
    %548 = arith.addf %546, %547 : vector<8x1xf32>
    %549 = math.rsqrt %548 : vector<8x1xf32>
    %550 = vector.broadcast %549 : vector<8x1xf32> to vector<8x64xf32>
    %551 = arith.mulf %541, %550 : vector<8x64xf32>
    %552 = vector.broadcast %533 : vector<1x64xf32> to vector<8x64xf32>
    %553 = arith.mulf %551, %552 : vector<8x64xf32>
    %554 = vector.broadcast %535 : vector<1x64xf32> to vector<8x64xf32>
    %555 = arith.addf %553, %554 : vector<8x64xf32>
    %c3_273 = arith.constant 3 : index
    %c0_274 = arith.constant 0 : index
    %c0_275 = arith.constant 0 : index
    %556 = vector.load %arg24[%c3_273, %c0_274, %c0_275] : memref<4x64x64xf32, #tpu.memory_space<vmem>>, vector<1x64x64xf32>
    %557 = vector.shape_cast %556 : vector<1x64x64xf32> to vector<64x64xf32>
    %cst_276 = arith.constant dense<0.000000e+00> : vector<8x64xf32>
    %558 = tpu.matmul %555, %557, %cst_276 {dimension_numbers = #tpu.dot_dimension_numbers<[1], [0], [0], [1], [0, 0, 1, 1], [], []>} : vector<8x64xf32>, vector<64x64xf32>, vector<8x64xf32> -> vector<8x64xf32>
    %c3_277 = arith.constant 3 : index
    %c0_278 = arith.constant 0 : index
    %c0_279 = arith.constant 0 : index
    %559 = vector.load %arg25[%c3_277, %c0_278, %c0_279] : memref<4x1x64xf32, #tpu.memory_space<vmem>>, vector<1x1x64xf32>
    %560 = vector.shape_cast %559 : vector<1x1x64xf32> to vector<1x64xf32>
    %561 = vector.broadcast %560 : vector<1x64xf32> to vector<8x64xf32>
    %562 = arith.addf %558, %561 : vector<8x64xf32>
    %563 = arith.addf %555, %562 : vector<8x64xf32>
    %c3_280 = arith.constant 3 : index
    %c0_281 = arith.constant 0 : index
    %c0_282 = arith.constant 0 : index
    %564 = vector.load %arg30[%c3_280, %c0_281, %c0_282] : memref<4x1x64xf32, #tpu.memory_space<vmem>>, vector<1x1x64xf32>
    %565 = vector.shape_cast %564 : vector<1x1x64xf32> to vector<1x64xf32>
    %c3_283 = arith.constant 3 : index
    %c0_284 = arith.constant 0 : index
    %c0_285 = arith.constant 0 : index
    %566 = vector.load %arg31[%c3_283, %c0_284, %c0_285] : memref<4x1x64xf32, #tpu.memory_space<vmem>>, vector<1x1x64xf32>
    %567 = vector.shape_cast %566 : vector<1x1x64xf32> to vector<1x64xf32>
    %cst_286 = arith.constant dense<0.000000e+00> : vector<8xf32>
    %568 = vector.multi_reduction <add>, %563, %cst_286 [1] : vector<8x64xf32> to vector<8xf32>
    %569 = vector.shape_cast %568 : vector<8xf32> to vector<8x1xf32>
    %cst_287 = arith.constant 6.400000e+01 : f32
    %570 = vector.broadcast %cst_287 : f32 to vector<8x1xf32>
    %571 = arith.divf %569, %570 : vector<8x1xf32>
    %572 = vector.broadcast %571 : vector<8x1xf32> to vector<8x64xf32>
    %573 = arith.subf %563, %572 : vector<8x64xf32>
    %574 = arith.mulf %573, %573 : vector<8x64xf32>
    %cst_288 = arith.constant dense<0.000000e+00> : vector<8xf32>
    %575 = vector.multi_reduction <add>, %574, %cst_288 [1] : vector<8x64xf32> to vector<8xf32>
    %576 = vector.shape_cast %575 : vector<8xf32> to vector<8x1xf32>
    %cst_289 = arith.constant 6.400000e+01 : f32
    %577 = vector.broadcast %cst_289 : f32 to vector<8x1xf32>
    %578 = arith.divf %576, %577 : vector<8x1xf32>
    %cst_290 = arith.constant 9.99999974E-6 : f32
    %579 = vector.broadcast %cst_290 : f32 to vector<8x1xf32>
    %580 = arith.addf %578, %579 : vector<8x1xf32>
    %581 = math.rsqrt %580 : vector<8x1xf32>
    %582 = vector.broadcast %581 : vector<8x1xf32> to vector<8x64xf32>
    %583 = arith.mulf %573, %582 : vector<8x64xf32>
    %584 = vector.broadcast %565 : vector<1x64xf32> to vector<8x64xf32>
    %585 = arith.mulf %583, %584 : vector<8x64xf32>
    %586 = vector.broadcast %567 : vector<1x64xf32> to vector<8x64xf32>
    %587 = arith.addf %585, %586 : vector<8x64xf32>
    %c3_291 = arith.constant 3 : index
    %c0_292 = arith.constant 0 : index
    %c0_293 = arith.constant 0 : index
    %588 = vector.load %arg26[%c3_291, %c0_292, %c0_293] : memref<4x64x128xf32, #tpu.memory_space<vmem>>, vector<1x64x128xf32>
    %589 = vector.shape_cast %588 : vector<1x64x128xf32> to vector<64x128xf32>
    %cst_294 = arith.constant dense<0.000000e+00> : vector<8x128xf32>
    %590 = tpu.matmul %587, %589, %cst_294 {dimension_numbers = #tpu.dot_dimension_numbers<[1], [0], [0], [1], [0, 0, 1, 1], [], []>} : vector<8x64xf32>, vector<64x128xf32>, vector<8x128xf32> -> vector<8x128xf32>
    %c3_295 = arith.constant 3 : index
    %c0_296 = arith.constant 0 : index
    %c0_297 = arith.constant 0 : index
    %591 = vector.load %arg27[%c3_295, %c0_296, %c0_297] : memref<4x1x128xf32, #tpu.memory_space<vmem>>, vector<1x1x128xf32>
    %592 = vector.shape_cast %591 : vector<1x1x128xf32> to vector<1x128xf32>
    %593 = vector.broadcast %592 : vector<1x128xf32> to vector<8x128xf32>
    %594 = arith.addf %590, %593 : vector<8x128xf32>
    %cst_298 = arith.constant 0.000000e+00 : f32
    %595 = vector.broadcast %cst_298 : f32 to vector<8x128xf32>
    %596 = arith.maximumf %594, %595 : vector<8x128xf32>
    %c3_299 = arith.constant 3 : index
    %c0_300 = arith.constant 0 : index
    %c0_301 = arith.constant 0 : index
    %597 = vector.load %arg28[%c3_299, %c0_300, %c0_301] : memref<4x128x64xf32, #tpu.memory_space<vmem>>, vector<1x128x64xf32>
    %598 = vector.shape_cast %597 : vector<1x128x64xf32> to vector<128x64xf32>
    %cst_302 = arith.constant dense<0.000000e+00> : vector<8x64xf32>
    %599 = tpu.matmul %596, %598, %cst_302 {dimension_numbers = #tpu.dot_dimension_numbers<[1], [0], [0], [1], [0, 0, 1, 1], [], []>} : vector<8x128xf32>, vector<128x64xf32>, vector<8x64xf32> -> vector<8x64xf32>
    %c3_303 = arith.constant 3 : index
    %c0_304 = arith.constant 0 : index
    %c0_305 = arith.constant 0 : index
    %600 = vector.load %arg29[%c3_303, %c0_304, %c0_305] : memref<4x1x64xf32, #tpu.memory_space<vmem>>, vector<1x1x64xf32>
    %601 = vector.shape_cast %600 : vector<1x1x64xf32> to vector<1x64xf32>
    %602 = vector.broadcast %601 : vector<1x64xf32> to vector<8x64xf32>
    %603 = arith.addf %599, %602 : vector<8x64xf32>
    %604 = arith.addf %587, %603 : vector<8x64xf32>
    %c3_306 = arith.constant 3 : index
    %c0_307 = arith.constant 0 : index
    %c0_308 = arith.constant 0 : index
    %605 = vector.load %arg32[%c3_306, %c0_307, %c0_308] : memref<4x1x64xf32, #tpu.memory_space<vmem>>, vector<1x1x64xf32>
    %606 = vector.shape_cast %605 : vector<1x1x64xf32> to vector<1x64xf32>
    %c3_309 = arith.constant 3 : index
    %c0_310 = arith.constant 0 : index
    %c0_311 = arith.constant 0 : index
    %607 = vector.load %arg33[%c3_309, %c0_310, %c0_311] : memref<4x1x64xf32, #tpu.memory_space<vmem>>, vector<1x1x64xf32>
    %608 = vector.shape_cast %607 : vector<1x1x64xf32> to vector<1x64xf32>
    %cst_312 = arith.constant dense<0.000000e+00> : vector<8xf32>
    %609 = vector.multi_reduction <add>, %604, %cst_312 [1] : vector<8x64xf32> to vector<8xf32>
    %610 = vector.shape_cast %609 : vector<8xf32> to vector<8x1xf32>
    %cst_313 = arith.constant 6.400000e+01 : f32
    %611 = vector.broadcast %cst_313 : f32 to vector<8x1xf32>
    %612 = arith.divf %610, %611 : vector<8x1xf32>
    %613 = vector.broadcast %612 : vector<8x1xf32> to vector<8x64xf32>
    %614 = arith.subf %604, %613 : vector<8x64xf32>
    %615 = arith.mulf %614, %614 : vector<8x64xf32>
    %cst_314 = arith.constant dense<0.000000e+00> : vector<8xf32>
    %616 = vector.multi_reduction <add>, %615, %cst_314 [1] : vector<8x64xf32> to vector<8xf32>
    %617 = vector.shape_cast %616 : vector<8xf32> to vector<8x1xf32>
    %cst_315 = arith.constant 6.400000e+01 : f32
    %618 = vector.broadcast %cst_315 : f32 to vector<8x1xf32>
    %619 = arith.divf %617, %618 : vector<8x1xf32>
    %cst_316 = arith.constant 9.99999974E-6 : f32
    %620 = vector.broadcast %cst_316 : f32 to vector<8x1xf32>
    %621 = arith.addf %619, %620 : vector<8x1xf32>
    %622 = math.rsqrt %621 : vector<8x1xf32>
    %623 = vector.broadcast %622 : vector<8x1xf32> to vector<8x64xf32>
    %624 = arith.mulf %614, %623 : vector<8x64xf32>
    %625 = vector.broadcast %606 : vector<1x64xf32> to vector<8x64xf32>
    %626 = arith.mulf %624, %625 : vector<8x64xf32>
    %627 = vector.broadcast %608 : vector<1x64xf32> to vector<8x64xf32>
    %628 = arith.addf %626, %627 : vector<8x64xf32>
    %c0_317 = arith.constant 0 : index
    %c0_318 = arith.constant 0 : index
    %629 = vector.load %arg34[%c0_317, %c0_318] : memref<64x1xf32, #tpu.memory_space<vmem>>, vector<64x1xf32>
    %cst_319 = arith.constant dense<0.000000e+00> : vector<8x1xf32>
    %630 = tpu.matmul %628, %629, %cst_319 {dimension_numbers = #tpu.dot_dimension_numbers<[1], [0], [0], [1], [0, 0, 1, 1], [], []>} : vector<8x64xf32>, vector<64x1xf32>, vector<8x1xf32> -> vector<8x1xf32>
    %c0_320 = arith.constant 0 : index
    %c0_321 = arith.constant 0 : index
    %631 = vector.load %arg35[%c0_320, %c0_321] : memref<1x1xf32, #tpu.memory_space<vmem>>, vector<1x1xf32>
    %632 = vector.broadcast %631 : vector<1x1xf32> to vector<8x1xf32>
    %633 = arith.addf %630, %632 : vector<8x1xf32>
    %634 = arith.negf %633 : vector<8x1xf32>
    %635 = math.exp %634 : vector<8x1xf32>
    %cst_322 = arith.constant 1.000000e+00 : f32
    %636 = vector.broadcast %cst_322 : f32 to vector<8x1xf32>
    %637 = arith.addf %636, %635 : vector<8x1xf32>
    %638 = arith.divf %636, %637 : vector<8x1xf32>
    %c0_323 = arith.constant 0 : index
    %c0_324 = arith.constant 0 : index
    %639 = vector.load %arg36[%c0_323, %c0_324] : memref<42x64xf32, #tpu.memory_space<vmem>>, vector<42x64xf32>
    %cst_325 = arith.constant dense<0.000000e+00> : vector<8x64xf32>
    %640 = tpu.matmul %0, %639, %cst_325 {dimension_numbers = #tpu.dot_dimension_numbers<[1], [0], [0], [1], [0, 0, 1, 1], [], []>} : vector<8x42xf32>, vector<42x64xf32>, vector<8x64xf32> -> vector<8x64xf32>
    %c0_326 = arith.constant 0 : index
    %c0_327 = arith.constant 0 : index
    %641 = vector.load %arg37[%c0_326, %c0_327] : memref<1x64xf32, #tpu.memory_space<vmem>>, vector<1x64xf32>
    %642 = vector.broadcast %641 : vector<1x64xf32> to vector<8x64xf32>
    %643 = arith.addf %640, %642 : vector<8x64xf32>
    %cst_328 = arith.constant 0.000000e+00 : f32
    %644 = vector.broadcast %cst_328 : f32 to vector<8x64xf32>
    %645 = arith.maximumf %643, %644 : vector<8x64xf32>
    %c0_329 = arith.constant 0 : index
    %c0_330 = arith.constant 0 : index
    %646 = vector.load %arg38[%c0_329, %c0_330] : memref<64x32xf32, #tpu.memory_space<vmem>>, vector<64x32xf32>
    %cst_331 = arith.constant dense<0.000000e+00> : vector<8x32xf32>
    %647 = tpu.matmul %645, %646, %cst_331 {dimension_numbers = #tpu.dot_dimension_numbers<[1], [0], [0], [1], [0, 0, 1, 1], [], []>} : vector<8x64xf32>, vector<64x32xf32>, vector<8x32xf32> -> vector<8x32xf32>
    %c0_332 = arith.constant 0 : index
    %c0_333 = arith.constant 0 : index
    %648 = vector.load %arg39[%c0_332, %c0_333] : memref<1x32xf32, #tpu.memory_space<vmem>>, vector<1x32xf32>
    %649 = vector.broadcast %648 : vector<1x32xf32> to vector<8x32xf32>
    %650 = arith.addf %647, %649 : vector<8x32xf32>
    %c0_334 = arith.constant 0 : index
    %c0_335 = arith.constant 0 : index
    %651 = vector.load %arg40[%c0_334, %c0_335] : memref<32x1xf32, #tpu.memory_space<vmem>>, vector<32x1xf32>
    %cst_336 = arith.constant dense<0.000000e+00> : vector<8x1xf32>
    %652 = tpu.matmul %650, %651, %cst_336 {dimension_numbers = #tpu.dot_dimension_numbers<[1], [0], [0], [1], [0, 0, 1, 1], [], []>} : vector<8x32xf32>, vector<32x1xf32>, vector<8x1xf32> -> vector<8x1xf32>
    %c0_337 = arith.constant 0 : index
    %c0_338 = arith.constant 0 : index
    %653 = vector.load %arg41[%c0_337, %c0_338] : memref<1x1xf32, #tpu.memory_space<vmem>>, vector<1x1xf32>
    %654 = vector.broadcast %653 : vector<1x1xf32> to vector<8x1xf32>
    %655 = arith.addf %652, %654 : vector<8x1xf32>
    %656 = arith.negf %655 : vector<8x1xf32>
    %657 = math.exp %656 : vector<8x1xf32>
    %cst_339 = arith.constant 1.000000e+00 : f32
    %658 = vector.broadcast %cst_339 : f32 to vector<8x1xf32>
    %659 = arith.addf %658, %657 : vector<8x1xf32>
    %660 = arith.divf %658, %659 : vector<8x1xf32>
    %c0_340 = arith.constant 0 : index
    %c0_341 = arith.constant 0 : index
    %661 = vector.load %arg42[%c0_340, %c0_341] : memref<1x5xf32, #tpu.memory_space<vmem>>, vector<1x5xf32>
    %662 = vector.extract_strided_slice %661 {offsets = [0, 0], sizes = [1, 1], strides = [1, 1]} : vector<1x5xf32> to vector<1x1xf32>
    %663 = vector.broadcast %662 : vector<1x1xf32> to vector<8x1xf32>
    %664 = arith.mulf %24, %663 : vector<8x1xf32>
    %665 = vector.extract_strided_slice %661 {offsets = [0, 1], sizes = [1, 1], strides = [1, 1]} : vector<1x5xf32> to vector<1x1xf32>
    %666 = vector.broadcast %665 : vector<1x1xf32> to vector<8x1xf32>
    %667 = arith.mulf %220, %666 : vector<8x1xf32>
    %668 = arith.addf %664, %667 : vector<8x1xf32>
    %669 = vector.extract_strided_slice %661 {offsets = [0, 2], sizes = [1, 1], strides = [1, 1]} : vector<1x5xf32> to vector<1x1xf32>
    %670 = vector.broadcast %669 : vector<1x1xf32> to vector<8x1xf32>
    %671 = arith.mulf %331, %670 : vector<8x1xf32>
    %672 = arith.addf %668, %671 : vector<8x1xf32>
    %673 = vector.extract_strided_slice %661 {offsets = [0, 3], sizes = [1, 1], strides = [1, 1]} : vector<1x5xf32> to vector<1x1xf32>
    %674 = vector.broadcast %673 : vector<1x1xf32> to vector<8x1xf32>
    %675 = arith.mulf %638, %674 : vector<8x1xf32>
    %676 = arith.addf %672, %675 : vector<8x1xf32>
    %677 = vector.extract_strided_slice %661 {offsets = [0, 4], sizes = [1, 1], strides = [1, 1]} : vector<1x5xf32> to vector<1x1xf32>
    %678 = vector.broadcast %677 : vector<1x1xf32> to vector<8x1xf32>
    %679 = arith.mulf %660, %678 : vector<8x1xf32>
    %680 = arith.addf %676, %679 : vector<8x1xf32>
    %c0_342 = arith.constant 0 : index
    %c0_343 = arith.constant 0 : index
    %681 = vector.load %arg43[%c0_342, %c0_343] : memref<8x1xf32, #tpu.memory_space<vmem>>, vector<8x1xf32>
    tpu.vector_store %arg43[%c0_342, %c0_343], %680 {strides = array<i32>} : memref<8x1xf32, #tpu.memory_space<vmem>>, vector<8x1xf32>,
    return
  }
  func.func @transform_0(%arg0: i32) -> (i32, i32) {
    %c0_i32 = arith.constant 0 : i32
    %c0_i32_0 = arith.constant 0 : i32
    return %arg0, %c0_i32 : i32, i32
  }
  func.func @transform_1(%arg0: i32) -> (i32, i32) {
    %c0_i32 = arith.constant 0 : i32
    %c0_i32_0 = arith.constant 0 : i32
    %c0_i32_1 = arith.constant 0 : i32
    return %c0_i32, %c0_i32_0 : i32, i32
  }
  func.func @transform_2(%arg0: i32) -> (i32, i32) {
    %c0_i32 = arith.constant 0 : i32
    %c0_i32_0 = arith.constant 0 : i32
    %c0_i32_1 = arith.constant 0 : i32
    return %c0_i32, %c0_i32_0 : i32, i32
  }
  func.func @transform_3(%arg0: i32) -> (i32, i32) {
    %c0_i32 = arith.constant 0 : i32
    %c0_i32_0 = arith.constant 0 : i32
    %c0_i32_1 = arith.constant 0 : i32
    return %c0_i32, %c0_i32_0 : i32, i32
  }
  func.func @transform_4(%arg0: i32) -> (i32, i32) {
    %c0_i32 = arith.constant 0 : i32
    %c0_i32_0 = arith.constant 0 : i32
    %c0_i32_1 = arith.constant 0 : i32
    return %c0_i32, %c0_i32_0 : i32, i32
  }
  func.func @transform_5(%arg0: i32) -> (i32, i32) {
    %c0_i32 = arith.constant 0 : i32
    %c0_i32_0 = arith.constant 0 : i32
    %c0_i32_1 = arith.constant 0 : i32
    return %c0_i32, %c0_i32_0 : i32, i32
  }
  func.func @transform_6(%arg0: i32) -> (i32, i32) {
    %c0_i32 = arith.constant 0 : i32
    %c0_i32_0 = arith.constant 0 : i32
    %c0_i32_1 = arith.constant 0 : i32
    return %c0_i32, %c0_i32_0 : i32, i32
  }
  func.func @transform_7(%arg0: i32) -> (i32, i32, i32) {
    %c0_i32 = arith.constant 0 : i32
    %c0_i32_0 = arith.constant 0 : i32
    %c0_i32_1 = arith.constant 0 : i32
    %c0_i32_2 = arith.constant 0 : i32
    return %c0_i32, %c0_i32_0, %c0_i32_1 : i32, i32, i32
  }
  func.func @transform_8(%arg0: i32) -> (i32, i32) {
    %c0_i32 = arith.constant 0 : i32
    %c0_i32_0 = arith.constant 0 : i32
    %c0_i32_1 = arith.constant 0 : i32
    return %c0_i32, %c0_i32_0 : i32, i32
  }
  func.func @transform_9(%arg0: i32) -> (i32, i32, i32) {
    %c0_i32 = arith.constant 0 : i32
    %c0_i32_0 = arith.constant 0 : i32
    %c0_i32_1 = arith.constant 0 : i32
    %c0_i32_2 = arith.constant 0 : i32
    return %c0_i32, %c0_i32_0, %c0_i32_1 : i32, i32, i32
  }
  func.func @transform_10(%arg0: i32) -> (i32, i32) {
    %c0_i32 = arith.constant 0 : i32
    %c0_i32_0 = arith.constant 0 : i32
    %c0_i32_1 = arith.constant 0 : i32
    return %c0_i32, %c0_i32_0 : i32, i32
  }
  func.func @transform_11(%arg0: i32) -> (i32, i32, i32) {
    %c0_i32 = arith.constant 0 : i32
    %c0_i32_0 = arith.constant 0 : i32
    %c0_i32_1 = arith.constant 0 : i32
    %c0_i32_2 = arith.constant 0 : i32
    return %c0_i32, %c0_i32_0, %c0_i32_1 : i32, i32, i32
  }
  func.func @transform_12(%arg0: i32) -> (i32, i32) {
    %c0_i32 = arith.constant 0 : i32
    %c0_i32_0 = arith.constant 0 : i32
    %c0_i32_1 = arith.constant 0 : i32
    return %c0_i32, %c0_i32_0 : i32, i32
  }
  func.func @transform_13(%arg0: i32) -> (i32, i32) {
    %c0_i32 = arith.constant 0 : i32
    %c0_i32_0 = arith.constant 0 : i32
    %c0_i32_1 = arith.constant 0 : i32
    return %c0_i32, %c0_i32_0 : i32, i32
  }
  func.func @transform_14(%arg0: i32) -> (i32, i32) {
    %c0_i32 = arith.constant 0 : i32
    %c0_i32_0 = arith.constant 0 : i32
    %c0_i32_1 = arith.constant 0 : i32
    return %c0_i32, %c0_i32_0 : i32, i32
  }
  func.func @transform_15(%arg0: i32) -> (i32, i32) {
    %c0_i32 = arith.constant 0 : i32
    %c0_i32_0 = arith.constant 0 : i32
    %c0_i32_1 = arith.constant 0 : i32
    return %c0_i32, %c0_i32_0 : i32, i32
  }
  func.func @transform_16(%arg0: i32) -> (i32, i32) {
    %c0_i32 = arith.constant 0 : i32
    %c0_i32_0 = arith.constant 0 : i32
    %c0_i32_1 = arith.constant 0 : i32
    return %c0_i32, %c0_i32_0 : i32, i32
  }
  func.func @transform_17(%arg0: i32) -> (i32, i32, i32) {
    %c0_i32 = arith.constant 0 : i32
    %c0_i32_0 = arith.constant 0 : i32
    %c0_i32_1 = arith.constant 0 : i32
    %c0_i32_2 = arith.constant 0 : i32
    return %c0_i32, %c0_i32_0, %c0_i32_1 : i32, i32, i32
  }
  func.func @transform_18(%arg0: i32) -> (i32, i32, i32) {
    %c0_i32 = arith.constant 0 : i32
    %c0_i32_0 = arith.constant 0 : i32
    %c0_i32_1 = arith.constant 0 : i32
    %c0_i32_2 = arith.constant 0 : i32
    return %c0_i32, %c0_i32_0, %c0_i32_1 : i32, i32, i32
  }
  func.func @transform_19(%arg0: i32) -> (i32, i32) {
    %c0_i32 = arith.constant 0 : i32
    %c0_i32_0 = arith.constant 0 : i32
    %c0_i32_1 = arith.constant 0 : i32
    return %c0_i32, %c0_i32_0 : i32, i32
  }
  func.func @transform_20(%arg0: i32) -> (i32, i32) {
    %c0_i32 = arith.constant 0 : i32
    %c0_i32_0 = arith.constant 0 : i32
    %c0_i32_1 = arith.constant 0 : i32
    return %c0_i32, %c0_i32_0 : i32, i32
  }
  func.func @transform_21(%arg0: i32) -> (i32, i32) {
    %c0_i32 = arith.constant 0 : i32
    %c0_i32_0 = arith.constant 0 : i32
    %c0_i32_1 = arith.constant 0 : i32
    return %c0_i32, %c0_i32_0 : i32, i32
  }
  func.func @transform_22(%arg0: i32) -> (i32, i32) {
    %c0_i32 = arith.constant 0 : i32
    %c0_i32_0 = arith.constant 0 : i32
    %c0_i32_1 = arith.constant 0 : i32
    return %c0_i32, %c0_i32_0 : i32, i32
  }
  func.func @transform_23(%arg0: i32) -> (i32, i32, i32) {
    %c0_i32 = arith.constant 0 : i32
    %c0_i32_0 = arith.constant 0 : i32
    %c0_i32_1 = arith.constant 0 : i32
    %c0_i32_2 = arith.constant 0 : i32
    return %c0_i32, %c0_i32_0, %c0_i32_1 : i32, i32, i32
  }
  func.func @transform_24(%arg0: i32) -> (i32, i32, i32) {
    %c0_i32 = arith.constant 0 : i32
    %c0_i32_0 = arith.constant 0 : i32
    %c0_i32_1 = arith.constant 0 : i32
    %c0_i32_2 = arith.constant 0 : i32
    return %c0_i32, %c0_i32_0, %c0_i32_1 : i32, i32, i32
  }
  func.func @transform_25(%arg0: i32) -> (i32, i32, i32) {
    %c0_i32 = arith.constant 0 : i32
    %c0_i32_0 = arith.constant 0 : i32
    %c0_i32_1 = arith.constant 0 : i32
    %c0_i32_2 = arith.constant 0 : i32
    return %c0_i32, %c0_i32_0, %c0_i32_1 : i32, i32, i32
  }
  func.func @transform_26(%arg0: i32) -> (i32, i32, i32) {
    %c0_i32 = arith.constant 0 : i32
    %c0_i32_0 = arith.constant 0 : i32
    %c0_i32_1 = arith.constant 0 : i32
    %c0_i32_2 = arith.constant 0 : i32
    return %c0_i32, %c0_i32_0, %c0_i32_1 : i32, i32, i32
  }
  func.func @transform_27(%arg0: i32) -> (i32, i32, i32) {
    %c0_i32 = arith.constant 0 : i32
    %c0_i32_0 = arith.constant 0 : i32
    %c0_i32_1 = arith.constant 0 : i32
    %c0_i32_2 = arith.constant 0 : i32
    return %c0_i32, %c0_i32_0, %c0_i32_1 : i32, i32, i32
  }
  func.func @transform_28(%arg0: i32) -> (i32, i32, i32) {
    %c0_i32 = arith.constant 0 : i32
    %c0_i32_0 = arith.constant 0 : i32
    %c0_i32_1 = arith.constant 0 : i32
    %c0_i32_2 = arith.constant 0 : i32
    return %c0_i32, %c0_i32_0, %c0_i32_1 : i32, i32, i32
  }
  func.func @transform_29(%arg0: i32) -> (i32, i32, i32) {
    %c0_i32 = arith.constant 0 : i32
    %c0_i32_0 = arith.constant 0 : i32
    %c0_i32_1 = arith.constant 0 : i32
    %c0_i32_2 = arith.constant 0 : i32
    return %c0_i32, %c0_i32_0, %c0_i32_1 : i32, i32, i32
  }
  func.func @transform_30(%arg0: i32) -> (i32, i32, i32) {
    %c0_i32 = arith.constant 0 : i32
    %c0_i32_0 = arith.constant 0 : i32
    %c0_i32_1 = arith.constant 0 : i32
    %c0_i32_2 = arith.constant 0 : i32
    return %c0_i32, %c0_i32_0, %c0_i32_1 : i32, i32, i32
  }
  func.func @transform_31(%arg0: i32) -> (i32, i32, i32) {
    %c0_i32 = arith.constant 0 : i32
    %c0_i32_0 = arith.constant 0 : i32
    %c0_i32_1 = arith.constant 0 : i32
    %c0_i32_2 = arith.constant 0 : i32
    return %c0_i32, %c0_i32_0, %c0_i32_1 : i32, i32, i32
  }
  func.func @transform_32(%arg0: i32) -> (i32, i32, i32) {
    %c0_i32 = arith.constant 0 : i32
    %c0_i32_0 = arith.constant 0 : i32
    %c0_i32_1 = arith.constant 0 : i32
    %c0_i32_2 = arith.constant 0 : i32
    return %c0_i32, %c0_i32_0, %c0_i32_1 : i32, i32, i32
  }
  func.func @transform_33(%arg0: i32) -> (i32, i32) {
    %c0_i32 = arith.constant 0 : i32
    %c0_i32_0 = arith.constant 0 : i32
    %c0_i32_1 = arith.constant 0 : i32
    return %c0_i32, %c0_i32_0 : i32, i32
  }
  func.func @transform_34(%arg0: i32) -> (i32, i32) {
    %c0_i32 = arith.constant 0 : i32
    %c0_i32_0 = arith.constant 0 : i32
    %c0_i32_1 = arith.constant 0 : i32
    return %c0_i32, %c0_i32_0 : i32, i32
  }
  func.func @transform_35(%arg0: i32) -> (i32, i32) {
    %c0_i32 = arith.constant 0 : i32
    %c0_i32_0 = arith.constant 0 : i32
    %c0_i32_1 = arith.constant 0 : i32
    return %c0_i32, %c0_i32_0 : i32, i32
  }
  func.func @transform_36(%arg0: i32) -> (i32, i32) {
    %c0_i32 = arith.constant 0 : i32
    %c0_i32_0 = arith.constant 0 : i32
    %c0_i32_1 = arith.constant 0 : i32
    return %c0_i32, %c0_i32_0 : i32, i32
  }
  func.func @transform_37(%arg0: i32) -> (i32, i32) {
    %c0_i32 = arith.constant 0 : i32
    %c0_i32_0 = arith.constant 0 : i32
    %c0_i32_1 = arith.constant 0 : i32
    return %c0_i32, %c0_i32_0 : i32, i32
  }
  func.func @transform_38(%arg0: i32) -> (i32, i32) {
    %c0_i32 = arith.constant 0 : i32
    %c0_i32_0 = arith.constant 0 : i32
    %c0_i32_1 = arith.constant 0 : i32
    return %c0_i32, %c0_i32_0 : i32, i32
  }
  func.func @transform_39(%arg0: i32) -> (i32, i32) {
    %c0_i32 = arith.constant 0 : i32
    %c0_i32_0 = arith.constant 0 : i32
    %c0_i32_1 = arith.constant 0 : i32
    return %c0_i32, %c0_i32_0 : i32, i32
  }
  func.func @transform_40(%arg0: i32) -> (i32, i32) {
    %c0_i32 = arith.constant 0 : i32
    %c0_i32_0 = arith.constant 0 : i32
    %c0_i32_1 = arith.constant 0 : i32
    return %c0_i32, %c0_i32_0 : i32, i32
  }
  func.func @transform_41(%arg0: i32) -> (i32, i32) {
    %c0_i32 = arith.constant 0 : i32
    %c0_i32_0 = arith.constant 0 : i32
    %c0_i32_1 = arith.constant 0 : i32
    return %c0_i32, %c0_i32_0 : i32, i32
  }
  func.func @transform_42(%arg0: i32) -> (i32, i32) {
    %c0_i32 = arith.constant 0 : i32
    %c0_i32_0 = arith.constant 0 : i32
    return %arg0, %c0_i32 : i32, i32
  }
}

</mosaic_0001>

<bundles_post_ra>
// kernel: _lambda_.1
= control target key start
LH: loop header
LB: loop body
LE: loop exit
PB: predicated region body
PF: predicated region fallthrough
CT: control target
= control target key end

     0   :  { %s6838_s6 = smov 1   ;;  %s6839_s10 = smov 2   ;;  %s7789_s0 = inlined_call_operand.smem [shape: u32[43], index: -1, kind: input, shape index: {}] }
   0x1   :  { %s6930_s5 = sld [smem:[%s7789_s0]]   ;;  %s6840_s14 = smov 3  }
   0x2   :  { %s6935_s9 = sld [smem:[%s7789_s0 + %s6838_s6]]   ;;  %s6841_s18 = smov 4  }
   0x3   :  { %s6940_s13 = sld [smem:[%s7789_s0 + %s6839_s10]]   ;;  %s6842_s22 = smov 5  }
   0x4   :  { %s6945_s17 = sld [smem:[%s7789_s0 + %s6840_s14]]   ;;  %s6843_s26 = smov 6  }
   0x5   :  { %s6950_s21 = sld [smem:[%s7789_s0 + %s6841_s18]]   ;;  %s6844_s30 = smov 7  }
   0x6   :  { %s6955_s25 = sld [smem:[%s7789_s0 + %s6842_s22]]   ;;  %s6845_s4 = smov 8  }
   0x7   :  { %7812 = sst [smem:[#allocation61_spill]] %s6930_s5  ;;  %s6846_s10 = smov 9  }
   0x8   :  { %7813 = sst [smem:[#allocation62_spill]] %s6935_s9  ;;  %s6847_s15 = smov 10  }
   0x9   :  { %s4370_s29 = sld [smem:[%s7789_s0 + %s6843_s26]]   ;;  %s6848_s20 = smov 11  }
   0xa   :  { %7814 = sst [smem:[#allocation63_spill]] %s6945_s17  ;;  %s6849_s26 = smov 12  }
   0xb   :  { %s6963_s3 = sld [smem:[%s7789_s0 + %s6844_s30]]   ;;  %s6850_s1 = smov 13  }
   0xc   :  { %7815 = sst [smem:[#allocation64_spill]] %s6955_s25  ;;  %s6851_s7 = smov 15  }
   0xd   :  { %s6968_s8 = sld [smem:[%s7789_s0 + %s6845_s4]]   ;;  %s6854_s27 = smov 18  }
   0xe   :  { %s6973_s14 = sld [smem:[%s7789_s0 + %s6846_s10]]   ;;  %s6855_s4 = smov 19  }
   0xf   :  { %s6978_s19 = sld [smem:[%s7789_s0 + %s6847_s15]]   ;;  %v90_v0 = vstv %s4370_s29  ;;  %s6852_s15 = smov 16  }
  0x10   :  { %s6983_s24 = sld [smem:[%s7789_s0 + %s6848_s20]]   ;;  %91 = vst [vmem:[#allocation2] sm:$0x1] %v90_v0  ;;  %s6853_s29 = smov 17  }
  0x11   :  { %s6988_s30 = sld [smem:[%s7789_s0 + %s6849_s26]]   ;;  %s6877_s22 = smov 20  }
  0x12   :  { %s6993_s6 = sld [smem:[%s7789_s0 + %s6850_s1]]   ;;  %s6878_s17 = smov 34  }
  0x13   :  { %7816 = sst [smem:[#allocation65_spill]] %s6968_s8 }
  0x14   :  { %s6998_s12 = sld [smem:[%s7789_s0 + %s6851_s7]]  }
  0x15   :  { %7817 = sst [smem:[#allocation66_spill]] %s6978_s19 }
  0x16   :  { %s7003_s20 = sld [smem:[%s7789_s0 + %s6852_s15]]   ;;  %s6856_s15 = smov 21  }
  0x17   :  { %7818 = sst [smem:[#allocation67_spill]] %s6988_s30 }
  0x18   :  { %s7008_s26 = sld [smem:[%s7789_s0 + %s6853_s29]]   ;;  %s6857_s29 = smov 22  }
  0x19   :  { %s7013_s2 = sld [smem:[%s7789_s0 + %s6854_s27]]   ;;  %s6858_s27 = smov 23  }
  0x1a   :  { %7819 = sst [smem:[#allocation68_spill]] %s6998_s12 }
  0x1b   :  { %s7018_s11 = sld [smem:[%s7789_s0 + %s6855_s4]]   ;;  %s6859_s4 = smov 24  }
  0x1c   :  { %s7023_s5 = sld [smem:[%s7789_s0 + %s6856_s15]]   ;;  %s6860_s15 = smov 25  }
  0x1d   :  { %s7033_s12 = sld [smem:[%s7789_s0 + %s6858_s27]]   ;;  %s6862_s27 = smov 27  }
  0x1e   :  { %7820 = sst [smem:[#allocation69_spill]] %s7008_s26 }
  0x1f   :  { %s7028_s26 = sld [smem:[%s7789_s0 + %s6857_s29]]   ;;  %s6861_s29 = smov 26  }
  0x20   :  { %s7043_s30 = sld [smem:[%s7789_s0 + %s6860_s15]]   ;;  %s6864_s15 = smov 29  }
  0x21   :  { %7821 = sst [smem:[#allocation70_spill]] %s7018_s11 }
  0x22   :  { %s7038_s11 = sld [smem:[%s7789_s0 + %s6859_s4]]   ;;  %s6863_s4 = smov 28  }
  0x23   :  { %s7053_s19 = sld [smem:[%s7789_s0 + %s6862_s27]]   ;;  %s6866_s27 = smov 31  }
  0x24   :  { %s7063_s8 = sld [smem:[%s7789_s0 + %s6864_s15]]   ;;  %s6868_s15 = smov 33  }
  0x25   :  { %7822 = sst [smem:[#allocation71_spill]] %s7028_s26 }
  0x26   :  { %s7048_s26 = sld [smem:[%s7789_s0 + %s6861_s29]]   ;;  %s6865_s29 = smov 30  }
  0x27   :  { %s7073_s25 = sld [smem:[%s7789_s0 + %s6866_s27]]   ;;  %s6870_s27 = smov 36  }
  0x28   :  { %7823 = sst [smem:[#allocation72_spill]] %s7038_s11 }
  0x29   :  { %s7058_s11 = sld [smem:[%s7789_s0 + %s6863_s4]]   ;;  %s6867_s4 = smov 32  }
  0x2a   :  { %7826 = sst [smem:[#allocation75_spill]] %s7063_s8 }
  0x2b   :  { %s7083_s8 = sld [smem:[%s7789_s0 + %s6868_s15]]   ;;  %s6872_s15 = smov 38  }
  0x2c   :  { %7824 = sst [smem:[#allocation73_spill]] %s7048_s26 }
  0x2d   :  { %s7068_s26 = sld [smem:[%s7789_s0 + %s6865_s29]]   ;;  %s6869_s29 = smov 35  }
  0x2e   :  { %7828 = sst [smem:[#allocation77_spill]] %s7073_s25 }
  0x2f   :  { %7825 = sst [smem:[#allocation74_spill]] %s7058_s11 }
  0x30   :  { %s7078_s11 = sld [smem:[%s7789_s0 + %s6867_s4]]   ;;  %s6871_s4 = smov 37  }
  0x31   :  { %7830 = sst [smem:[#allocation79_spill]] %s7083_s8 }
  0x32   :  { %s7093_s25 = sld [smem:[%s7789_s0 + %s6870_s27]]   ;;  %s6874_s27 = smov 41  }
  0x33   :  { %7827 = sst [smem:[#allocation76_spill]] %s7068_s26 }
  0x34   :  { %s7088_s26 = sld [smem:[%s7789_s0 + %s6869_s29]]   ;;  %s6873_s29 = smov 39  }
  0x35   :  { %s7103_s8 = sld [smem:[%s7789_s0 + %s6872_s15]]   ;;  %s6876_s15 = smov 14  }
  0x36   :  { %7829 = sst [smem:[#allocation78_spill]] %s7078_s11 }
  0x37   :  { %s7098_s11 = sld [smem:[%s7789_s0 + %s6871_s4]]   ;;  %s6875_s4 = smov 42  }
  0x38   :  { %7832 = sst [smem:[#allocation81_spill]] %s7093_s25 }
  0x39   :  { %s7113_s25 = sld [smem:[%s7789_s0 + %s6874_s27]]  }
  0x3a   :  { %7831 = sst [smem:[#allocation80_spill]] %s7088_s26 }
  0x3b   :  { %7834 = sst [smem:[#allocation83_spill]] %s7103_s8 }
  0x3c   :  { %s7108_s26 = sld [smem:[%s7789_s0 + %s6873_s29]]  }
  0x3d   :  { %7833 = sst [smem:[#allocation82_spill]] %s7098_s11 }
  0x3e   :  { %s7118_s11 = sld [smem:[%s7789_s0 + %s6875_s4]]  }
  0x3f   :  { %7836 = sst [smem:[#allocation85_spill]] %s7113_s25  ;;  %s6879_s25 = smov 40  }
  0x40   :  { %s4378_s8 = sld [smem:[%s7789_s0 + %s6876_s15]]  }
  0x41   :  { %s4398_s1 = sld [smem:[%s7789_s0 + %s6878_s17]]  }
  0x42   :  { %7835 = sst [smem:[#allocation84_spill]] %s7108_s26 }
  0x43   :  { %s4384_s26 = sld [smem:[%s7789_s0 + %s6877_s22]]  }
  0x44   :  { %s4404_s4 = sld [smem:[%s7789_s0 + %s6879_s25]]  }
  0x46   :  { %v92_v1 = vstv %s4378_s8 }
  0x47   :  { %93 = vst [vmem:[#allocation3] sm:$0x1] %v92_v1  ;;  %v96_v3 = vstv %s4398_s1 }
  0x48   :  { %97 = vst [vmem:[#allocation5] sm:$0x1] %v96_v3 }
  0x49   :  { %v94_v2 = vstv %s4384_s26 }
  0x4a   :  { %95 = vst [vmem:[#allocation4] sm:$0x1] %v94_v2  ;;  %v98_v4 = vstv %s4404_s4 }
  0x4b   :  { %99 = vst [vmem:[#allocation6] sm:$0x1] %v98_v4 }
  0x4c   :  { %100 = vsyncpa [#allocation8], 0 }
  0x4d   :  { %101 = vsyncpa [#allocation10], 0 }
  0x4e   :  { %102 = vsyncpa [#allocation13], 0 }
  0x4f   :  { %103 = vsyncpa [#allocation16], 0 }
  0x50   :  { %104 = vsyncpa [#allocation19], 0 }
  0x51   :  { %105 = vsyncpa [#allocation22], 0 }
  0x52   :  { %106 = vsyncpa [#allocation25], 0 }
  0x53   :  { %107 = vsyncpa [#allocation28], 0 }
  0x54   :  { %108 = vsyncpa [#allocation31], 0 }
  0x55   :  { %109 = vsyncpa [#allocation34], 0 }
  0x56   :  { %110 = vsyncpa [#allocation37], 0 }
  0x57   :  { %111 = vsyncpa [#allocation40], 0 }
  0x58   :  { %112 = vsyncpa [#allocation43], 0 }
  0x59   :  { %113 = vsyncpa [#allocation46], 0  ;;  %s6880_s0 = smov [#allocation9]   ;;  %s6881_s17 = smov [#allocation12]  }
  0x5a   :  { %s134_s9 = sshll.u32 %s6880_s0, 4  ;;  %s156_s25 = sshll.u32 %s6881_s17, 4  ;;  %s135_s9 = int_to_ptr.vmem [resolvable:$true] %s134_s9  ;;  %s157_s25 = int_to_ptr.vmem [resolvable:$true] %s156_s25 }
  0x5b   :  { %s6238_s8 = scalar_lea.hbm %s6940_s13, 16 }
  0x5c   :  { %p6239_p0 = scmp.ne.s32.totalorder %s6940_s13, %s6238_s8  ;;  %p6242_p1 = scmp.lt.u32.totalorder %s6238_s8, %s6940_s13 }
  0x5e   :  { %p6244_p2 = pnand %p6242_p1, %p6239_p0 }
  0x60   :  { %6247 = shalt.err (!%p6244_p2)
}
  0x61   :  { %s6248_s26 = scalar_lea.vmem %s135_s9, 16  ;;  %s6252_s10 = scalar_lea.vmem %s135_s9, 32 }
  0x62   :  { %p6249_p3 = scmp.ne.s32.totalorder %s135_s9, %s6248_s26  ;;  %p6253_p4 = scmp.lt.s32.totalorder %s135_s9, %s135_s9 }
  0x63   :  { %p6254_p5 = scmp.lt.s32.totalorder %s6252_s10, %s6248_s26 }
  0x65   :  { %p6255_p6 = por %p6254_p5, %p6253_p4 }
  0x67   :  { %p6256_p7 = pnand %p6255_p6, %p6249_p3 }
  0x69   :  { %6259 = shalt.err (!%p6256_p7)
}
  0x6a   :  { %137 = dma.hbm_to_vmem [thread:$0]  %s6940_s13, 16, %s135_s9, [#allocation10]  }
  0x6b   :  { %s6260_s15 = scalar_lea.hbm %s6950_s21, 16 }
  0x6c   :  { %p6261_p8 = scmp.ne.s32.totalorder %s6950_s21, %s6260_s15  ;;  %p6264_p9 = scmp.lt.u32.totalorder %s6260_s15, %s6950_s21 }
  0x6e   :  { %p6266_p10 = pnand %p6264_p9, %p6261_p8 }
  0x70   :  { %6269 = shalt.err (!%p6266_p10)
}
  0x71   :  { %s6270_s16 = scalar_lea.vmem %s157_s25, 16  ;;  %s6274_s18 = scalar_lea.vmem %s157_s25, 32 }
  0x72   :  { %p6271_p11 = scmp.ne.s32.totalorder %s157_s25, %s6270_s16  ;;  %p6275_p12 = scmp.lt.s32.totalorder %s157_s25, %s157_s25 }
  0x73   :  { %p6276_p13 = scmp.lt.s32.totalorder %s6274_s18, %s6270_s16 }
  0x75   :  { %p6277_p0 = por %p6276_p13, %p6275_p12 }
  0x77   :  { %p6278_p1 = pnand %p6277_p0, %p6271_p11 }
  0x79   :  { %6281 = shalt.err (!%p6278_p1)
}
  0x7a   :  { %159 = dma.hbm_to_vmem [thread:$0]  %s6950_s21, 16, %s157_s25, [#allocation13]  }
  0x7b   :  { %s6882_s22 = smov [#allocation15]   ;;  %s6883_s29 = smov [#allocation18]  }
  0x7c   :  { %s179_s13 = sshll.u32 %s6882_s22, 4  ;;  %s201_s23 = sshll.u32 %s6883_s29, 4  ;;  %s180_s13 = int_to_ptr.vmem [resolvable:$true] %s179_s13  ;;  %s7140_s23 = int_to_ptr.vmem [resolvable:$true] %s201_s23 }
  0x7d   :  { %s6282_s28 = scalar_lea.hbm %s6963_s3, 2304 }
  0x7e   :  { %p6283_p2 = scmp.ne.s32.totalorder %s6963_s3, %s6282_s28  ;;  %p6286_p3 = scmp.lt.u32.totalorder %s6282_s28, %s6963_s3 }
  0x80   :  { %p6288_p4 = pnand %p6286_p3, %p6283_p2 }
  0x82   :  { %6291 = shalt.err (!%p6288_p4)
}
  0x83   :  { %s6292_s27 = scalar_lea.vmem %s180_s13, 2304  ;;  %p6297_p6 = scmp.lt.s32.totalorder %s180_s13, %s180_s13 }
  0x84   :  { %p6293_p5 = scmp.ne.s32.totalorder %s180_s13, %s6292_s27  ;;  %p6298_p7 = scmp.lt.s32.totalorder %s6292_s27, %s6292_s27 }
  0x86   :  { %p6299_p8 = por %p6298_p7, %p6297_p6 }
  0x88   :  { %p6300_p9 = pnand %p6299_p8, %p6293_p5 }
  0x8a   :  { %6303 = shalt.err (!%p6300_p9)
}
  0x8b   :  { %s6884_s21 = smov 128   ;;  %s6885_s1 = smov 8  }
  0x8c   :  { %185 = dma.hbm_to_vmem [thread:$0]  %s6963_s3, 2304, %s180_s13, [#allocation16], %s6884_s21, %s6884_s21, %s6885_s1  }
  0x8d   :  { %s6304_s7 = scalar_lea.hbm %s6973_s14, 3072 }
  0x8e   :  { %p6305_p10 = scmp.ne.s32.totalorder %s6973_s14, %s6304_s7  ;;  %p6308_p11 = scmp.lt.u32.totalorder %s6304_s7, %s6973_s14 }
  0x90   :  { %p6310_p12 = pnand %p6308_p11, %p6305_p10 }
  0x92   :  { %6313 = shalt.err (!%p6310_p12)
}
  0x93   :  { %s6314_s4 = scalar_lea.vmem %s7140_s23, 3072  ;;  %p6319_p0 = scmp.lt.s32.totalorder %s7140_s23, %s7140_s23 }
  0x94   :  { %p6315_p13 = scmp.ne.s32.totalorder %s7140_s23, %s6314_s4  ;;  %p6320_p1 = scmp.lt.s32.totalorder %s6314_s4, %s6314_s4 }
  0x96   :  { %p6321_p2 = por %p6320_p1, %p6319_p0 }
  0x98   :  { %p6322_p3 = pnand %p6321_p2, %p6315_p13 }
  0x9a   :  { %6325 = shalt.err (!%p6322_p3)
}
  0x9b   :  { %207 = dma.hbm_to_vmem [thread:$0]  %s6973_s14, 3072, %s7140_s23, [#allocation19], %s6884_s21, %s6884_s21, %s6885_s1  }
  0x9c   :  { %s6886_s3 = smov [#allocation21]   ;;  %s6887_s9 = smov [#allocation24]  }
  0x9d   :  { %s223_s0 = sshll.u32 %s6886_s3, 4  ;;  %s245_s17 = sshll.u32 %s6887_s9, 4  ;;  %s224_s0 = int_to_ptr.vmem [resolvable:$true] %s223_s0  ;;  %s7161_s17 = int_to_ptr.vmem [resolvable:$true] %s245_s17 }
  0x9e   :  { %s6326_s25 = scalar_lea.hbm %s6983_s24, 3072 }
  0x9f   :  { %p6327_p4 = scmp.ne.s32.totalorder %s6983_s24, %s6326_s25  ;;  %p6330_p5 = scmp.lt.u32.totalorder %s6326_s25, %s6983_s24 }
  0xa1   :  { %p6332_p6 = pnand %p6330_p5, %p6327_p4 }
  0xa3   :  { %6335 = shalt.err (!%p6332_p6)
}
  0xa4   :  { %s6336_s8 = scalar_lea.vmem %s224_s0, 3072  ;;  %p6341_p8 = scmp.lt.s32.totalorder %s224_s0, %s224_s0 }
  0xa5   :  { %p6337_p7 = scmp.ne.s32.totalorder %s224_s0, %s6336_s8  ;;  %p6342_p9 = scmp.lt.s32.totalorder %s6336_s8, %s6336_s8 }
  0xa7   :  { %p6343_p10 = por %p6342_p9, %p6341_p8 }
  0xa9   :  { %p6344_p11 = pnand %p6343_p10, %p6337_p7 }
  0xab   :  { %6347 = shalt.err (!%p6344_p11)
}
  0xac   :  { %229 = dma.hbm_to_vmem [thread:$0]  %s6983_s24, 3072, %s224_s0, [#allocation22], %s6884_s21, %s6884_s21, %s6885_s1  }
  0xad   :  { %s6348_s14 = scalar_lea.hbm %s6993_s6, 512 }
  0xae   :  { %p6349_p12 = scmp.ne.s32.totalorder %s6993_s6, %s6348_s14  ;;  %p6352_p13 = scmp.lt.u32.totalorder %s6348_s14, %s6993_s6 }
  0xb0   :  { %p6354_p0 = pnand %p6352_p13, %p6349_p12 }
  0xb2   :  { %6357 = shalt.err (!%p6354_p0)
}
  0xb3   :  { %s6358_s26 = scalar_lea.vmem %s7161_s17, 512  ;;  %p6363_p2 = scmp.lt.s32.totalorder %s7161_s17, %s7161_s17 }
  0xb4   :  { %p6359_p1 = scmp.ne.s32.totalorder %s7161_s17, %s6358_s26  ;;  %p6364_p3 = scmp.lt.s32.totalorder %s6358_s26, %s6358_s26 }
  0xb6   :  { %p6365_p4 = por %p6364_p3, %p6363_p2 }
  0xb8   :  { %p6366_p5 = pnand %p6365_p4, %p6359_p1 }
  0xba   :  { %6369 = shalt.err (!%p6366_p5)
}
  0xbb   :  { %251 = dma.hbm_to_vmem [thread:$0]  %s6993_s6, 512, %s7161_s17, [#allocation25], %s6884_s21, %s6884_s21, %s6885_s1  }
  0xbc   :  { %s6888_s24 = smov [#allocation27]   ;;  %s6889_s15 = smov [#allocation30]  }
  0xbd   :  { %s272_s10 = sshll.u32 %s6888_s24, 4  ;;  %s293_s16 = sshll.u32 %s6889_s15, 4  ;;  %s273_s10 = int_to_ptr.vmem [resolvable:$true] %s272_s10  ;;  %s7182_s16 = int_to_ptr.vmem [resolvable:$true] %s293_s16 }
  0xbe   :  { %s6370_s18 = scalar_lea.hbm %s7003_s20, 16 }
  0xbf   :  { %p6371_p6 = scmp.ne.s32.totalorder %s7003_s20, %s6370_s18  ;;  %p6374_p7 = scmp.lt.u32.totalorder %s6370_s18, %s7003_s20 }
  0xc1   :  { %p6376_p8 = pnand %p6374_p7, %p6371_p6 }
  0xc3   :  { %6379 = shalt.err (!%p6376_p8)
}
  0xc4   :  { %s6380_s22 = scalar_lea.vmem %s273_s10, 16  ;;  %s6384_s13 = scalar_lea.vmem %s273_s10, 32 }
  0xc5   :  { %p6381_p9 = scmp.ne.s32.totalorder %s273_s10, %s6380_s22  ;;  %p6385_p10 = scmp.lt.s32.totalorder %s273_s10, %s273_s10 }
  0xc6   :  { %p6386_p11 = scmp.lt.s32.totalorder %s6384_s13, %s6380_s22 }
  0xc8   :  { %p6387_p12 = por %p6386_p11, %p6385_p10 }
  0xca   :  { %p6388_p13 = pnand %p6387_p12, %p6381_p9 }
  0xcc   :  { %6391 = shalt.err (!%p6388_p13)
}
  0xcd   :  { %275 = dma.hbm_to_vmem [thread:$0]  %s7003_s20, 16, %s273_s10, [#allocation28]  }
  0xce   :  { %s6392_s6 = scalar_lea.hbm %s7013_s2, 128 }
  0xcf   :  { %p6393_p0 = scmp.ne.s32.totalorder %s7013_s2, %s6392_s6  ;;  %p6396_p1 = scmp.lt.u32.totalorder %s6392_s6, %s7013_s2 }
  0xd1   :  { %p6398_p2 = pnand %p6396_p1, %p6393_p0 }
  0xd3   :  { %6401 = shalt.err (!%p6398_p2)
}
  0xd4   :  { %s6402_s29 = scalar_lea.vmem %s7182_s16, 128  ;;  %p6407_p4 = scmp.lt.s32.totalorder %s7182_s16, %s7182_s16 }
  0xd5   :  { %p6403_p3 = scmp.ne.s32.totalorder %s7182_s16, %s6402_s29  ;;  %p6408_p5 = scmp.lt.s32.totalorder %s6402_s29, %s6402_s29 }
  0xd7   :  { %p6409_p6 = por %p6408_p5, %p6407_p4 }
  0xd9   :  { %p6410_p7 = pnand %p6409_p6, %p6403_p3 }
  0xdb   :  { %6413 = shalt.err (!%p6410_p7)
}
  0xdc   :  { %s6890_s23 = smov 32   ;;  %s6891_s20 = smov 2  }
  0xdd   :  { %299 = dma.hbm_to_vmem [thread:$0]  %s7013_s2, 128, %s7182_s16, [#allocation31], %s6890_s23, %s6890_s23, %s6891_s20  }
  0xde   :  { %s6892_s28 = smov [#allocation33]   ;;  %s6893_s7 = smov [#allocation36]  }
  0xdf   :  { %s319_s27 = sshll.u32 %s6892_s28, 4  ;;  %s341_s4 = sshll.u32 %s6893_s7, 4  ;;  %s320_s27 = int_to_ptr.vmem [resolvable:$true] %s319_s27  ;;  %s7197_s4 = int_to_ptr.vmem [resolvable:$true] %s341_s4 }
  0xe0   :  { %s6414_s3 = scalar_lea.hbm %s7023_s5, 768 }
  0xe1   :  { %p6415_p8 = scmp.ne.s32.totalorder %s7023_s5, %s6414_s3  ;;  %p6418_p9 = scmp.lt.u32.totalorder %s6414_s3, %s7023_s5 }
  0xe3   :  { %p6420_p10 = pnand %p6418_p9, %p6415_p8 }
  0xe5   :  { %6423 = shalt.err (!%p6420_p10)
}
  0xe6   :  { %s6424_s0 = scalar_lea.vmem %s320_s27, 768  ;;  %p6429_p12 = scmp.lt.s32.totalorder %s320_s27, %s320_s27 }
  0xe7   :  { %p6425_p11 = scmp.ne.s32.totalorder %s320_s27, %s6424_s0  ;;  %p6430_p13 = scmp.lt.s32.totalorder %s6424_s0, %s6424_s0 }
  0xe9   :  { %p6431_p0 = por %p6430_p13, %p6429_p12 }
  0xeb   :  { %p6432_p1 = pnand %p6431_p0, %p6425_p11 }
  0xed   :  { %6435 = shalt.err (!%p6432_p1)
}
  0xee   :  { %325 = dma.hbm_to_vmem [thread:$0]  %s7023_s5, 768, %s320_s27, [#allocation34], %s6884_s21, %s6884_s21, %s6885_s1  }
  0xef   :  { %s6436_s2 = scalar_lea.hbm %s7033_s12, 4096 }
  0xf0   :  { %p6437_p2 = scmp.ne.s32.totalorder %s7033_s12, %s6436_s2  ;;  %p6440_p3 = scmp.lt.u32.totalorder %s6436_s2, %s7033_s12 }
  0xf2   :  { %p6442_p4 = pnand %p6440_p3, %p6437_p2 }
  0xf4   :  { %6445 = shalt.err (!%p6442_p4)
}
  0xf5   :  { %s6446_s9 = scalar_lea.vmem %s7197_s4, 4096  ;;  %p6451_p6 = scmp.lt.s32.totalorder %s7197_s4, %s7197_s4 }
  0xf6   :  { %p6447_p5 = scmp.ne.s32.totalorder %s7197_s4, %s6446_s9  ;;  %p6452_p7 = scmp.lt.s32.totalorder %s6446_s9, %s6446_s9 }
  0xf8   :  { %p6453_p8 = por %p6452_p7, %p6451_p6 }
  0xfa   :  { %p6454_p9 = pnand %p6453_p8, %p6447_p5 }
  0xfc   :  { %6457 = shalt.err (!%p6454_p9)
}
  0xfd   :  { %347 = dma.hbm_to_vmem [thread:$0]  %s7033_s12, 4096, %s7197_s4, [#allocation37], %s6884_s21, %s6884_s21, %s6885_s1  }
  0xfe   :  { %s6894_s5 = smov [#allocation39]   ;;  %s6895_s25 = smov [#allocation42]  }
  0xff   :  { %s365_s17 = sshll.u32 %s6894_s5, 4  ;;  %s389_s8 = sshll.u32 %s6895_s25, 4  ;;  %s366_s17 = int_to_ptr.vmem [resolvable:$true] %s365_s17  ;;  %s7218_s8 = int_to_ptr.vmem [resolvable:$true] %s389_s8 }
 0x100   :  { %s6458_s14 = scalar_lea.hbm %s7043_s30, 4096 }
 0x101   :  { %p6459_p10 = scmp.ne.s32.totalorder %s7043_s30, %s6458_s14  ;;  %p6462_p11 = scmp.lt.u32.totalorder %s6458_s14, %s7043_s30 }
 0x103   :  { %p6464_p12 = pnand %p6462_p11, %p6459_p10 }
 0x105   :  { %6467 = shalt.err (!%p6464_p12)
}
 0x106   :  { %s6468_s26 = scalar_lea.vmem %s366_s17, 4096  ;;  %p6473_p0 = scmp.lt.s32.totalorder %s366_s17, %s366_s17 }
 0x107   :  { %p6469_p13 = scmp.ne.s32.totalorder %s366_s17, %s6468_s26  ;;  %p6474_p1 = scmp.lt.s32.totalorder %s6468_s26, %s6468_s26 }
 0x109   :  { %p6475_p2 = por %p6474_p1, %p6473_p0 }
 0x10b   :  { %p6476_p3 = pnand %p6475_p2, %p6469_p13 }
 0x10d   :  { %6479 = shalt.err (!%p6476_p3)
}
 0x10e   :  { %371 = dma.hbm_to_vmem [thread:$0]  %s7043_s30, 4096, %s366_s17, [#allocation40], %s6884_s21, %s6884_s21, %s6885_s1  }
 0x10f   :  { %s6480_s12 = scalar_lea.hbm %s7053_s19, 8192 }
 0x110   :  { %p6481_p4 = scmp.ne.s32.totalorder %s7053_s19, %s6480_s12  ;;  %p6484_p5 = scmp.lt.u32.totalorder %s6480_s12, %s7053_s19 }
 0x112   :  { %p6486_p6 = pnand %p6484_p5, %p6481_p4 }
 0x114   :  { %6489 = shalt.err (!%p6486_p6)
}
 0x115   :  { %s6490_s24 = scalar_lea.vmem %s7218_s8, 8192  ;;  %p6495_p8 = scmp.lt.s32.totalorder %s7218_s8, %s7218_s8 }
 0x116   :  { %p6491_p7 = scmp.ne.s32.totalorder %s7218_s8, %s6490_s24  ;;  %p6496_p9 = scmp.lt.s32.totalorder %s6490_s24, %s6490_s24 }
 0x118   :  { %p6497_p10 = por %p6496_p9, %p6495_p8 }
 0x11a   :  { %p6498_p11 = pnand %p6497_p10, %p6491_p7 }
 0x11c   :  { %6501 = shalt.err (!%p6498_p11)
}
 0x11d   :  { %s7837_s30 = sld [smem:[#allocation62_spill]]  ;;  %s6896_s10 = smov [#allocation7]  }
 0x11e   :  { %395 = dma.hbm_to_vmem [thread:$0]  %s7053_s19, 8192, %s7218_s8, [#allocation43], %s6884_s21, %s6884_s21, %s6885_s1  }
 0x11f   :  { %s121_s15 = sshll.u32 %s6896_s10, 4  ;;  %s6897_s16 = smov [#allocation11]   ;;  %s122_s15 = int_to_ptr.vmem [resolvable:$true] %s121_s15 }
 0x120   :  { %s143_s18 = sshll.u32 %s6897_s16, 4  ;;  %s7239_s18 = int_to_ptr.vmem [resolvable:$true] %s143_s18 }
 0x123   :  { %s6502_s22 = scalar_lea.hbm %s7837_s30, 768 }
 0x124   :  { %p6503_p12 = scmp.ne.s32.totalorder %s7837_s30, %s6502_s22  ;;  %p6506_p13 = scmp.lt.u32.totalorder %s6502_s22, %s7837_s30 }
 0x126   :  { %p6508_p0 = pnand %p6506_p13, %p6503_p12 }
 0x128   :  { %6511 = shalt.err (!%p6508_p0)
}
 0x129   :  { %s6512_s13 = scalar_lea.vmem %s122_s15, 768  ;;  %p6517_p2 = scmp.lt.s32.totalorder %s122_s15, %s122_s15 }
 0x12a   :  { %p6513_p1 = scmp.ne.s32.totalorder %s122_s15, %s6512_s13  ;;  %p6518_p3 = scmp.lt.s32.totalorder %s6512_s13, %s6512_s13 }
 0x12c   :  { %p6519_p4 = por %p6518_p3, %p6517_p2 }
 0x12e   :  { %p6520_p5 = pnand %p6519_p4, %p6513_p1 }
 0x130   :  { %6523 = shalt.err (!%p6520_p5)
}
 0x131   :  { %s7838_s19 = sld [smem:[#allocation63_spill]] }
 0x132   :  { %127 = dma.hbm_to_vmem [thread:$0]  %s7837_s30, 768, %s122_s15, [#allocation8], %s6884_s21, %s6884_s21, %s6885_s1  }
 0x137   :  { %s6524_s6 = scalar_lea.hbm %s7838_s19, 2048 }
 0x138   :  { %p6525_p6 = scmp.ne.s32.totalorder %s7838_s19, %s6524_s6  ;;  %p6528_p7 = scmp.lt.u32.totalorder %s6524_s6, %s7838_s19 }
 0x13a   :  { %p6530_p8 = pnand %p6528_p7, %p6525_p6 }
 0x13c   :  { %6533 = shalt.err (!%p6530_p8)
}
 0x13d   :  { %s6534_s29 = scalar_lea.vmem %s7239_s18, 2048  ;;  %p6539_p10 = scmp.lt.s32.totalorder %s7239_s18, %s7239_s18 }
 0x13e   :  { %p6535_p9 = scmp.ne.s32.totalorder %s7239_s18, %s6534_s29  ;;  %p6540_p11 = scmp.lt.s32.totalorder %s6534_s29, %s6534_s29 }
 0x140   :  { %p6541_p12 = por %p6540_p11, %p6539_p10 }
 0x142   :  { %p6542_p13 = pnand %p6541_p12, %p6535_p9 }
 0x144   :  { %6545 = shalt.err (!%p6542_p13)
}
 0x145   :  { %s7839_s23 = sld [smem:[#allocation64_spill]]  ;;  %s6898_s20 = smov [#allocation14]  }
 0x146   :  { %149 = dma.hbm_to_vmem [thread:$0]  %s7838_s19, 2048, %s7239_s18, [#allocation10], %s6884_s21, %s6884_s21, %s6885_s1  }
 0x147   :  { %s165_s28 = sshll.u32 %s6898_s20, 4  ;;  %s6899_s27 = smov [#allocation17]   ;;  %s166_s28 = int_to_ptr.vmem [resolvable:$true] %s165_s28 }
 0x148   :  { %s192_s7 = sshll.u32 %s6899_s27, 4  ;;  %s193_s7 = int_to_ptr.vmem [resolvable:$true] %s192_s7 }
 0x14b   :  { %s6546_s4 = scalar_lea.hbm %s7839_s23, 1024 }
 0x14c   :  { %p6547_p0 = scmp.ne.s32.totalorder %s7839_s23, %s6546_s4  ;;  %p6550_p1 = scmp.lt.u32.totalorder %s6546_s4, %s7839_s23 }
 0x14e   :  { %p6552_p2 = pnand %p6550_p1, %p6547_p0 }
 0x150   :  { %6555 = shalt.err (!%p6552_p2)
}
 0x151   :  { %s6556_s3 = scalar_lea.vmem %s166_s28, 1024  ;;  %p6561_p4 = scmp.lt.s32.totalorder %s166_s28, %s166_s28 }
 0x152   :  { %p6557_p3 = scmp.ne.s32.totalorder %s166_s28, %s6556_s3  ;;  %p6562_p5 = scmp.lt.s32.totalorder %s6556_s3, %s6556_s3 }
 0x154   :  { %p6563_p6 = por %p6562_p5, %p6561_p4 }
 0x156   :  { %p6564_p7 = pnand %p6563_p6, %p6557_p3 }
 0x158   :  { %6567 = shalt.err (!%p6564_p7)
}
 0x159   :  { %s7840_s0 = sld [smem:[#allocation65_spill]] }
 0x15a   :  { %171 = dma.hbm_to_vmem [thread:$0]  %s7839_s23, 1024, %s166_s28, [#allocation13], %s6884_s21, %s6884_s21, %s6885_s1  }
 0x15f   :  { %s6568_s2 = scalar_lea.hbm %s7840_s0, 16 }
 0x160   :  { %p6569_p8 = scmp.ne.s32.totalorder %s7840_s0, %s6568_s2  ;;  %p6572_p9 = scmp.lt.u32.totalorder %s6568_s2, %s7840_s0 }
 0x162   :  { %p6574_p10 = pnand %p6572_p9, %p6569_p8 }
 0x164   :  { %6577 = shalt.err (!%p6574_p10)
}
 0x165   :  { %s6578_s9 = scalar_lea.vmem %s193_s7, 16  ;;  %s6582_s5 = scalar_lea.vmem %s193_s7, 32 }
 0x166   :  { %p6579_p11 = scmp.ne.s32.totalorder %s193_s7, %s6578_s9  ;;  %p6583_p12 = scmp.lt.s32.totalorder %s193_s7, %s193_s7 }
 0x167   :  { %p6584_p13 = scmp.lt.s32.totalorder %s6582_s5, %s6578_s9 }
 0x169   :  { %p6585_p0 = por %p6584_p13, %p6583_p12 }
 0x16b   :  { %p6586_p1 = pnand %p6585_p0, %p6579_p11 }
 0x16d   :  { %6589 = shalt.err (!%p6586_p1)
}
 0x16e   :  { %s7841_s17 = sld [smem:[#allocation66_spill]]  ;;  %s6900_s25 = smov [#allocation20]  }
 0x16f   :  { %195 = dma.hbm_to_vmem [thread:$0]  %s7840_s0, 16, %s193_s7, [#allocation16]  }
 0x170   :  { %s214_s8 = sshll.u32 %s6900_s25, 4  ;;  %s6901_s14 = smov [#allocation23]   ;;  %s215_s8 = int_to_ptr.vmem [resolvable:$true] %s214_s8 }
 0x171   :  { %s236_s26 = sshll.u32 %s6901_s14, 4  ;;  %s237_s26 = int_to_ptr.vmem [resolvable:$true] %s236_s26 }
 0x174   :  { %s6590_s12 = scalar_lea.hbm %s7841_s17, 16 }
 0x175   :  { %p6591_p2 = scmp.ne.s32.totalorder %s7841_s17, %s6590_s12  ;;  %p6594_p3 = scmp.lt.u32.totalorder %s6590_s12, %s7841_s17 }
 0x177   :  { %p6596_p4 = pnand %p6594_p3, %p6591_p2 }
 0x179   :  { %6599 = shalt.err (!%p6596_p4)
}
 0x17a   :  { %s6600_s24 = scalar_lea.vmem %s215_s8, 16  ;;  %s6604_s30 = scalar_lea.vmem %s215_s8, 32 }
 0x17b   :  { %p6601_p5 = scmp.ne.s32.totalorder %s215_s8, %s6600_s24  ;;  %p6605_p6 = scmp.lt.s32.totalorder %s215_s8, %s215_s8 }
 0x17c   :  { %p6606_p7 = scmp.lt.s32.totalorder %s6604_s30, %s6600_s24 }
 0x17e   :  { %p6607_p8 = por %p6606_p7, %p6605_p6 }
 0x180   :  { %p6608_p9 = pnand %p6607_p8, %p6601_p5 }
 0x182   :  { %6611 = shalt.err (!%p6608_p9)
}
 0x183   :  { %s7842_s10 = sld [smem:[#allocation67_spill]] }
 0x184   :  { %217 = dma.hbm_to_vmem [thread:$0]  %s7841_s17, 16, %s215_s8, [#allocation19]  }
 0x189   :  { %s6612_s15 = scalar_lea.hbm %s7842_s10, 16 }
 0x18a   :  { %p6613_p10 = scmp.ne.s32.totalorder %s7842_s10, %s6612_s15  ;;  %p6616_p11 = scmp.lt.u32.totalorder %s6612_s15, %s7842_s10 }
 0x18c   :  { %p6618_p12 = pnand %p6616_p11, %p6613_p10 }
 0x18e   :  { %6621 = shalt.err (!%p6618_p12)
}
 0x18f   :  { %s6622_s16 = scalar_lea.vmem %s237_s26, 16  ;;  %s6626_s18 = scalar_lea.vmem %s237_s26, 32 }
 0x190   :  { %p6623_p13 = scmp.ne.s32.totalorder %s237_s26, %s6622_s16  ;;  %p6627_p0 = scmp.lt.s32.totalorder %s237_s26, %s237_s26 }
 0x191   :  { %p6628_p1 = scmp.lt.s32.totalorder %s6626_s18, %s6622_s16 }
 0x193   :  { %p6629_p2 = por %p6628_p1, %p6627_p0 }
 0x195   :  { %p6630_p3 = pnand %p6629_p2, %p6623_p13 }
 0x197   :  { %6633 = shalt.err (!%p6630_p3)
}
 0x198   :  { %s7843_s22 = sld [smem:[#allocation68_spill]]  ;;  %s6902_s13 = smov [#allocation26]  }
 0x199   :  { %239 = dma.hbm_to_vmem [thread:$0]  %s7842_s10, 16, %s237_s26, [#allocation22]  }
 0x19a   :  { %s259_s19 = sshll.u32 %s6902_s13, 4  ;;  %s6903_s6 = smov [#allocation29]   ;;  %s260_s19 = int_to_ptr.vmem [resolvable:$true] %s259_s19 }
 0x19b   :  { %s281_s29 = sshll.u32 %s6903_s6, 4  ;;  %s7279_s29 = int_to_ptr.vmem [resolvable:$true] %s281_s29 }
 0x19e   :  { %s6634_s23 = scalar_lea.hbm %s7843_s22, 768 }
 0x19f   :  { %p6635_p4 = scmp.ne.s32.totalorder %s7843_s22, %s6634_s23  ;;  %p6638_p5 = scmp.lt.u32.totalorder %s6634_s23, %s7843_s22 }
 0x1a1   :  { %p6640_p6 = pnand %p6638_p5, %p6635_p4 }
 0x1a3   :  { %6643 = shalt.err (!%p6640_p6)
}
 0x1a4   :  { %s6644_s20 = scalar_lea.vmem %s260_s19, 768  ;;  %p6649_p8 = scmp.lt.s32.totalorder %s260_s19, %s260_s19 }
 0x1a5   :  { %p6645_p7 = scmp.ne.s32.totalorder %s260_s19, %s6644_s20  ;;  %p6650_p9 = scmp.lt.s32.totalorder %s6644_s20, %s6644_s20 }
 0x1a7   :  { %p6651_p10 = por %p6650_p9, %p6649_p8 }
 0x1a9   :  { %p6652_p11 = pnand %p6651_p10, %p6645_p7 }
 0x1ab   :  { %6655 = shalt.err (!%p6652_p11)
}
 0x1ac   :  { %s7844_s28 = sld [smem:[#allocation69_spill]] }
 0x1ad   :  { %265 = dma.hbm_to_vmem [thread:$0]  %s7843_s22, 768, %s260_s19, [#allocation25], %s6884_s21, %s6884_s21, %s6885_s1  }
 0x1b2   :  { %s6656_s27 = scalar_lea.hbm %s7844_s28, 8192 }
 0x1b3   :  { %p6657_p12 = scmp.ne.s32.totalorder %s7844_s28, %s6656_s27  ;;  %p6660_p13 = scmp.lt.u32.totalorder %s6656_s27, %s7844_s28 }
 0x1b5   :  { %p6662_p0 = pnand %p6660_p13, %p6657_p12 }
 0x1b7   :  { %6665 = shalt.err (!%p6662_p0)
}
 0x1b8   :  { %s6666_s7 = scalar_lea.vmem %s7279_s29, 8192  ;;  %p6671_p2 = scmp.lt.s32.totalorder %s7279_s29, %s7279_s29 }
 0x1b9   :  { %p6667_p1 = scmp.ne.s32.totalorder %s7279_s29, %s6666_s7  ;;  %p6672_p3 = scmp.lt.s32.totalorder %s6666_s7, %s6666_s7 }
 0x1bb   :  { %p6673_p4 = por %p6672_p3, %p6671_p2 }
 0x1bd   :  { %p6674_p5 = pnand %p6673_p4, %p6667_p1 }
 0x1bf   :  { %6677 = shalt.err (!%p6674_p5)
}
 0x1c0   :  { %s6904_s4 = smov 256   ;;  %s7845_s3 = sld [smem:[#allocation70_spill]] }
 0x1c1   :  { %s6905_s0 = smov 16   ;;  %s6906_s2 = smov [#allocation32]  }
 0x1c2   :  { %287 = dma.hbm_to_vmem [thread:$0]  %s7844_s28, 8192, %s7279_s29, [#allocation28], %s6904_s4, %s6904_s4, %s6905_s0  }
 0x1c3   :  { %s305_s9 = sshll.u32 %s6906_s2, 4  ;;  %s6907_s5 = smov [#allocation35]   ;;  %s306_s9 = int_to_ptr.vmem [resolvable:$true] %s305_s9 }
 0x1c4   :  { %s332_s17 = sshll.u32 %s6907_s5, 4  ;;  %s333_s17 = int_to_ptr.vmem [resolvable:$true] %s332_s17 }
 0x1c6   :  { %s6678_s25 = scalar_lea.hbm %s7845_s3, 1024 }
 0x1c7   :  { %p6679_p6 = scmp.ne.s32.totalorder %s7845_s3, %s6678_s25  ;;  %p6682_p7 = scmp.lt.u32.totalorder %s6678_s25, %s7845_s3 }
 0x1c9   :  { %p6684_p8 = pnand %p6682_p7, %p6679_p6 }
 0x1cb   :  { %6687 = shalt.err (!%p6684_p8)
}
 0x1cc   :  { %s6688_s8 = scalar_lea.vmem %s306_s9, 1024  ;;  %p6693_p10 = scmp.lt.s32.totalorder %s306_s9, %s306_s9 }
 0x1cd   :  { %p6689_p9 = scmp.ne.s32.totalorder %s306_s9, %s6688_s8  ;;  %p6694_p11 = scmp.lt.s32.totalorder %s6688_s8, %s6688_s8 }
 0x1cf   :  { %p6695_p12 = por %p6694_p11, %p6693_p10 }
 0x1d1   :  { %p6696_p13 = pnand %p6695_p12, %p6689_p9 }
 0x1d3   :  { %6699 = shalt.err (!%p6696_p13)
}
 0x1d4   :  { %s7846_s14 = sld [smem:[#allocation71_spill]] }
 0x1d5   :  { %311 = dma.hbm_to_vmem [thread:$0]  %s7845_s3, 1024, %s306_s9, [#allocation31], %s6884_s21, %s6884_s21, %s6885_s1  }
 0x1da   :  { %s6700_s26 = scalar_lea.hbm %s7846_s14, 16 }
 0x1db   :  { %p6701_p0 = scmp.ne.s32.totalorder %s7846_s14, %s6700_s26  ;;  %p6704_p1 = scmp.lt.u32.totalorder %s6700_s26, %s7846_s14 }
 0x1dd   :  { %p6706_p2 = pnand %p6704_p1, %p6701_p0 }
 0x1df   :  { %6709 = shalt.err (!%p6706_p2)
}
 0x1e0   :  { %s6710_s12 = scalar_lea.vmem %s333_s17, 16  ;;  %s6714_s24 = scalar_lea.vmem %s333_s17, 32 }
 0x1e1   :  { %p6711_p3 = scmp.ne.s32.totalorder %s333_s17, %s6710_s12  ;;  %p6715_p4 = scmp.lt.s32.totalorder %s333_s17, %s333_s17 }
 0x1e2   :  { %p6716_p5 = scmp.lt.s32.totalorder %s6714_s24, %s6710_s12 }
 0x1e4   :  { %p6717_p6 = por %p6716_p5, %p6715_p4 }
 0x1e6   :  { %p6718_p7 = pnand %p6717_p6, %p6711_p3 }
 0x1e8   :  { %6721 = shalt.err (!%p6718_p7)
}
 0x1e9   :  { %s7847_s30 = sld [smem:[#allocation72_spill]]  ;;  %s6908_s10 = smov [#allocation38]  }
 0x1ea   :  { %335 = dma.hbm_to_vmem [thread:$0]  %s7846_s14, 16, %s333_s17, [#allocation34]  }
 0x1eb   :  { %s353_s15 = sshll.u32 %s6908_s10, 4  ;;  %s6909_s16 = smov [#allocation41]   ;;  %s354_s15 = int_to_ptr.vmem [resolvable:$true] %s353_s15 }
 0x1ec   :  { %s377_s18 = sshll.u32 %s6909_s16, 4  ;;  %s378_s18 = int_to_ptr.vmem [resolvable:$true] %s377_s18 }
 0x1ef   :  { %s6722_s22 = scalar_lea.hbm %s7847_s30, 64 }
 0x1f0   :  { %p6723_p8 = scmp.ne.s32.totalorder %s7847_s30, %s6722_s22  ;;  %p6726_p9 = scmp.lt.u32.totalorder %s6722_s22, %s7847_s30 }
 0x1f2   :  { %p6728_p10 = pnand %p6726_p9, %p6723_p8 }
 0x1f4   :  { %6731 = shalt.err (!%p6728_p10)
}
 0x1f5   :  { %s6732_s13 = scalar_lea.vmem %s354_s15, 64  ;;  %p6737_p12 = scmp.lt.s32.totalorder %s354_s15, %s354_s15 }
 0x1f6   :  { %p6733_p11 = scmp.ne.s32.totalorder %s354_s15, %s6732_s13  ;;  %p6738_p13 = scmp.lt.s32.totalorder %s6732_s13, %s6732_s13 }
 0x1f8   :  { %p6739_p0 = por %p6738_p13, %p6737_p12 }
 0x1fa   :  { %p6740_p1 = pnand %p6739_p0, %p6733_p11 }
 0x1fc   :  { %6743 = shalt.err (!%p6740_p1)
}
 0x1fd   :  { %s6910_s19 = smov 1   ;;  %s7848_s6 = sld [smem:[#allocation73_spill]] }
 0x1fe   :  { %359 = dma.hbm_to_vmem [thread:$0]  %s7847_s30, 64, %s354_s15, [#allocation37], %s6905_s0, %s6905_s0, %s6910_s19  }
 0x203   :  { %s6744_s29 = scalar_lea.hbm %s7848_s6, 64 }
 0x204   :  { %p6745_p2 = scmp.ne.s32.totalorder %s7848_s6, %s6744_s29  ;;  %p6748_p3 = scmp.lt.u32.totalorder %s6744_s29, %s7848_s6 }
 0x206   :  { %p6750_p4 = pnand %p6748_p3, %p6745_p2 }
 0x208   :  { %6753 = shalt.err (!%p6750_p4)
}
 0x209   :  { %s6754_s23 = scalar_lea.vmem %s378_s18, 64  ;;  %p6759_p6 = scmp.lt.s32.totalorder %s378_s18, %s378_s18 }
 0x20a   :  { %p6755_p5 = scmp.ne.s32.totalorder %s378_s18, %s6754_s23  ;;  %p6760_p7 = scmp.lt.s32.totalorder %s6754_s23, %s6754_s23 }
 0x20c   :  { %p6761_p8 = por %p6760_p7, %p6759_p6 }
 0x20e   :  { %p6762_p9 = pnand %p6761_p8, %p6755_p5 }
 0x210   :  { %6765 = shalt.err (!%p6762_p9)
}
 0x211   :  { %s7849_s20 = sld [smem:[#allocation79_spill]]  ;;  %s6911_s28 = smov [#allocation44]  }
 0x212   :  { %383 = dma.hbm_to_vmem [thread:$0]  %s7848_s6, 64, %s378_s18, [#allocation40], %s6905_s0, %s6905_s0, %s6910_s19  }
 0x213   :  { %s411_s27 = sshll.u32 %s6911_s28, 4  ;;  %s6912_s7 = smov [#allocation45]   ;;  %s412_s27 = int_to_ptr.vmem [resolvable:$true] %s411_s27 }
 0x214   :  { %s433_s4 = sshll.u32 %s6912_s7, 4  ;;  %s434_s4 = int_to_ptr.vmem [resolvable:$true] %s433_s4 }
 0x217   :  { %s6766_s3 = scalar_lea.hbm %s7849_s20, 1024 }
 0x218   :  { %p6767_p10 = scmp.ne.s32.totalorder %s7849_s20, %s6766_s3  ;;  %p6770_p11 = scmp.lt.u32.totalorder %s6766_s3, %s7849_s20 }
 0x21a   :  { %p6772_p12 = pnand %p6770_p11, %p6767_p10 }
 0x21c   :  { %6775 = shalt.err (!%p6772_p12)
}
 0x21d   :  { %s6776_s2 = scalar_lea.vmem %s412_s27, 1024  ;;  %p6781_p0 = scmp.lt.s32.totalorder %s412_s27, %s412_s27 }
 0x21e   :  { %p6777_p13 = scmp.ne.s32.totalorder %s412_s27, %s6776_s2  ;;  %p6782_p1 = scmp.lt.s32.totalorder %s6776_s2, %s6776_s2 }
 0x220   :  { %p6783_p2 = por %p6782_p1, %p6781_p0 }
 0x222   :  { %p6784_p3 = pnand %p6783_p2, %p6777_p13 }
 0x224   :  { %6787 = shalt.err (!%p6784_p3)
}
 0x225   :  { %s7850_s0 = sld [smem:[#allocation84_spill]] }
 0x226   :  { %417 = dma.hbm_to_vmem [thread:$0]  %s7849_s20, 1024, %s412_s27, [#allocation43], %s6884_s21, %s6884_s21, %s6885_s1  }
 0x22b   :  { %s6788_s9 = scalar_lea.hbm %s7850_s0, 512 }
 0x22c   :  { %p6789_p4 = scmp.ne.s32.totalorder %s7850_s0, %s6788_s9  ;;  %p6792_p5 = scmp.lt.u32.totalorder %s6788_s9, %s7850_s0 }
 0x22e   :  { %p6794_p6 = pnand %p6792_p5, %p6789_p4 }
 0x230   :  { %6797 = shalt.err (!%p6794_p6)
}
 0x231   :  { %s6798_s5 = scalar_lea.vmem %s434_s4, 512  ;;  %p6803_p8 = scmp.lt.s32.totalorder %s434_s4, %s434_s4 }
 0x232   :  { %p6799_p7 = scmp.ne.s32.totalorder %s434_s4, %s6798_s5  ;;  %p6804_p9 = scmp.lt.s32.totalorder %s6798_s5, %s6798_s5 }
 0x234   :  { %p6805_p10 = por %p6804_p9, %p6803_p8 }
 0x236   :  { %p6806_p11 = pnand %p6805_p10, %p6799_p7 }
 0x238   :  { %6809 = shalt.err (!%p6806_p11)
}
 0x239   :  { %439 = dma.hbm_to_vmem [thread:$0]  %s7850_s0, 512, %s434_s4, [#allocation46], %s6884_s21, %s6884_s21, %s6885_s1  }
 0x23a   :  { %6810 = dma.done.wait [#allocation8], 768  }
 0x23b   :  { %6811 = vsyncadd [#allocation8], 4294966528 }
 0x23c   :  { %6812 = dma.done.wait [#allocation10], 2064  }
 0x23d   :  { %6813 = vsyncadd [#allocation10], 4294965232 }
 0x23e   :  { %6814 = dma.done.wait [#allocation13], 1040  }
 0x23f   :  { %6815 = vsyncadd [#allocation13], 4294966256 }
 0x240   :  { %6816 = dma.done.wait [#allocation16], 2320  }
 0x241   :  { %6817 = vsyncadd [#allocation16], 4294964976 }
 0x242   :  { %6818 = dma.done.wait [#allocation19], 3088  }
 0x243   :  { %6819 = vsyncadd [#allocation19], 4294964208 }
 0x244   :  { %6820 = dma.done.wait [#allocation22], 3088  }
 0x245   :  { %6821 = vsyncadd [#allocation22], 4294964208 }
 0x246   :  { %6822 = dma.done.wait [#allocation25], 1280  }
 0x247   :  { %6823 = vsyncadd [#allocation25], 4294966016 }
 0x248   :  { %6824 = dma.done.wait [#allocation28], 8208  }
 0x249   :  { %6825 = vsyncadd [#allocation28], 4294959088 }
 0x24a   :  { %6826 = dma.done.wait [#allocation31], 1152  }
 0x24b   :  { %6827 = vsyncadd [#allocation31], 4294966144 }
 0x24c   :  { %6828 = dma.done.wait [#allocation34], 784  }
 0x24d   :  { %6829 = vsyncadd [#allocation34], 4294966512 }
 0x24e   :  { %6830 = dma.done.wait [#allocation37], 4160  }
 0x24f   :  { %6831 = vsyncadd [#allocation37], 4294963136 }
 0x250   :  { %6832 = dma.done.wait [#allocation40], 4160  }
 0x251   :  { %6833 = vsyncadd [#allocation40], 4294963136 }
 0x252   :  { %6834 = dma.done.wait [#allocation43], 9216  }
 0x253   :  { %6835 = vsyncadd [#allocation43], 4294958080 }
 0x254   :  { %6836 = dma.done.wait [#allocation46], 512  }
 0x255   :  { %6837 = vsyncadd [#allocation46], 4294966784  ;;  %v6913_v5 = vmov 0.0|0.0   ;;  %vm6914_vm0 = vmmov 0   ;;  %v6915_v6 = vmov 0.0   ;;  %v523_v7 = vld [vmem:[#allocation7] sm:$0xff] }
 0x256   :  { %5586 = vmatprep.subr.bf16.mxu0 %v6913_v5  ;;  %5596 = vmatprep.subr.bf16.mxu1 %v6913_v5  ;;  %v524_v8 = vld [vmem:[#allocation7 + $0x8] sm:$0xff]  ;;  %v525_v9 = vld [vmem:[#allocation7 + $0x10] sm:$0xff]  ;;  %v526_v11 = vld [vmem:[#allocation7 + $0x18] sm:$0xff]  ;;  %vm540_vm1 = vcmask 1041408   ;;  %s7851_s21 = sld [smem:[#allocation61_spill]]  ;;  %vm6916_vm2 = vmmov 1  }
 0x257   :  { %4882 = vmatprep.mubr.msk.f32.mxu0 %vm6914_vm0, %v6915_v6  ;;  %4917 = vmatprep.mubr.msk.f32.mxu1 %vm6914_vm0, %v6915_v6  ;;  %v5587_v10 = vpack.c.bf16 %v524_v8, %v523_v7  ;;  %v615_v12 = vld [vmem:[#allocation11] sm:$0xff]  ;;  %v616_v13 = vld [vmem:[#allocation11 + $0x8] sm:$0xff]  ;;  %v5590_v14 = vpack.c.bf16 %v526_v11, %v525_v9  ;;  %v617_v16 = vld [vmem:[#allocation11 + $0x10] sm:$0xff]  ;;  %vm536_vm4 = vcmask 343040   ;;  %vm724_vm5 = vcmask 523264   ;;  %s6917_s1 = smov 64  }
 0x258   :  { %v5597_v15 = vpack.c.bf16 %v616_v13, %v615_v12  ;;  %v618_v17 = vld [vmem:[#allocation11 + $0x18] sm:$0xff]  ;;  %v527_v18 = vld [vmem:[#allocation7 + $0x20] sm:$0xff]  ;;  %v528_v19 = vld [vmem:[#allocation7 + $0x28] sm:$0x3]  ;;  %vm1767_vm6 = vcmask 261120   ;;  %s7854_s17 = sld [smem:[#allocation75_spill]] }
 0x259   :  { %5588 = vmatpush3.bf16.msra.mxu0 %v5587_v10  ;;  %v5600_v20 = vpack.c.bf16 %v618_v17, %v617_v16  ;;  %v619_v21 = vld [vmem:[#allocation11 + $0x20] sm:$0xff]  ;;  %v620_v22 = vld [vmem:[#allocation11 + $0x28] sm:$0xff]  ;;  %v5593_v23 = vpack.c.bf16 %v528_v19, %v527_v18  ;;  %vm7344_vm3 = vmpackc.low %vm540_vm1, %vm6916_vm2  ;;  %s7855_s25 = sld [smem:[#allocation76_spill]]  ;;  %s7856_s8 = sld [smem:[#allocation74_spill]]  ;;  %vm4345_vm7 = vcmask 7168  }
 0x25a   :  { %5589 = vmatprep.subr.bf16.mxu0 %v6913_v5  ;;  %5598 = vmatpush3.bf16.msra.mxu1 %v5597_v15  ;;  %v5603_v25 = vpack.c.bf16 %v620_v22, %v619_v21  ;;  %v621_v26 = vld [vmem:[#allocation11 + $0x30] sm:$0xff]  ;;  %v622_v27 = vld [vmem:[#allocation11 + $0x38] sm:$0xff]  ;;  %v623_v30 = vld [vmem:[#allocation11 + $0x40] sm:$0xff]  ;;  %s7857_s14 = sld [smem:[#allocation77_spill]]  ;;  %s7858_s26 = sld [smem:[#allocation78_spill]] }
 0x25b   :  { %5599 = vmatprep.subr.bf16.mxu1 %v6913_v5  ;;  %v5606_v29 = vpack.c.bf16 %v622_v27, %v621_v26  ;;  %v624_v31 = vld [vmem:[#allocation11 + $0x48] sm:$0xff]  ;;  %v625_v33 = vld [vmem:[#allocation11 + $0x50] sm:$0xff]  ;;  %v626_v34 = vld [vmem:[#allocation11 + $0x58] sm:$0xff]  ;;  %s7859_s12 = sld [smem:[#allocation85_spill]]  ;;  %s6918_s24 = smov 127  }
 0x25c   :  { %v7352_v28 = vld [vmem:[%s7851_s21] sm:$0xff]  ;;  %v5609_v32 = vpack.c.bf16 %v624_v31, %v623_v30  ;;  %v5612_v35 = vpack.c.bf16 %v626_v34, %v625_v33  ;;  %v627_v36 = vld [vmem:[#allocation11 + $0x60] sm:$0xff]  ;;  %v630_v40 = vld [vmem:[#allocation11 + $0x78] sm:$0xff]  ;;  %s6919_s30 = smov 126   ;;  %s6920_s10 = smov 125  }
 0x25d   :  { %5591 = vmatpush3.bf16.msra.mxu0 %v5590_v14  ;;  %v628_v37 = vld [vmem:[#allocation11 + $0x68] sm:$0xff]  ;;  %v629_v39 = vld [vmem:[#allocation11 + $0x70] sm:$0xff]  ;;  %v712_v46 = vld [vmem:[#allocation14 + $0x18] sm:$0xff]  ;;  %s7860_s15 = sld [smem:[#allocation80_spill]]  ;;  %s7861_s16 = sld [smem:[#allocation82_spill]] }
 0x25e   :  { %5592 = vmatprep.subr.bf16.mxu0 %v6913_v5  ;;  %5601 = vmatpush3.bf16.msra.mxu1 %v5600_v20  ;;  %v5615_v38 = vpack.c.bf16 %v628_v37, %v627_v36  ;;  %v5618_v41 = vpack.c.bf16 %v630_v40, %v629_v39  ;;  %v709_v42 = vld [vmem:[#allocation14] sm:$0xff]  ;;  %v710_v43 = vld [vmem:[#allocation14 + $0x8] sm:$0xff]  ;;  %v711_v44 = vld [vmem:[#allocation14 + $0x10] sm:$0xff]  ;;  %s7862_s18 = sld [smem:[#allocation81_spill]]  ;;  %s7863_s22 = sld [smem:[#allocation83_spill]] }
 0x25f   :  { %5602 = vmatprep.subr.bf16.mxu1 %v6913_v5  ;;  %v5621_v45 = vpack.c.bf16 %v710_v43, %v709_v42  ;;  %v5624_v47 = vpack.c.bf16 %v712_v46, %v711_v44  ;;  %v713_v48 = vld [vmem:[#allocation14 + $0x20] sm:$0xff]  ;;  %v714_v49 = vld [vmem:[#allocation14 + $0x28] sm:$0xff]  ;;  %v4407_v51 = vld [vmem:[#allocation9] ss:$0 sm:$0xff]  ;;  %s6921_s13 = smov 124  }
 0x260   :  { %v5627_v50 = vpack.c.bf16 %v714_v49, %v713_v48  ;;  %v715_v56 = vld [vmem:[#allocation14 + $0x30] sm:$0xff]  ;;  %v716_v57 = vld [vmem:[#allocation14 + $0x38] sm:$0xff]  ;;  %v814_v62 = vld [vmem:[#allocation15 + $0x40] sm:$0xff] }
 0x261   :  { %5595 = vmatpush3.bf16.msk.msra.mxu0 %vm7344_vm3, %v5593_v23  ;;  %v5630_v58 = vpack.c.bf16 %v716_v57, %v715_v56  ;;  %v812_v59 = vld [vmem:[#allocation15 + $0x30] sm:$0xff]  ;;  %v813_v60 = vld [vmem:[#allocation15 + $0x38] sm:$0xff]  ;;  %v815_v63 = vld [vmem:[#allocation15 + $0x48] sm:$0xff] }
 0x262   :  { %5620 = vmatprep.subr.bf16.mxu0 %v6913_v5  ;;  %5604 = vmatpush3.bf16.msra.mxu1 %v5603_v25  ;;  %v5643_v61 = vpack.c.bf16 %v813_v60, %v812_v59  ;;  %v5646_v0 = vpack.c.bf16 %v815_v63, %v814_v62  ;;  %v816_v1 = vld [vmem:[#allocation15 + $0x50] sm:$0xff]  ;;  %v817_v2 = vld [vmem:[#allocation15 + $0x58] sm:$0x3]  ;;  %v4410_v4 = vld [vmem:[#allocation12] ss:$0 sm:$0xff] }
 0x263   :  { %5605 = vmatprep.subr.bf16.mxu1 %v6913_v5  ;;  %v5649_v3 = vpack.c.bf16 %v817_v2, %v816_v1  ;;  %v819_v7 = vld [vmem:[#allocation15 + $0x60] sm:$0xff]  ;;  %v820_v8 = vld [vmem:[#allocation15 + $0x68] sm:$0xff]  ;;  %v821_v14 = vld [vmem:[#allocation15 + $0x70] sm:$0xff] }
 0x264   :  { %4883 = vmatmul.mubr.msk.f32.vlgmr.msra.gmra.mrb[0].mxu0 %vm536_vm4, %v7352_v28  ;;  %v5633_v12 = vpack.c.bf16 %v820_v8, %v819_v7  ;;  %v822_v15 = vld [vmem:[#allocation15 + $0x78] sm:$0xff]  ;;  %v823_v17 = vld [vmem:[#allocation15 + $0x80] sm:$0xff]  ;;  %v824_v18 = vld [vmem:[#allocation15 + $0x88] sm:$0x3] }
 0x265   :  { %4936 = vmatprep.mubr.msk.f32.mxu0 %vm6914_vm0, %v6915_v6  ;;  %5622 = vmatpush3.bf16.msra.mxu0 %v5621_v45  ;;  %v5636_v16 = vpack.c.bf16 %v822_v15, %v821_v14  ;;  %v5639_v19 = vpack.c.bf16 %v824_v18, %v823_v17  ;;  %v805_v20 = vld [vmem:[#allocation15] sm:$0xff]  ;;  %v806_v21 = vld [vmem:[#allocation15 + $0x8] sm:$0xff]  ;;  %v807_v23 = vld [vmem:[#allocation15 + $0x10] sm:$0xff] }
 0x266   :  { %5607 = vmatpush3.bf16.msra.mxu1 %v5606_v29  ;;  %5623 = vmatprep.subr.bf16.mxu0 %v6913_v5  ;;  %v5653_v22 = vpack.c.bf16 %v806_v21, %v805_v20  ;;  %v808_v25 = vld [vmem:[#allocation15 + $0x18] sm:$0xff]  ;;  %v809_v27 = vld [vmem:[#allocation15 + $0x20] sm:$0xff]  ;;  %v810_v29 = vld [vmem:[#allocation15 + $0x28] sm:$0x3] }
 0x267   :  { %5608 = vmatprep.subr.bf16.mxu1 %v6913_v5  ;;  %v5656_v26 = vpack.c.bf16 %v808_v25, %v807_v23  ;;  %v5659_v30 = vpack.c.bf16 %v810_v29, %v809_v27  ;;  %v1054_v31 = vld [vmem:[#allocation18] sm:$0xff]  ;;  %v1056_v37 = vld [vmem:[#allocation18 + $0x10] sm:$0xff]  ;;  %v1059_v44 = vld [vmem:[#allocation18 + $0x28] sm:$0xff] }
 0x268   :  { %v1152_v33 = vld [vmem:[#allocation18 + $0x40] sm:$0xff]  ;;  %v1154_v39 = vld [vmem:[#allocation18 + $0x50] sm:$0xff]  ;;  %v4414_v59 = vld [vmem:[#allocation17] ss:$0 sm:$0xff] }
 0x269   :  { %5625 = vmatpush3.bf16.msra.mxu0 %v5624_v47  ;;  %v1058_v43 = vld [vmem:[#allocation18 + $0x20] sm:$0xff]  ;;  %v1157_v47 = vld [vmem:[#allocation18 + $0x68] sm:$0xff]  ;;  %v1060_v49 = vld [vmem:[#allocation18 + $0x30] sm:$0xff] }
 0x26a   :  { %5610 = vmatpush3.bf16.msra.mxu1 %v5609_v32  ;;  %5626 = vmatprep.subr.bf16.mxu0 %v6913_v5  ;;  %v1055_v32 = vld [vmem:[#allocation18 + $0x8] sm:$0xff]  ;;  %v1156_v45 = vld [vmem:[#allocation18 + $0x60] sm:$0xff]  ;;  %v5669_v46 = vpack.c.bf16 %v1059_v44, %v1058_v43  ;;  %v1244_v7 = vld [vmem:[#allocation18 + $0x98] sm:$0xff] }
 0x26b   :  { %5611 = vmatprep.subr.bf16.mxu1 %v6913_v5  ;;  %v5663_v34 = vpack.c.bf16 %v1055_v32, %v1054_v31  ;;  %v5681_v48 = vpack.c.bf16 %v1157_v47, %v1156_v45  ;;  %v1241_v60 = vld [vmem:[#allocation18 + $0x80] sm:$0xff]  ;;  %v1248_v14 = vld [vmem:[#allocation18 + $0xb8] sm:$0xff]  ;;  %v1353_v21 = vld [vmem:[#allocation21 + $0x8] sm:$0xff] }
 0x26c   :  { %v1352_v20 = vld [vmem:[#allocation21] sm:$0xff]  ;;  %v1483_v25 = vld [vmem:[#allocation21 + $0x48] sm:$0xff]  ;;  %v1354_v27 = vld [vmem:[#allocation21 + $0x10] sm:$0xff] }
 0x26d   :  { %5628 = vmatpush3.bf16.msra.mxu0 %v5627_v50  ;;  %v1061_v50 = vld [vmem:[#allocation18 + $0x38] sm:$0xff]  ;;  %v5699_v23 = vpack.c.bf16 %v1353_v21, %v1352_v20  ;;  %v4141_v24 = vld [vmem:[%s7861_s16 + $0x10] sm:$0xff] }
 0x26e   :  { %5613 = vmatpush3.bf16.msra.mxu1 %v5612_v35  ;;  %5629 = vmatprep.subr.bf16.mxu0 %v6913_v5  ;;  %v1153_v35 = vld [vmem:[#allocation18 + $0x48] sm:$0xff]  ;;  %v1355_v29 = vld [vmem:[#allocation21 + $0x18] sm:$0xff] }
 0x26f   :  { %5614 = vmatprep.subr.bf16.mxu1 %v6913_v5  ;;  %v5675_v36 = vpack.c.bf16 %v1153_v35, %v1152_v33  ;;  %v5702_v31 = vpack.c.bf16 %v1355_v29, %v1354_v27  ;;  %v1485_v32 = vld [vmem:[#allocation21 + $0x58] sm:$0xff]  ;;  %v1357_v35 = vld [vmem:[#allocation21 + $0x28] sm:$0xff] }
 0x270   :  { %v1489_v44 = vld [vmem:[#allocation21 + $0x78] sm:$0xff] }
 0x271   :  { %5631 = vmatpush3.bf16.msra.mxu0 %v5630_v58 }
 0x272   :  { %5616 = vmatpush3.bf16.msra.mxu1 %v5615_v38  ;;  %5632 = vmatprep.subr.bf16.mxu0 %v6913_v5  ;;  %v1057_v38 = vld [vmem:[#allocation18 + $0x18] sm:$0xff] }
 0x273   :  { %5617 = vmatprep.subr.bf16.mxu1 %v6913_v5  ;;  %v5666_v40 = vpack.c.bf16 %v1057_v38, %v1056_v37  ;;  %v1487_v38 = vld [vmem:[#allocation21 + $0x68] sm:$0xff] }
 0x276   :  { %5619 = vmatpush3.bf16.msra.mxu1 %v5618_v41  ;;  %v1155_v41 = vld [vmem:[#allocation18 + $0x58] sm:$0xff] }
 0x277   :  { %5642 = vmatprep.subr.bf16.mxu1 %v6913_v5  ;;  %v5678_v42 = vpack.c.bf16 %v1155_v41, %v1154_v39  ;;  %v1359_v41 = vld [vmem:[#allocation21 + $0x38] sm:$0xff] }
 0x337   :  { %v610_v52 = vpop.f32.mrb[0].mxu0 }
 0x338   :  { %v611_v53 = vadd.f32 %v4407_v51, %v610_v52  ;;  %v4884_v54 = vpop.f32.mrb[1].mxu0  ;;  %v1158_v51 = vld [vmem:[#allocation18 + $0x70] sm:$0xff]  ;;  %v5672_v52 = vpack.c.bf16 %v1061_v50, %v1060_v49 }
 0x33a   :  { %v614_v55 = vmax.f32 %v611_v53, 0.0  ;;  %v1159_v53 = vld [vmem:[#allocation18 + $0x78] sm:$0xff] }
 0x33b   :  { %v5684_v54 = vpack.c.bf16 %v1159_v53, %v1158_v51 }
 0x33c   :  { %4918 = vmatmul.mubr.f32.vlgmr.msra.gmra.mrb[0].mxu1 %v614_v55 }
 0x33d   :  { %4966 = vmatprep.mubr.msk.f32.mxu1 %vm6914_vm0, %v6915_v6  ;;  %5644 = vmatpush3.bf16.msra.mxu1 %v5643_v61  ;;  %v1242_v61 = vld [vmem:[#allocation18 + $0x88] sm:$0xff] }
 0x33e   :  { %5645 = vmatprep.subr.bf16.mxu1 %v6913_v5  ;;  %v5687_v2 = vpack.c.bf16 %v1242_v61, %v1241_v60  ;;  %v1591_v60 = vld [vmem:[#allocation21 + $0x80] sm:$0xff]  ;;  %v1592_v61 = vld [vmem:[#allocation21 + $0x88] sm:$0xff] }
 0x341   :  { %5647 = vmatpush3.bf16.msra.mxu1 %v5646_v0 }
 0x342   :  { %5648 = vmatprep.subr.bf16.mxu1 %v6913_v5 }
 0x345   :  { %5651 = vmatpush3.bf16.msk.msra.mxu1 %vm7344_vm3, %v5649_v3 }
 0x346   :  { %5662 = vmatprep.subr.bf16.mxu1 %v6913_v5 }
 0x348   :  { %4967 = vmatmul.mubr.msk.f32.vlgmr.msra.gmra.mrb[2].mxu1 %vm536_vm4, %v7352_v28 }
 0x349   :  { %5000 = vmatprep.mubr.msk.f32.mxu1 %vm6914_vm0, %v6915_v6  ;;  %5664 = vmatpush3.bf16.msra.mxu1 %v5663_v34  ;;  %v1356_v34 = vld [vmem:[#allocation21 + $0x20] sm:$0xff] }
 0x34a   :  { %5665 = vmatprep.subr.bf16.mxu1 %v6913_v5  ;;  %v5705_v37 = vpack.c.bf16 %v1357_v35, %v1356_v34  ;;  %v1756_v34 = vld [vmem:[#allocation24] sm:$0xff]  ;;  %v1757_v35 = vld [vmem:[#allocation24 + $0x8] sm:$0xff] }
 0x34d   :  { %5667 = vmatpush3.bf16.msra.mxu1 %v5666_v40  ;;  %v1358_v40 = vld [vmem:[#allocation21 + $0x30] sm:$0xff] }
 0x34e   :  { %5668 = vmatprep.subr.bf16.mxu1 %v6913_v5  ;;  %v5708_v43 = vpack.c.bf16 %v1359_v41, %v1358_v40  ;;  %v1934_v40 = vld [vmem:[#allocation29 + $0x8] sm:$0xff]  ;;  %v1936_v41 = vld [vmem:[#allocation29 + $0x18] sm:$0xff] }
 0x351   :  { %5670 = vmatpush3.bf16.msra.mxu1 %v5669_v46 }
 0x352   :  { %5671 = vmatprep.subr.bf16.mxu1 %v6913_v5 }
 0x355   :  { %5673 = vmatpush3.bf16.msra.mxu1 %v5672_v52 }
 0x356   :  { %5686 = vmatprep.subr.bf16.mxu1 %v6913_v5 }
 0x40f   :  { %v704_v9 = vpop.f32.mrb[0].mxu1 }
 0x410   :  { %v705_v10 = vadd.f32 %v4410_v4, %v704_v9  ;;  %v4919_v11 = vpop.f32.mrb[1].mxu1  ;;  %v1243_v4 = vld [vmem:[#allocation18 + $0x90] sm:$0xff] }
 0x411   :  { %v5690_v9 = vpack.c.bf16 %v1244_v7, %v1243_v4  ;;  %v1246_v11 = vld [vmem:[#allocation18 + $0xa8] sm:$0xff]  ;;  %v1593_v7 = vld [vmem:[#allocation21 + $0x90] sm:$0xff] }
 0x412   :  { %v708_v13 = vmax.f32 %v705_v10, 0.0  ;;  %v1245_v10 = vld [vmem:[#allocation18 + $0xa0] sm:$0xff] }
 0x414   :  { %4937 = vmatmul.mubr.msk.f32.vlgmr.msra.gmra.mrb[2].mxu0 %vm724_vm5, %v708_v13  ;;  %v1247_v13 = vld [vmem:[#allocation18 + $0xb0] sm:$0xff] }
 0x415   :  { %5634 = vmatpush3.bf16.msra.mxu0 %v5633_v12  ;;  %4951 = vmatprep.mubr.msk.f32.mxu0 %vm6914_vm0, %v6915_v6  ;;  %v5693_v12 = vpack.c.bf16 %v1246_v11, %v1245_v10  ;;  %v5696_v18 = vpack.c.bf16 %v1248_v14, %v1247_v13 }
 0x416   :  { %5635 = vmatprep.subr.bf16.mxu0 %v6913_v5 }
 0x419   :  { %5637 = vmatpush3.bf16.msra.mxu0 %v5636_v16 }
 0x41a   :  { %5638 = vmatprep.subr.bf16.mxu0 %v6913_v5 }
 0x41b   :  { %v974_v55 = vpop.f32.mrb[2].mxu1 }
 0x41c   :  { %v4968_v56 = vpop.f32.mrb[3].mxu1  ;;  %v975_v1 = vadd.f32 %v4414_v59, %v974_v55 }
 0x41d   :  { %5641 = vmatpush3.bf16.msk.msra.mxu0 %vm7344_vm3, %v5639_v19 }
 0x41e   :  { %5652 = vmatprep.subr.bf16.mxu0 %v6913_v5  ;;  %v978_v8 = vmax.f32 %v975_v1, 0.0 }
 0x420   :  { %4952 = vmatmul.mubr.msk.f32.vlgmr.msra.gmra.mrb[4].mxu0 %vm536_vm4, %v7352_v28 }
 0x421   :  { %5654 = vmatpush3.bf16.msra.mxu0 %v5653_v22  ;;  %4981 = vmatprep.mubr.msk.f32.mxu0 %vm6914_vm0, %v6915_v6  ;;  %v1482_v22 = vld [vmem:[#allocation21 + $0x40] sm:$0xff] }
 0x422   :  { %5655 = vmatprep.subr.bf16.mxu0 %v6913_v5 }
 0x425   :  { %5657 = vmatpush3.bf16.msra.mxu0 %v5656_v26  ;;  %v5711_v26 = vpack.c.bf16 %v1483_v25, %v1482_v22  ;;  %v1597_v22 = vld [vmem:[#allocation21 + $0xb0] sm:$0xff] }
 0x426   :  { %5658 = vmatprep.subr.bf16.mxu0 %v6913_v5 }
 0x429   :  { %5661 = vmatpush3.bf16.msk.msra.mxu0 %vm7344_vm3, %v5659_v30  ;;  %v1484_v30 = vld [vmem:[#allocation21 + $0x50] sm:$0xff] }
 0x42a   :  { %5674 = vmatprep.subr.bf16.mxu0 %v6913_v5  ;;  %v5714_v33 = vpack.c.bf16 %v1485_v32, %v1484_v30 }
 0x42c   :  { %4982 = vmatmul.mubr.msk.f32.vlgmr.msra.gmra.mrb[6].mxu0 %vm536_vm4, %v7352_v28 }
 0x42d   :  { %5025 = vmatprep.mubr.msk.f32.mxu0 %vm6914_vm0, %v6915_v6  ;;  %5676 = vmatpush3.bf16.msra.mxu0 %v5675_v36  ;;  %v1486_v36 = vld [vmem:[#allocation21 + $0x60] sm:$0xff] }
 0x42e   :  { %5677 = vmatprep.subr.bf16.mxu0 %v6913_v5  ;;  %v5717_v39 = vpack.c.bf16 %v1487_v38, %v1486_v36  ;;  %v5735_v36 = vpack.c.bf16 %v1757_v35, %v1756_v34  ;;  %v1759_v38 = vld [vmem:[#allocation24 + $0x18] sm:$0xff] }
 0x431   :  { %5679 = vmatpush3.bf16.msra.mxu0 %v5678_v42  ;;  %v1488_v42 = vld [vmem:[#allocation21 + $0x70] sm:$0xff] }
 0x432   :  { %5680 = vmatprep.subr.bf16.mxu0 %v6913_v5  ;;  %v5720_v45 = vpack.c.bf16 %v1489_v44, %v1488_v42  ;;  %v1933_v42 = vld [vmem:[#allocation29] sm:$0xff]  ;;  %v1935_v44 = vld [vmem:[#allocation29 + $0x10] sm:$0xff] }
 0x435   :  { %5682 = vmatpush3.bf16.msra.mxu0 %v5681_v48 }
 0x436   :  { %5683 = vmatprep.subr.bf16.mxu0 %v6913_v5 }
 0x439   :  { %5685 = vmatpush3.bf16.msra.mxu0 %v5684_v54 }
 0x43a   :  { %5698 = vmatprep.subr.bf16.mxu0 %v6913_v5 }
 0x4e7   :  { %v7409_v57 = vpop.f32.mrb[2].mxu0 }
 0x4e8   :  { %v4938_v58 = vpop.f32.mrb[3].mxu0 }
 0x4f3   :  { %v900_v62 = vpop.f32.mrb[4].mxu0 }
 0x4f4   :  { %v901_v63 = vadd.f32 %v4414_v59, %v900_v62  ;;  %v4953_v0 = vpop.f32.mrb[5].mxu0  ;;  %v4430_v62 = vld [vmem:[#allocation20] ss:$0 sm:$0xff] }
 0x4f6   :  { %v904_v3 = vmax.f32 %v901_v63, 0.0 }
 0x4f8   :  { %5001 = vmatmul.mubr.msk.f32.vlgmr.msra.gmra.mrb[4].mxu1 %vm724_vm5, %v904_v3  ;;  %5026 = vmatmul.mubr.msk.f32.vlgmr.msra.gmra.mrb[8].mxu0 %vm724_vm5, %v904_v3 }
 0x4f9   :  { %5688 = vmatpush3.bf16.msra.mxu1 %v5687_v2  ;;  %5003 = vmatprep.mubr.msk.f32.mxu1 %vm6914_vm0, %v6915_v6  ;;  %v5723_v2 = vpack.c.bf16 %v1592_v61, %v1591_v60 }
 0x4fa   :  { %5689 = vmatprep.subr.bf16.mxu1 %v6913_v5  ;;  %5028 = vmatprep.mubr.msk.f32.mxu0 %vm6914_vm0, %v6915_v6 }
 0x4fb   :  { %5700 = vmatpush3.bf16.msra.mxu0 %v5699_v23  ;;  %v1598_v23 = vld [vmem:[#allocation21 + $0xb8] sm:$0xff] }
 0x4fc   :  { %5004 = vmatmul.mubr.msk.f32.gmra.mrb[6].mxu1 %vm724_vm5, %v978_v8  ;;  %5029 = vmatmul.mubr.msk.f32.gmra.mrb[10].mxu0 %vm724_vm5, %v978_v8  ;;  %v5732_v27 = vpack.c.bf16 %v1598_v23, %v1597_v22 }
 0x4fd   :  { %5691 = vmatpush3.bf16.msra.mxu1 %v5690_v9  ;;  %5006 = vmatprep.mubr.msk.f32.mxu1 %vm6914_vm0, %v6915_v6 }
 0x4fe   :  { %5692 = vmatprep.subr.bf16.mxu1 %v6913_v5  ;;  %5031 = vmatprep.mubr.msk.f32.mxu0 %vm6914_vm0, %v6915_v6 }
 0x4ff   :  { %v1048_v15 = vpop.f32.mrb[6].mxu0  ;;  %5701 = vmatprep.subr.bf16.mxu0 %v6913_v5 }
 0x500   :  { %v1049_v16 = vadd.f32 %v4414_v59, %v1048_v15  ;;  %v4983_v17 = vpop.f32.mrb[7].mxu0  ;;  %5703 = vmatpush3.bf16.msra.mxu0 %v5702_v31 }
 0x501   :  { %5694 = vmatpush3.bf16.msra.mxu1 %v5693_v12  ;;  %5704 = vmatprep.subr.bf16.mxu0 %v6913_v5  ;;  %v1596_v17 = vld [vmem:[#allocation21 + $0xa8] sm:$0xff] }
 0x502   :  { %v1052_v19 = vmax.f32 %v1049_v16, 0.0  ;;  %5695 = vmatprep.subr.bf16.mxu1 %v6913_v5  ;;  %v1595_v16 = vld [vmem:[#allocation21 + $0xa0] sm:$0xff] }
 0x503   :  { %v5729_v21 = vpack.c.bf16 %v1596_v17, %v1595_v16 }
 0x504   :  { %5007 = vmatmul.mubr.msk.f32.gmra.mrb[8].mxu1 %vm724_vm5, %v1052_v19  ;;  %5032 = vmatmul.mubr.msk.f32.gmra.mrb[12].mxu0 %vm724_vm5, %v1052_v19 }
 0x505   :  { %5697 = vmatpush3.bf16.msra.mxu1 %v5696_v18  ;;  %5050 = vmatprep.mubr.msk.f32.mxu1 %vm6914_vm0, %v6915_v6 }
 0x506   :  { %5710 = vmatprep.subr.bf16.mxu1 %v6913_v5  ;;  %5075 = vmatprep.mubr.msk.f32.mxu0 %vm6914_vm0, %v6915_v6 }
 0x507   :  { %5706 = vmatpush3.bf16.msra.mxu0 %v5705_v37  ;;  %v1758_v37 = vld [vmem:[#allocation24 + $0x10] sm:$0xff] }
 0x508   :  { %5051 = vmatmul.mubr.msk.f32.vlgmr.msra.gmra.mrb[10].mxu1 %vm724_vm5, %v904_v3  ;;  %5707 = vmatprep.subr.bf16.mxu0 %v6913_v5 }
 0x509   :  { %5053 = vmatprep.mubr.msk.f32.mxu1 %vm6914_vm0, %v6915_v6  ;;  %5712 = vmatpush3.bf16.msra.mxu1 %v5711_v26 }
 0x50a   :  { %5713 = vmatprep.subr.bf16.mxu1 %v6913_v5 }
 0x50b   :  { %5709 = vmatpush3.bf16.msra.mxu0 %v5708_v43  ;;  %v5750_v43 = vpack.c.bf16 %v1936_v41, %v1934_v40 }
 0x50c   :  { %5054 = vmatmul.mubr.msk.f32.gmra.mrb[12].mxu1 %vm724_vm5, %v978_v8  ;;  %5722 = vmatprep.subr.bf16.mxu0 %v6913_v5  ;;  %v1594_v8 = vld [vmem:[#allocation21 + $0x98] sm:$0xff] }
 0x50d   :  { %5056 = vmatprep.mubr.msk.f32.mxu1 %vm6914_vm0, %v6915_v6  ;;  %5715 = vmatpush3.bf16.msra.mxu1 %v5714_v33  ;;  %v5726_v12 = vpack.c.bf16 %v1594_v8, %v1593_v7 }
 0x50e   :  { %5716 = vmatprep.subr.bf16.mxu1 %v6913_v5 }
 0x510   :  { %5057 = vmatmul.mubr.msk.f32.gmra.mrb[14].mxu1 %vm724_vm5, %v1052_v19 }
 0x511   :  { %5112 = vmatprep.mubr.msk.f32.mxu1 %vm6914_vm0, %v6915_v6  ;;  %5718 = vmatpush3.bf16.msra.mxu1 %v5717_v39  ;;  %v5738_v39 = vpack.c.bf16 %v1759_v38, %v1758_v37 }
 0x512   :  { %5719 = vmatprep.subr.bf16.mxu1 %v6913_v5 }
 0x515   :  { %5721 = vmatpush3.bf16.msra.mxu1 %v5720_v45  ;;  %v1938_v45 = vld [vmem:[#allocation29 + $0x28] sm:$0xff] }
 0x516   :  { %5734 = vmatprep.subr.bf16.mxu1 %v6913_v5 }
 0x5cb   :  { %v1137_v46 = vpop.f32.mrb[4].mxu1  ;;  %v1226_v47 = vpop.f32.mrb[8].mxu0 }
 0x5cc   :  { %v5002_v48 = vpop.f32.mrb[5].mxu1  ;;  %v5027_v49 = vpop.f32.mrb[9].mxu0 }
 0x5cd   :  { %v1937_v49 = vld [vmem:[#allocation29 + $0x20] sm:$0xff] }
 0x5cf   :  { %v1142_v50 = vpop.f32.mrb[6].mxu1  ;;  %v1231_v51 = vpop.f32.mrb[10].mxu0 }
 0x5d0   :  { %v5005_v52 = vpop.f32.mrb[7].mxu1  ;;  %v5030_v53 = vpop.f32.mrb[11].mxu0  ;;  %v1342_v19 = vadd.f32 %v4430_v62, %v1231_v51  ;;  %v1347_v29 = vadd.f32 %v4430_v62, %v1142_v50  ;;  %v1939_v50 = vld [vmem:[#allocation29 + $0x30] sm:$0xff]  ;;  %v1942_v51 = vld [vmem:[#allocation29 + $0x48] sm:$0xff] }
 0x5d1   :  { %v1944_v52 = vld [vmem:[#allocation29 + $0x58] sm:$0xff]  ;;  %v5756_v53 = vpack.c.bf16 %v1939_v50, %v1937_v49 }
 0x5d2   :  { %v1343_v25 = vmax.f32 %v1342_v19, 0.0  ;;  %v1348_v31 = vmax.f32 %v1347_v29, 0.0  ;;  %v4452_v29 = vld [vmem:[#allocation23] ss:$0 sm:$0xff] }
 0x5d7   :  { %v7450_v54 = vpop.f32.mrb[8].mxu1  ;;  %v1236_v55 = vpop.f32.mrb[12].mxu0 }
 0x5d8   :  { %v1344_v56 = vadd.f32 %v1236_v55, %v1137_v46  ;;  %v5008_v58 = vpop.f32.mrb[9].mxu1  ;;  %v5033_v59 = vpop.f32.mrb[13].mxu0  ;;  %v1349_v32 = vadd.f32 %v4430_v62, %v7450_v54  ;;  %v1940_v46 = vld [vmem:[#allocation29 + $0x38] sm:$0xff]  ;;  %v5758_v54 = vpack.c.bf16 %v1944_v52, %v1942_v51 }
 0x5d9   :  { %v5754_v48 = vpack.c.bf16 %v1940_v46, %v1938_v45 }
 0x5da   :  { %v1345_v26 = vadd.f32 %v4430_v62, %v1344_v56  ;;  %v1350_v33 = vmax.f32 %v1349_v32, 0.0 }
 0x5db   :  { %v1315_v63 = vpop.f32.mrb[10].mxu1 }
 0x5dc   :  { %v1335_v0 = vadd.f32 %v4430_v62, %v1315_v63  ;;  %v5052_v1 = vpop.f32.mrb[11].mxu1  ;;  %v1346_v30 = vmax.f32 %v1345_v26, 0.0 }
 0x5de   :  { %v1336_v3 = vmax.f32 %v1335_v0, 0.0 }
 0x5df   :  { %v1320_v4 = vpop.f32.mrb[12].mxu1 }
 0x5e0   :  { %v1337_v9 = vadd.f32 %v4430_v62, %v1320_v4  ;;  %v5055_v10 = vpop.f32.mrb[13].mxu1  ;;  %5076 = vmatmul.mubr.msk.f32.vlgmr.msra.gmra.mrb[14].mxu0 %vm724_vm5, %v1336_v3  ;;  %5113 = vmatmul.mubr.msk.f32.vlgmr.msra.gmra.mrb[16].mxu1 %vm724_vm5, %v1336_v3 }
 0x5e1   :  { %5724 = vmatpush3.bf16.msra.mxu0 %v5723_v2  ;;  %5078 = vmatprep.mubr.msk.f32.mxu0 %vm6914_vm0, %v6915_v6 }
 0x5e2   :  { %v1338_v11 = vmax.f32 %v1337_v9, 0.0  ;;  %5115 = vmatprep.mubr.msk.f32.mxu1 %vm6914_vm0, %v6915_v6  ;;  %5725 = vmatprep.subr.bf16.mxu0 %v6913_v5 }
 0x5e3   :  { %v1325_v13 = vpop.f32.mrb[14].mxu1  ;;  %5736 = vmatpush3.bf16.msra.mxu1 %v5735_v36 }
 0x5e4   :  { %v1339_v14 = vadd.f32 %v1325_v13, %v1226_v47  ;;  %v5058_v15 = vpop.f32.mrb[15].mxu1  ;;  %5079 = vmatmul.mubr.msk.f32.gmra.mrb[16].mxu0 %vm724_vm5, %v1338_v11  ;;  %5116 = vmatmul.mubr.msk.f32.gmra.mrb[18].mxu1 %vm724_vm5, %v1338_v11  ;;  %v5752_v47 = vpack.c.bf16 %v1935_v44, %v1933_v42 }
 0x5e5   :  { %5081 = vmatprep.mubr.msk.f32.mxu0 %vm6914_vm0, %v6915_v6  ;;  %5118 = vmatprep.mubr.msk.f32.mxu1 %vm6914_vm0, %v6915_v6 }
 0x5e6   :  { %v1340_v18 = vadd.f32 %v4430_v62, %v1339_v14  ;;  %5727 = vmatpush3.bf16.msra.mxu0 %v5726_v12  ;;  %5737 = vmatprep.subr.bf16.mxu1 %v6913_v5 }
 0x5e7   :  { %5728 = vmatprep.subr.bf16.mxu0 %v6913_v5  ;;  %5739 = vmatpush3.bf16.msra.mxu1 %v5738_v39 }
 0x5e8   :  { %v1341_v20 = vmax.f32 %v1340_v18, 0.0  ;;  %5740 = vmatprep.subr.bf16.mxu1 %v6913_v5 }
 0x5ea   :  { %5082 = vmatmul.mubr.msk.f32.gmra.mrb[18].mxu0 %vm724_vm5, %v1341_v20  ;;  %5119 = vmatmul.mubr.msk.f32.gmra.mrb[20].mxu1 %vm724_vm5, %v1341_v20 }
 0x5eb   :  { %5084 = vmatprep.mubr.msk.f32.mxu0 %vm6914_vm0, %v6915_v6  ;;  %5121 = vmatprep.mubr.msk.f32.mxu1 %vm6914_vm0, %v6915_v6 }
 0x5ec   :  { %5730 = vmatpush3.bf16.msra.mxu0 %v5729_v21 }
 0x5ed   :  { %5731 = vmatprep.subr.bf16.mxu0 %v6913_v5 }
 0x5ee   :  { %5085 = vmatmul.mubr.msk.f32.gmra.mrb[20].mxu0 %vm724_vm5, %v1343_v25  ;;  %5122 = vmatmul.mubr.msk.f32.gmra.mrb[22].mxu1 %vm724_vm5, %v1343_v25 }
 0x5ef   :  { %5087 = vmatprep.mubr.msk.f32.mxu0 %vm6914_vm0, %v6915_v6  ;;  %5124 = vmatprep.mubr.msk.f32.mxu1 %vm6914_vm0, %v6915_v6 }
 0x5f0   :  { %5733 = vmatpush3.bf16.msra.mxu0 %v5732_v27 }
 0x5f1   :  { %5751 = vmatprep.subr.bf16.mxu0 %v5750_v43 }
 0x5f2   :  { %5088 = vmatmul.mubr.msk.f32.gmra.mrb[22].mxu0 %vm724_vm5, %v1346_v30  ;;  %5125 = vmatmul.mubr.msk.f32.gmra.mrb[24].mxu1 %vm724_vm5, %v1346_v30 }
 0x5f3   :  { %5090 = vmatprep.mubr.msk.f32.mxu0 %vm6914_vm0, %v6915_v6  ;;  %5127 = vmatprep.mubr.msk.f32.mxu1 %vm6914_vm0, %v6915_v6 }
 0x5f6   :  { %5091 = vmatmul.mubr.msk.f32.gmra.mrb[24].mxu0 %vm724_vm5, %v1348_v31  ;;  %5128 = vmatmul.mubr.msk.f32.gmra.mrb[26].mxu1 %vm724_vm5, %v1348_v31 }
 0x5f7   :  { %5093 = vmatprep.mubr.msk.f32.mxu0 %vm6914_vm0, %v6915_v6  ;;  %5130 = vmatprep.mubr.msk.f32.mxu1 %vm6914_vm0, %v6915_v6 }
 0x5fa   :  { %5094 = vmatmul.mubr.msk.f32.gmra.mrb[26].mxu0 %vm724_vm5, %v1350_v33  ;;  %5131 = vmatmul.mubr.msk.f32.gmra.mrb[28].mxu1 %vm724_vm5, %v1350_v33 }
 0x5fb   :  { %5149 = vmatprep.mubr.msk.f32.mxu0 %vm6914_vm0, %v6915_v6  ;;  %5178 = vmatprep.mubr.msk.f32.mxu1 %vm6914_vm0, %v6915_v6 }
 0x5fe   :  { %5150 = vmatmul.mubr.msk.f32.vlgmr.msra.gmra.mrb[28].mxu0 %vm724_vm5, %v1336_v3 }
 0x5ff   :  { %5152 = vmatprep.mubr.msk.f32.mxu0 %vm6914_vm0, %v6915_v6  ;;  %5753 = vmatpush1.bf16.msra.mxu0 %v5752_v47 }
 0x600   :  { %5755 = vmatprep.subr.bf16.mxu0 %v5754_v48 }
 0x602   :  { %5153 = vmatmul.mubr.msk.f32.gmra.mrb[30].mxu0 %vm724_vm5, %v1338_v11 }
 0x603   :  { %5155 = vmatprep.mubr.msk.f32.mxu0 %vm6914_vm0, %v6915_v6  ;;  %5757 = vmatpush1.bf16.msra.mxu0 %v5756_v53 }
 0x604   :  { %5759 = vmatprep.subr.bf16.mxu0 %v5758_v54 }
 0x606   :  { %5156 = vmatmul.mubr.msk.f32.gmra.mrb[32].mxu0 %vm724_vm5, %v1341_v20 }
 0x607   :  { %5158 = vmatprep.mubr.msk.f32.mxu0 %vm6914_vm0, %v6915_v6 }
 0x60a   :  { %5159 = vmatmul.mubr.msk.f32.gmra.mrb[34].mxu0 %vm724_vm5, %v1343_v25 }
 0x60b   :  { %5161 = vmatprep.mubr.msk.f32.mxu0 %vm6914_vm0, %v6915_v6 }
 0x60e   :  { %5162 = vmatmul.mubr.msk.f32.gmra.mrb[36].mxu0 %vm724_vm5, %v1346_v30 }
 0x60f   :  { %5164 = vmatprep.mubr.msk.f32.mxu0 %vm6914_vm0, %v6915_v6 }
 0x612   :  { %5165 = vmatmul.mubr.msk.f32.gmra.mrb[38].mxu0 %vm724_vm5, %v1348_v31 }
 0x613   :  { %5167 = vmatprep.mubr.msk.f32.mxu0 %vm6914_vm0, %v6915_v6 }
 0x616   :  { %5168 = vmatmul.mubr.msk.f32.gmra.mrb[40].mxu0 %vm724_vm5, %v1350_v33 }
 0x617   :  { %2028 = vmatprep.mubr.f32.mxu0 %v6915_v6 }
 0x6b3   :  { %v1447_v55 = vpop.f32.mrb[14].mxu0  ;;  %v1556_v56 = vpop.f32.mrb[16].mxu1 }
 0x6b4   :  { %v5077_v58 = vpop.f32.mrb[15].mxu0  ;;  %v5114_v59 = vpop.f32.mrb[17].mxu1 }
 0x6b7   :  { %v1452_v60 = vpop.f32.mrb[16].mxu0  ;;  %v1561_v61 = vpop.f32.mrb[18].mxu1 }
 0x6b8   :  { %v5080_v62 = vpop.f32.mrb[17].mxu0  ;;  %v5117_v63 = vpop.f32.mrb[19].mxu1 }
 0x6bd   :  { %v1457_v0 = vpop.f32.mrb[18].mxu0  ;;  %v1566_v1 = vpop.f32.mrb[20].mxu1 }
 0x6be   :  { %v5083_v2 = vpop.f32.mrb[19].mxu0  ;;  %v5120_v3 = vpop.f32.mrb[21].mxu1 }
 0x6c1   :  { %v7520_v4 = vpop.f32.mrb[20].mxu0  ;;  %v1571_v7 = vpop.f32.mrb[22].mxu1 }
 0x6c2   :  { %v5086_v8 = vpop.f32.mrb[21].mxu0  ;;  %v5123_v9 = vpop.f32.mrb[23].mxu1 }
 0x6c5   :  { %v7522_v10 = vpop.f32.mrb[22].mxu0  ;;  %v1576_v11 = vpop.f32.mrb[24].mxu1 }
 0x6c6   :  { %v1724_v12 = vadd.f32 %v1576_v11, %v1447_v55  ;;  %v5089_v13 = vpop.f32.mrb[23].mxu0  ;;  %v5126_v14 = vpop.f32.mrb[25].mxu1 }
 0x6c8   :  { %v1725_v8 = vadd.f32 %v4452_v29, %v1724_v12 }
 0x6c9   :  { %v1472_v15 = vpop.f32.mrb[24].mxu0  ;;  %v1581_v16 = vpop.f32.mrb[26].mxu1 }
 0x6ca   :  { %v1727_v17 = vadd.f32 %v1581_v16, %v1452_v60  ;;  %v5092_v18 = vpop.f32.mrb[25].mxu0  ;;  %v5129_v19 = vpop.f32.mrb[27].mxu1  ;;  %v1726_v14 = vmax.f32 %v1725_v8, 0.0 }
 0x6cc   :  { %v1728_v13 = vadd.f32 %v4452_v29, %v1727_v17 }
 0x6cd   :  { %v1477_v20 = vpop.f32.mrb[26].mxu0  ;;  %v1586_v21 = vpop.f32.mrb[28].mxu1 }
 0x6ce   :  { %v1730_v22 = vadd.f32 %v1586_v21, %v1457_v0  ;;  %v5095_v23 = vpop.f32.mrb[27].mxu0  ;;  %v5132_v25 = vpop.f32.mrb[29].mxu1  ;;  %v1722_v0 = vadd.f32 %v4452_v29, %v1571_v7  ;;  %v1729_v19 = vmax.f32 %v1728_v13, 0.0  ;;  %v1737_v7 = vadd.f32 %v4452_v29, %v1472_v15 }
 0x6cf   :  { %v1735_v23 = vadd.f32 %v4452_v29, %v7522_v10  ;;  %v1739_v12 = vadd.f32 %v4452_v29, %v1477_v20  ;;  %v1850_v10 = vld [vmem:[#allocation26 + $0x18] sm:$0xff]  ;;  %v1851_v20 = vld [vmem:[#allocation26 + $0x20] sm:$0xff] }
 0x6d0   :  { %v1723_v11 = vmax.f32 %v1722_v0, 0.0  ;;  %v1731_v16 = vadd.f32 %v4452_v29, %v1730_v22  ;;  %v1847_v22 = vld [vmem:[#allocation26] sm:$0xff] }
 0x6d1   :  { %v1665_v26 = vpop.f32.mrb[28].mxu0 }
 0x6d2   :  { %v5151_v27 = vpop.f32.mrb[29].mxu0  ;;  %v1705_v30 = vadd.f32 %v4452_v29, %v1665_v26  ;;  %v1732_v25 = vmax.f32 %v1731_v16, 0.0 }
 0x6d4   :  { %v1706_v34 = vmax.f32 %v1705_v30, 0.0  ;;  %v1736_v30 = vmax.f32 %v1735_v23, 0.0  ;;  %v2067_v23 = vld [vmem:[#allocation29 + $0xd8] sm:$0xff] }
 0x6d5   :  { %v1670_v31 = vpop.f32.mrb[30].mxu0 }
 0x6d6   :  { %v1707_v32 = vadd.f32 %v4452_v29, %v1670_v31  ;;  %v5154_v33 = vpop.f32.mrb[31].mxu0 }
 0x6d7   :  { %v1740_v33 = vmax.f32 %v1739_v12, 0.0 }
 0x6d8   :  { %v1708_v35 = vmax.f32 %v1707_v32, 0.0  ;;  %v1738_v32 = vmax.f32 %v1737_v7, 0.0  ;;  %v2069_v7 = vld [vmem:[#allocation29 + $0xe8] sm:$0xff] }
 0x6d9   :  { %v1675_v36 = vpop.f32.mrb[32].mxu0 }
 0x6da   :  { %v1741_v37 = vadd.f32 %v1708_v35, %v1706_v34  ;;  %v1709_v38 = vadd.f32 %v4452_v29, %v1675_v36  ;;  %v5157_v39 = vpop.f32.mrb[33].mxu0  ;;  %v1848_v35 = vld [vmem:[#allocation26 + $0x8] sm:$0xff] }
 0x6dc   :  { %v1710_v40 = vmax.f32 %v1709_v38, 0.0  ;;  %v1849_v38 = vld [vmem:[#allocation26 + $0x10] sm:$0xff] }
 0x6dd   :  { %v1680_v41 = vpop.f32.mrb[34].mxu0  ;;  %v5744_v15 = vpack.c.bf16 %v1850_v10, %v1849_v38 }
 0x6de   :  { %v1742_v42 = vadd.f32 %v1741_v37, %v1710_v40  ;;  %v1711_v43 = vadd.f32 %v4452_v29, %v1680_v41  ;;  %v5160_v44 = vpop.f32.mrb[35].mxu0  ;;  %v1941_v40 = vld [vmem:[#allocation29 + $0x40] sm:$0xff]  ;;  %v1943_v41 = vld [vmem:[#allocation29 + $0x50] sm:$0xff] }
 0x6df   :  { %v1948_v44 = vld [vmem:[#allocation29 + $0x78] sm:$0xff] }
 0x6e0   :  { %v1712_v45 = vmax.f32 %v1711_v43, 0.0  ;;  %v1946_v43 = vld [vmem:[#allocation29 + $0x68] sm:$0xff] }
 0x6e1   :  { %v1685_v46 = vpop.f32.mrb[36].mxu0 }
 0x6e2   :  { %v1743_v47 = vadd.f32 %v1742_v42, %v1712_v45  ;;  %v1713_v48 = vadd.f32 %v1685_v46, %v1556_v56  ;;  %v5163_v49 = vpop.f32.mrb[37].mxu0  ;;  %v5760_v42 = vpack.c.bf16 %v1943_v41, %v1941_v40  ;;  %v5762_v45 = vpack.c.bf16 %v1948_v44, %v1946_v43  ;;  %v1945_v46 = vld [vmem:[#allocation29 + $0x60] sm:$0xff]  ;;  %v2181_v43 = vld [vmem:[#allocation29 + $0x108] sm:$0xff]  ;;  %v2183_v44 = vld [vmem:[#allocation29 + $0x118] sm:$0xff] }
 0x6e4   :  { %v1714_v50 = vadd.f32 %v4452_v29, %v1713_v48  ;;  %5761 = vmatpush1.bf16.msra.mxu0 %v5760_v42 }
 0x6e5   :  { %v1690_v51 = vpop.f32.mrb[38].mxu0  ;;  %5763 = vmatprep.subr.bf16.mxu0 %v5762_v45  ;;  %v5782_v45 = vpack.c.bf16 %v2183_v44, %v2181_v43  ;;  %v2308_v44 = vld [vmem:[#allocation29 + $0x1a0] sm:$0xff] }
 0x6e6   :  { %v1715_v52 = vmax.f32 %v1714_v50, 0.0  ;;  %v1716_v53 = vadd.f32 %v1690_v51, %v1561_v61  ;;  %v5166_v54 = vpop.f32.mrb[39].mxu0  ;;  %v1733_v61 = vadd.f32 %v4452_v29, %v7520_v4  ;;  %v5741_v4 = vpack.c.bf16 %v1848_v35, %v1847_v22  ;;  %v4456_v51 = vld [vmem:[#allocation27] ss:$0 sm:$0xff] }
 0x6e7   :  { %v2057_v54 = vld [vmem:[#allocation29 + $0x88] sm:$0xff] }
 0x6e8   :  { %v1744_v55 = vadd.f32 %v1743_v47, %v1715_v52  ;;  %v1717_v58 = vadd.f32 %v4452_v29, %v1716_v53  ;;  %v1734_v26 = vmax.f32 %v1733_v61, 0.0  ;;  %v1947_v47 = vld [vmem:[#allocation29 + $0x70] sm:$0xff] }
 0x6e9   :  { %v1695_v59 = vpop.f32.mrb[40].mxu0  ;;  %v5764_v48 = vpack.c.bf16 %v1947_v47, %v1945_v46  ;;  %v2062_v61 = vld [vmem:[#allocation29 + $0xb0] sm:$0xff]  ;;  %v2073_v46 = vld [vmem:[#allocation30 + $0x2] sm:$0x3] }
 0x6ea   :  { %v1718_v60 = vmax.f32 %v1717_v58, 0.0  ;;  %v1719_v62 = vadd.f32 %v1695_v59, %v1566_v1  ;;  %v5169_v63 = vpop.f32.mrb[41].mxu0  ;;  %v1951_v59 = vlaneseq }
 0x6eb   :  { %5765 = vmatpush1.bf16.msra.mxu0 %v5764_v48  ;;  %v1949_v63 = vld [vmem:[#allocation30] sm:$0x3] }
 0x6ec   :  { %v1745_v2 = vadd.f32 %v1744_v55, %v1718_v60  ;;  %v1720_v3 = vadd.f32 %v4452_v29, %v1719_v62  ;;  %v1852_v29 = vld [vmem:[#allocation26 + $0x28] sm:$0x3]  ;;  %v2059_v55 = vld [vmem:[#allocation29 + $0x98] sm:$0xff]  ;;  %v1952_v60 = vshrl.u32 %v1951_v59, 7  ;;  %5783 = vmatprep.subr.bf16.mxu0 %v5782_v45  ;;  %v2180_v48 = vld [vmem:[#allocation29 + $0x100] sm:$0xff] }
 0x6ed   :  { %v5747_v39 = vpack.c.bf16 %v1852_v29, %v1851_v20  ;;  %v5766_v58 = vpack.c.bf16 %v2059_v55, %v2057_v54  ;;  %v2185_v54 = vld [vmem:[#allocation29 + $0x128] sm:$0xff]  ;;  %v2187_v55 = vld [vmem:[#allocation29 + $0x138] sm:$0xff]  ;;  %v2184_v59 = vld [vmem:[#allocation29 + $0x120] sm:$0xff] }
 0x6ee   :  { %v1721_v9 = vmax.f32 %v1720_v3, 0.0  ;;  %v7540_v62 = vsub.s32 0, %v1952_v60  ;;  %v2058_v3 = vld [vmem:[#allocation29 + $0x90] sm:$0xff]  ;;  %v7544_v22 = vsub.s32 1, %v1952_v60 }
 0x6ef   :  { %v2186_v60 = vld [vmem:[#allocation29 + $0x130] sm:$0xff] }
 0x6f0   :  { %v1746_v56 = vadd.f32 %v1745_v2, %v1721_v9  ;;  %v1954_v0 = vrot.slane %v1949_v63, %v7540_v62  ;;  %v2056_v2 = vld [vmem:[#allocation29 + $0x80] sm:$0xff]  ;;  %v1958_v35 = vrot.slane %v1949_v63, %v7544_v22  ;;  %v2078_v47 = vrot.slane %v2073_v46, %v7540_v62  ;;  %v2310_v45 = vld [vmem:[#allocation29 + $0x1b0] sm:$0xff] }
 0x6f1   :  { %v5768_v8 = vpack.c.bf16 %v2058_v3, %v2056_v2  ;;  %v5788_v63 = vpack.c.bf16 %v2186_v60, %v2184_v59  ;;  %v2191_v2 = vld [vmem:[#allocation29 + $0x158] sm:$0xff]  ;;  %v2188_v3 = vld [vmem:[#allocation29 + $0x140] sm:$0xff]  ;;  %v2318_v59 = vld [vmem:[#allocation29 + $0x1f0] sm:$0xff] }
 0x6f2   :  { %v1747_v18 = vadd.f32 %v1746_v56, %v1723_v11  ;;  %v2061_v56 = vld [vmem:[#allocation29 + $0xa8] sm:$0xff] }
 0x6f4   :  { %v1748_v21 = vadd.f32 %v1747_v18, %v1726_v14  ;;  %v2063_v14 = vld [vmem:[#allocation29 + $0xb8] sm:$0xff]  ;;  %v2060_v18 = vld [vmem:[#allocation29 + $0xa0] sm:$0xff] }
 0x6f5   :  { %v5770_v16 = vpack.c.bf16 %v2063_v14, %v2061_v56 }
 0x6f6   :  { %v1749_v1 = vadd.f32 %v1748_v21, %v1729_v19  ;;  %v5772_v19 = vpack.c.bf16 %v2062_v61, %v2060_v18  ;;  %v2065_v21 = vld [vmem:[#allocation29 + $0xc8] sm:$0xff]  ;;  %v2194_v18 = vld [vmem:[#allocation29 + $0x170] sm:$0xff] }
 0x6f8   :  { %v1750_v27 = vadd.f32 %v1749_v1, %v1732_v25  ;;  %v2064_v25 = vld [vmem:[#allocation29 + $0xc0] sm:$0xff]  ;;  %v5774_v1 = vpack.c.bf16 %v2067_v23, %v2065_v21  ;;  %v2082_v23 = vrot.slane %v2073_v46, %v7544_v22  ;;  %v5804_v46 = vpack.c.bf16 %v2310_v45, %v2308_v44 }
 0x6fa   :  { %v1751_v31 = vadd.f32 %v1750_v27, %v1734_v26  ;;  %v2066_v26 = vld [vmem:[#allocation29 + $0xd0] sm:$0xff]  ;;  %v2071_v27 = vld [vmem:[#allocation29 + $0xf8] sm:$0xff] }
 0x6fb   :  { %v5778_v12 = vpack.c.bf16 %v2071_v27, %v2069_v7 }
 0x6fc   :  { %v1752_v17 = vadd.f32 %v1751_v31, %v1736_v30  ;;  %v5776_v30 = vpack.c.bf16 %v2066_v26, %v2064_v25  ;;  %v2068_v31 = vld [vmem:[#allocation29 + $0xe0] sm:$0xff] }
 0x6fe   :  { %v1753_v34 = vadd.f32 %v1752_v17, %v1738_v32  ;;  %v2070_v32 = vld [vmem:[#allocation29 + $0xf0] sm:$0xff] }
 0x6ff   :  { %v5780_v17 = vpack.c.bf16 %v2070_v32, %v2068_v31 }
 0x700   :  { %v1754_v36 = vadd.f32 %v1753_v34, %v1740_v33 }
 0x702   :  { %v1755_v37 = vmul.f32 0.06666667, %v1754_v36 }
 0x704   :  { %5179 = vmatmul.mubr.msk.f32.vlgmr.msra.gmra.mrb[30].mxu1 %vm1767_vm6, %v1755_v37 }
 0x705   :  { %5742 = vmatpush3.bf16.msra.mxu1 %v5741_v4  ;;  %5193 = vmatprep.mubr.msk.f32.mxu1 %vm6914_vm0, %v6915_v6 }
 0x706   :  { %5743 = vmatprep.subr.bf16.mxu1 %v6913_v5 }
 0x709   :  { %5745 = vmatpush3.bf16.msra.mxu1 %v5744_v15 }
 0x70a   :  { %5746 = vmatprep.subr.bf16.mxu1 %v6913_v5 }
 0x70d   :  { %5749 = vmatpush3.bf16.msk.msra.mxu1 %vm7344_vm3, %v5747_v39 }
 0x70e   :  { %5767 = vmatprep.subr.bf16.mxu1 %v5766_v58  ;;  %v5786_v58 = vpack.c.bf16 %v2187_v55, %v2185_v54 }
 0x710   :  { %5194 = vmatmul.mubr.msk.f32.vlgmr.msra.gmra.mrb[32].mxu1 %vm536_vm4, %v7352_v28 }
 0x711   :  { %2152 = vmatprep.mubr.f32.mxu1 %v6915_v6  ;;  %5769 = vmatpush1.bf16.msra.mxu1 %v5768_v8 }
 0x712   :  { %5771 = vmatprep.subr.bf16.mxu1 %v5770_v16  ;;  %v2192_v16 = vld [vmem:[#allocation29 + $0x160] sm:$0xff] }
 0x713   :  { %v5796_v61 = vpack.c.bf16 %v2194_v18, %v2192_v16 }
 0x715   :  { %5773 = vmatpush1.bf16.msra.mxu1 %v5772_v19 }
 0x716   :  { %5775 = vmatprep.subr.bf16.mxu1 %v5774_v1 }
 0x719   :  { %5777 = vmatpush1.bf16.msra.mxu1 %v5776_v30 }
 0x71a   :  { %5779 = vmatprep.subr.bf16.mxu1 %v5778_v12 }
 0x71d   :  { %5781 = vmatpush1.bf16.msra.mxu1 %v5780_v17 }
 0x7d7   :  { %v7536_v49 = vpop.f32.mrb[30].mxu1 }
 0x7d8   :  { %v5180_v50 = vpop.f32.mrb[31].mxu1 }
 0x7d9   :  { %v2182_v50 = vld [vmem:[#allocation29 + $0x110] sm:$0xff] }
 0x7e3   :  { %v1929_v52 = vpop.f32.mrb[32].mxu1 }
 0x7e4   :  { %v1930_v28 = vadd.f32 %v4456_v51, %v1929_v52  ;;  %v5195_v53 = vpop.f32.mrb[33].mxu1  ;;  %v5784_v51 = vpack.c.bf16 %v2182_v50, %v2180_v48  ;;  %v2315_v48 = vld [vmem:[#allocation29 + $0x1d8] sm:$0xff]  ;;  %v2312_v50 = vld [vmem:[#allocation29 + $0x1c0] sm:$0xff] }
 0x7e6   :  { %4459 = vmatmul.mubr.msk.f32.vlgmr.msra.gmra.mrb[42].mxu0 %vm724_vm5, %v1930_v28 }
 0x7e7   :  { %2276 = vmatprep.mubr.f32.mxu0 %v6915_v6  ;;  %5785 = vmatpush1.bf16.msra.mxu0 %v5784_v51 }
 0x7e8   :  { %5787 = vmatprep.subr.bf16.mxu0 %v5786_v58  ;;  %v2316_v58 = vld [vmem:[#allocation29 + $0x1e0] sm:$0xff] }
 0x7e9   :  { %v5812_v60 = vpack.c.bf16 %v2318_v59, %v2316_v58  ;;  %v2607_v59 = vld [vmem:[#allocation36] sm:$0xff] }
 0x7eb   :  { %5789 = vmatpush1.bf16.msra.mxu0 %v5788_v63 }
 0x8b9   :  { %v2030_v9 = vpop.f32.mrb[42].mxu0 }
 0x8ba   :  { %v2031_v11 = vadd.f32 %v2030_v9, %v1954_v0  ;;  %v2032_v13 = vpop.f32.mrb[43].mxu0  ;;  %v2189_v0 = vld [vmem:[#allocation29 + $0x148] sm:$0xff]  ;;  %v2190_v9 = vld [vmem:[#allocation29 + $0x150] sm:$0xff] }
 0x8bb   :  { %v2033_v36 = vadd.f32 %v2032_v13, %v1958_v35  ;;  %v5790_v8 = vpack.c.bf16 %v2191_v2, %v2189_v0  ;;  %v2195_v13 = vld [vmem:[#allocation29 + $0x178] sm:$0xff]  ;;  %v5792_v56 = vpack.c.bf16 %v2190_v9, %v2188_v3  ;;  %v2305_v35 = vld [vmem:[#allocation29 + $0x188] sm:$0xff] }
 0x8bc   :  { %6152 = vtanh.f32 %v2031_v11  ;;  %v4460_v34 = vmul.f32 -1.442695, %v2031_v11  ;;  %v2193_v11 = vld [vmem:[#allocation29 + $0x168] sm:$0xff] }
 0x8bd   :  { %v4461_v4 = vmul.f32 -1.442695, %v2033_v36  ;;  %5791 = vmatprep.subr.bf16.mxu0 %v5790_v8  ;;  %v5794_v14 = vpack.c.bf16 %v2195_v13, %v2193_v11  ;;  %v2307_v36 = vld [vmem:[#allocation29 + $0x198] sm:$0xff] }
 0x8be   :  { %6154 = vpow2.f32 %v4460_v34  ;;  %5793 = vmatpush1.bf16.msra.mxu0 %v5792_v56 }
 0x8bf   :  { %6156 = vpow2.f32 %v4461_v4  ;;  %5795 = vmatprep.subr.bf16.mxu0 %v5794_v14  ;;  %v5798_v4 = vpack.c.bf16 %v2307_v36, %v2305_v35  ;;  %v2321_v35 = vld [vmem:[#allocation30 + $0x6] sm:$0x3] }
 0x8c0   :  { %v2326_v36 = vrot.slane %v2321_v35, %v7540_v62 }
 0x8c1   :  { %5799 = vmatprep.subr.bf16.mxu1 %v5798_v4 }
 0x8c2   :  { %5797 = vmatpush1.bf16.msra.mxu0 %v5796_v61  ;;  %v2521_v61 = vld [vmem:[#allocation33] sm:$0xff] }
 0x8c3   :  { %5814 = vmatprep.subr.bf16.mxu0 %v6913_v5 }
 0x8c6   :  { %v6153_v33 = vpop.eup %6152 }
 0x8c7   :  { %2049 = vrot.lane.b32.xlu0 %v6153_v33, %s6917_s1 }
 0x8c8   :  { %v6155_v37 = vpop.eup %6154 }
 0x8c9   :  { %v2038_v38 = vadd.f32 1.0, %v6155_v37  ;;  %v6157_v10 = vpop.eup %6156  ;;  %v2197_v37 = vld [vmem:[#allocation30 + $0x4] sm:$0x3] }
 0x8ca   :  { %v2045_v15 = vadd.f32 1.0, %v6157_v10  ;;  %v2304_v10 = vld [vmem:[#allocation29 + $0x180] sm:$0xff]  ;;  %v2206_v2 = vrot.slane %v2197_v37, %v7544_v22 }
 0x8cb   :  { %6158 = vrcp.f32 %v2038_v38  ;;  %v2202_v38 = vrot.slane %v2197_v37, %v7540_v62 }
 0x8cc   :  { %6160 = vrcp.f32 %v2045_v15  ;;  %v2306_v15 = vld [vmem:[#allocation29 + $0x190] sm:$0xff] }
 0x8d5   :  { %v6159_v20 = vpop.eup %6158 }
 0x8d6   :  { %v6161_v40 = vpop.eup %6160 }
 0x939   :  { %v2050_v29 = vpop.permute.xlu0 %2049 }
 0x93a   :  { %v2052_v39 = vmul.f32 %v6159_v20, %v2050_v29  ;;  %v5800_v20 = vpack.c.bf16 %v2306_v15, %v2304_v10  ;;  %v2429_v10 = vld [vmem:[#allocation32 + $0x10] sm:$0xff]  ;;  %v2430_v15 = vld [vmem:[#allocation32 + $0x18] sm:$0xff] }
 0x93c   :  { %6162 = vtanh.f32 %v2052_v39 }
 0x946   :  { %v6163_v41 = vpop.eup %6162 }
 0x947   :  { %v2054_v42 = vmul.f32 %v6163_v41, %v6161_v40  ;;  %v2309_v41 = vld [vmem:[#allocation29 + $0x1a8] sm:$0xff] }
 0x949   :  { %4462 = vmatmul.mubr.msk.f32.vlgmr.msra.gmra.mrb[34].mxu1 %vm724_vm5, %v2054_v42  ;;  %v2311_v42 = vld [vmem:[#allocation29 + $0x1b8] sm:$0xff] }
 0x94a   :  { %2400 = vmatprep.mubr.f32.mxu1 %v6915_v6  ;;  %5801 = vmatpush1.bf16.msra.mxu1 %v5800_v20  ;;  %v5802_v43 = vpack.c.bf16 %v2311_v42, %v2309_v41  ;;  %v5818_v20 = vpack.c.bf16 %v2430_v15, %v2429_v10  ;;  %v2433_v41 = vld [vmem:[#allocation32 + $0x30] sm:$0xff]  ;;  %v2434_v42 = vld [vmem:[#allocation32 + $0x38] sm:$0xff] }
 0x94b   :  { %v2730_v10 = vld [vmem:[#allocation39 + $0x20] sm:$0xff]  ;;  %v2731_v15 = vld [vmem:[#allocation39 + $0x28] sm:$0xff] }
 0x94c   :  { %5803 = vmatprep.subr.bf16.mxu1 %v5802_v43  ;;  %v5824_v43 = vpack.c.bf16 %v2434_v42, %v2433_v41  ;;  %v2815_v41 = vld [vmem:[#allocation42] sm:$0xff]  ;;  %v2816_v42 = vld [vmem:[#allocation42 + $0x8] sm:$0xff] }
 0x94e   :  { %5805 = vmatpush1.bf16.msra.mxu1 %v5804_v46 }
 0xa1c   :  { %v2154_v52 = vpop.f32.mrb[34].mxu1 }
 0xa1d   :  { %v2155_v28 = vadd.f32 %v2154_v52, %v2078_v47  ;;  %v2156_v53 = vpop.f32.mrb[35].mxu1  ;;  %v2313_v47 = vld [vmem:[#allocation29 + $0x1c8] sm:$0xff]  ;;  %v2314_v52 = vld [vmem:[#allocation29 + $0x1d0] sm:$0xff] }
 0xa1e   :  { %v2157_v25 = vadd.f32 %v2156_v53, %v2082_v23  ;;  %v5806_v51 = vpack.c.bf16 %v2315_v48, %v2313_v47  ;;  %v2319_v53 = vld [vmem:[#allocation29 + $0x1f8] sm:$0xff]  ;;  %v5808_v54 = vpack.c.bf16 %v2314_v52, %v2312_v50  ;;  %v2330_v47 = vrot.slane %v2321_v35, %v7544_v22  ;;  %v2609_v22 = vld [vmem:[#allocation36 + $0x10] sm:$0xff] }
 0xa1f   :  { %6164 = vtanh.f32 %v2155_v28  ;;  %v4463_v21 = vmul.f32 -1.442695, %v2155_v28  ;;  %v2317_v28 = vld [vmem:[#allocation29 + $0x1e8] sm:$0xff] }
 0xa20   :  { %v4464_v1 = vmul.f32 -1.442695, %v2157_v25  ;;  %5807 = vmatprep.subr.bf16.mxu1 %v5806_v51  ;;  %v5810_v55 = vpack.c.bf16 %v2319_v53, %v2317_v28  ;;  %v2727_v35 = vld [vmem:[#allocation39 + $0x8] sm:$0xff] }
 0xa21   :  { %6166 = vpow2.f32 %v4463_v21  ;;  %5809 = vmatpush1.bf16.msra.mxu1 %v5808_v54 }
 0xa22   :  { %6168 = vpow2.f32 %v4464_v1  ;;  %5811 = vmatprep.subr.bf16.mxu1 %v5810_v55 }
 0xa25   :  { %5813 = vmatpush1.bf16.msra.mxu1 %v5812_v60  ;;  %v2608_v60 = vld [vmem:[#allocation36 + $0x8] sm:$0xff] }
 0xa26   :  { %5826 = vmatprep.subr.bf16.mxu1 %v6913_v5 }
 0xa29   :  { %v6165_v19 = vpop.eup %6164 }
 0xa2a   :  { %2173 = vrot.lane.b32.xlu0 %v6165_v19, %s6917_s1  ;;  %v2522_v19 = vld [vmem:[#allocation33 + $0x8] sm:$0xff] }
 0xa2b   :  { %v6167_v26 = vpop.eup %6166  ;;  %v5827_v25 = vpack.c.bf16 %v2522_v19, %v2521_v61 }
 0xa2c   :  { %v2162_v7 = vadd.f32 1.0, %v6167_v26  ;;  %v6169_v27 = vpop.eup %6168  ;;  %v2523_v26 = vld [vmem:[#allocation33 + $0x10] sm:$0xff] }
 0xa2d   :  { %v2169_v30 = vadd.f32 1.0, %v6169_v27 }
 0xa2e   :  { %6170 = vrcp.f32 %v2162_v7  ;;  %v2524_v7 = vld [vmem:[#allocation33 + $0x18] sm:$0xff] }
 0xa2f   :  { %6172 = vrcp.f32 %v2169_v30  ;;  %v5830_v27 = vpack.c.bf16 %v2524_v7, %v2523_v26  ;;  %v2525_v30 = vld [vmem:[#allocation33 + $0x20] sm:$0xff] }
 0xa38   :  { %v6171_v12 = vpop.eup %6170 }
 0xa39   :  { %v6173_v17 = vpop.eup %6172 }
 0xa9c   :  { %v2174_v31 = vpop.permute.xlu0 %2173 }
 0xa9d   :  { %v2176_v32 = vmul.f32 %v6171_v12, %v2174_v31  ;;  %v2526_v12 = vld [vmem:[#allocation33 + $0x28] sm:$0x3] }
 0xa9e   :  { %v5833_v31 = vpack.c.bf16 %v2526_v12, %v2525_v30 }
 0xa9f   :  { %6174 = vtanh.f32 %v2176_v32  ;;  %v6236_v32 = vld [vmem:[%s7851_s21] sm:$0xff] }
 0xaa9   :  { %v6175_v33 = vpop.eup %6174 }
 0xaaa   :  { %v2178_v34 = vmul.f32 %v6175_v33, %v6173_v17  ;;  %v2427_v17 = vld [vmem:[#allocation32] sm:$0xff]  ;;  %v2428_v33 = vld [vmem:[#allocation32 + $0x8] sm:$0xff] }
 0xaac   :  { %4465 = vmatmul.mubr.msk.f32.vlgmr.msra.gmra.mrb[44].mxu0 %vm724_vm5, %v2178_v34  ;;  %v5815_v34 = vpack.c.bf16 %v2428_v33, %v2427_v17 }
 0xaad   :  { %5212 = vmatprep.mubr.msk.f32.mxu0 %vm6914_vm0, %v6915_v6 }
 0xaae   :  { %5816 = vmatpush3.bf16.msra.mxu0 %v5815_v34  ;;  %v2726_v34 = vld [vmem:[#allocation39] sm:$0xff] }
 0xaaf   :  { %5817 = vmatprep.subr.bf16.mxu0 %v6913_v5 }
 0xab2   :  { %5819 = vmatpush3.bf16.msra.mxu0 %v5818_v20  ;;  %v5855_v20 = vpack.c.bf16 %v2731_v15, %v2730_v10  ;;  %v2941_v10 = vld [vmem:[#allocation36 + $0x50] sm:$0xff]  ;;  %v2942_v15 = vld [vmem:[#allocation36 + $0x58] sm:$0xff] }
 0xab3   :  { %5820 = vmatprep.subr.bf16.mxu0 %v6913_v5 }
 0xb7f   :  { %v2278_v29 = vpop.f32.mrb[44].mxu0 }
 0xb80   :  { %v2279_v39 = vadd.f32 %v2278_v29, %v2202_v38  ;;  %v2280_v40 = vpop.f32.mrb[45].mxu0  ;;  %v2431_v29 = vld [vmem:[#allocation32 + $0x20] sm:$0xff] }
 0xb81   :  { %v2281_v3 = vadd.f32 %v2280_v40, %v2206_v2  ;;  %v5837_v2 = vpack.c.bf16 %v2608_v60, %v2607_v59  ;;  %v2827_v60 = vld [vmem:[#allocation42 + $0x60] sm:$0xff] }
 0xb82   :  { %6176 = vtanh.f32 %v2279_v39  ;;  %v4466_v0 = vmul.f32 -1.442695, %v2279_v39  ;;  %v2432_v39 = vld [vmem:[#allocation32 + $0x28] sm:$0xff] }
 0xb83   :  { %v4467_v8 = vmul.f32 -1.442695, %v2281_v3  ;;  %v5821_v40 = vpack.c.bf16 %v2432_v39, %v2431_v29  ;;  %v2732_v29 = vld [vmem:[#allocation39 + $0x30] sm:$0xff]  ;;  %v2733_v39 = vld [vmem:[#allocation39 + $0x38] sm:$0xff] }
 0xb84   :  { %6178 = vpow2.f32 %v4466_v0 }
 0xb85   :  { %6180 = vpow2.f32 %v4467_v8  ;;  %5822 = vmatpush3.bf16.msra.mxu0 %v5821_v40  ;;  %v2610_v8 = vld [vmem:[#allocation36 + $0x18] sm:$0xff]  ;;  %v5858_v40 = vpack.c.bf16 %v2733_v39, %v2732_v29  ;;  %v2943_v29 = vld [vmem:[#allocation36 + $0x60] sm:$0xff]  ;;  %v2944_v39 = vld [vmem:[#allocation36 + $0x68] sm:$0xff] }
 0xb86   :  { %5823 = vmatprep.subr.bf16.mxu0 %v6913_v5 }
 0xb89   :  { %5825 = vmatpush3.bf16.msra.mxu0 %v5824_v43  ;;  %v2817_v43 = vld [vmem:[#allocation42 + $0x10] sm:$0xff] }
 0xb8a   :  { %5836 = vmatprep.subr.bf16.mxu0 %v6913_v5 }
 0xb8c   :  { %v6177_v63 = vpop.eup %6176 }
 0xb8d   :  { %2297 = vrot.lane.b32.xlu1 %v6177_v63, %s6917_s1 }
 0xb8e   :  { %v6179_v9 = vpop.eup %6178 }
 0xb8f   :  { %v2286_v11 = vadd.f32 1.0, %v6179_v9  ;;  %v6181_v13 = vpop.eup %6180  ;;  %v5840_v9 = vpack.c.bf16 %v2610_v8, %v2609_v22 }
 0xb90   :  { %v2293_v56 = vadd.f32 1.0, %v6181_v13  ;;  %v2612_v13 = vld [vmem:[#allocation36 + $0x28] sm:$0xff] }
 0xb91   :  { %6182 = vrcp.f32 %v2286_v11  ;;  %v2611_v11 = vld [vmem:[#allocation36 + $0x20] sm:$0xff] }
 0xb92   :  { %6184 = vrcp.f32 %v2293_v56  ;;  %v5843_v56 = vpack.c.bf16 %v2612_v13, %v2611_v11  ;;  %v4480_v13 = vld [vmem:[%s7855_s25] ss:$0 sm:$0xff] }
 0xb9b   :  { %v6183_v14 = vpop.eup %6182 }
 0xb9c   :  { %v6185_v21 = vpop.eup %6184 }
 0xbff   :  { %v2298_v16 = vpop.permute.xlu1 %2297 }
 0xc00   :  { %v2300_v18 = vmul.f32 %v6183_v14, %v2298_v16  ;;  %v2613_v14 = vld [vmem:[#allocation36 + $0x30] sm:$0xff]  ;;  %v2614_v16 = vld [vmem:[#allocation36 + $0x38] sm:$0xff] }
 0xc01   :  { %v5846_v61 = vpack.c.bf16 %v2614_v16, %v2613_v14  ;;  %v2829_v16 = vld [vmem:[#allocation42 + $0x70] sm:$0xff] }
 0xc02   :  { %6186 = vtanh.f32 %v2300_v18  ;;  %v4474_v18 = vld [vmem:[#allocation35] ss:$0 sm:$0xff] }
 0xc0c   :  { %v6187_v23 = vpop.eup %6186 }
 0xc0d   :  { %v2302_v1 = vmul.f32 %v6187_v23, %v6185_v21 }
 0xc0f   :  { %4468 = vmatmul.mubr.msk.f32.vlgmr.msra.gmra.mrb[36].mxu1 %vm724_vm5, %v2302_v1 }
 0xc10   :  { %5828 = vmatpush3.bf16.msra.mxu1 %v5827_v25  ;;  %5227 = vmatprep.mubr.msk.f32.mxu1 %vm6914_vm0, %v6915_v6  ;;  %v4477_v25 = vld [vmem:[#allocation38] ss:$0 sm:$0xff] }
 0xc11   :  { %5829 = vmatprep.subr.bf16.mxu1 %v6913_v5 }
 0xc14   :  { %5831 = vmatpush3.bf16.msra.mxu1 %v5830_v27 }
 0xc15   :  { %5832 = vmatprep.subr.bf16.mxu1 %v6913_v5 }
 0xc18   :  { %5835 = vmatpush3.bf16.msk.msra.mxu1 %vm7344_vm3, %v5833_v31 }
 0xc19   :  { %5848 = vmatprep.subr.bf16.mxu1 %v6913_v5 }
 0xc1b   :  { %5228 = vmatmul.mubr.msk.f32.vlgmr.msra.gmra.mrb[38].mxu1 %vm536_vm4, %v6236_v32 }
 0xc1c   :  { %5265 = vmatprep.mubr.msk.f32.mxu1 %vm6914_vm0, %v6915_v6 }
 0xce2   :  { %v2402_v4 = vpop.f32.mrb[36].mxu1 }
 0xce3   :  { %v2403_v37 = vadd.f32 %v2402_v4, %v2326_v36  ;;  %v2404_v38 = vpop.f32.mrb[37].mxu1  ;;  %v5849_v36 = vpack.c.bf16 %v2727_v35, %v2726_v34  ;;  %v2728_v4 = vld [vmem:[#allocation39 + $0x10] sm:$0xff] }
 0xce4   :  { %v2405_v48 = vadd.f32 %v2404_v38, %v2330_v47  ;;  %v2820_v47 = vld [vmem:[#allocation42 + $0x28] sm:$0xff] }
 0xce5   :  { %6188 = vtanh.f32 %v2403_v37  ;;  %v4469_v46 = vmul.f32 -1.442695, %v2403_v37  ;;  %5850 = vmatpush3.bf16.msra.mxu1 %v5849_v36  ;;  %v2729_v37 = vld [vmem:[#allocation39 + $0x18] sm:$0xff] }
 0xce6   :  { %v4470_v50 = vmul.f32 -1.442695, %v2405_v48  ;;  %5851 = vmatprep.subr.bf16.mxu1 %v6913_v5  ;;  %v5852_v38 = vpack.c.bf16 %v2729_v37, %v2728_v4  ;;  %v2939_v4 = vld [vmem:[#allocation36 + $0x40] sm:$0xff]  ;;  %v2940_v37 = vld [vmem:[#allocation36 + $0x48] sm:$0xff] }
 0xce7   :  { %6190 = vpow2.f32 %v4469_v46  ;;  %v2819_v46 = vld [vmem:[#allocation42 + $0x20] sm:$0xff] }
 0xce8   :  { %6192 = vpow2.f32 %v4470_v50  ;;  %v5867_v48 = vpack.c.bf16 %v2820_v47, %v2819_v46  ;;  %v2821_v50 = vld [vmem:[#allocation42 + $0x30] sm:$0xff]  ;;  %v4484_v47 = vld [vmem:[%s7857_s14] ss:$0 sm:$0xff] }
 0xce9   :  { %5853 = vmatpush3.bf16.msra.mxu1 %v5852_v38  ;;  %v5885_v38 = vpack.c.bf16 %v2940_v37, %v2939_v4  ;;  %v3162_v37 = vld [vmem:[#allocation42 + $0xd0] sm:$0xff] }
 0xcea   :  { %5854 = vmatprep.subr.bf16.mxu1 %v6913_v5 }
 0xced   :  { %5856 = vmatpush3.bf16.msra.mxu1 %v5855_v20  ;;  %v5888_v20 = vpack.c.bf16 %v2942_v15, %v2941_v10  ;;  %v3164_v15 = vld [vmem:[#allocation42 + $0xe0] sm:$0xff] }
 0xcee   :  { %v2603_v44 = vpop.f32.mrb[38].mxu1  ;;  %5857 = vmatprep.subr.bf16.mxu1 %v6913_v5 }
 0xcef   :  { %v6189_v62 = vpop.eup %6188  ;;  %v5229_v45 = vpop.f32.mrb[39].mxu1  ;;  %v2604_v19 = vadd.f32 %v4474_v18, %v2603_v44  ;;  %v2818_v44 = vld [vmem:[#allocation42 + $0x18] sm:$0xff] }
 0xcf0   :  { %2421 = vrot.lane.b32.xlu1 %v6189_v62, %s6917_s1  ;;  %v5861_v62 = vpack.c.bf16 %v2816_v42, %v2815_v41  ;;  %v5864_v45 = vpack.c.bf16 %v2818_v44, %v2817_v43  ;;  %v2830_v18 = vld [vmem:[#allocation42 + $0x78] sm:$0xff]  ;;  %v2945_v41 = vld [vmem:[#allocation36 + $0x70] sm:$0xff]  ;;  %v2946_v42 = vld [vmem:[#allocation36 + $0x78] sm:$0xff] }
 0xcf1   :  { %v6191_v51 = vpop.eup %6190  ;;  %5859 = vmatpush3.bf16.msra.mxu1 %v5858_v40  ;;  %v5891_v40 = vpack.c.bf16 %v2944_v39, %v2943_v29  ;;  %v5894_v43 = vpack.c.bf16 %v2946_v42, %v2945_v41 }
 0xcf2   :  { %v2410_v52 = vadd.f32 1.0, %v6191_v51  ;;  %v6193_v28 = vpop.eup %6192  ;;  %5884 = vmatprep.subr.bf16.mxu1 %v6913_v5  ;;  %v2822_v51 = vld [vmem:[#allocation42 + $0x38] sm:$0xff] }
 0xcf3   :  { %v2417_v53 = vadd.f32 1.0, %v6193_v28  ;;  %v2823_v28 = vld [vmem:[#allocation42 + $0x40] sm:$0xff] }
 0xcf4   :  { %6194 = vrcp.f32 %v2410_v52  ;;  %v5870_v52 = vpack.c.bf16 %v2822_v51, %v2821_v50  ;;  %v4485_v50 = vld [vmem:[%s7858_s26] ss:$0 sm:$0xff] }
 0xcf5   :  { %6196 = vrcp.f32 %v2417_v53  ;;  %v2824_v53 = vld [vmem:[#allocation42 + $0x48] sm:$0xff] }
 0xcfe   :  { %v6195_v54 = vpop.eup %6194 }
 0xcff   :  { %v6197_v63 = vpop.eup %6196 }
 0xd62   :  { %v2422_v55 = vpop.permute.xlu1 %2421 }
 0xd63   :  { %v2424_v58 = vmul.f32 %v6195_v54, %v2422_v55  ;;  %v5873_v54 = vpack.c.bf16 %v2824_v53, %v2823_v28  ;;  %v2825_v55 = vld [vmem:[#allocation42 + $0x50] sm:$0xff]  ;;  %v4486_v28 = vld [vmem:[#allocation38 + $0x1] ss:$0 sm:$0xff] }
 0xd65   :  { %6198 = vtanh.f32 %v2424_v58  ;;  %v2826_v58 = vld [vmem:[#allocation42 + $0x58] sm:$0xff] }
 0xd66   :  { %v5876_v59 = vpack.c.bf16 %v2826_v58, %v2825_v55 }
 0xd6f   :  { %v6199_v0 = vpop.eup %6198 }
 0xd70   :  { %v2426_v3 = vmul.f32 %v6199_v0, %v6197_v63  ;;  %v2828_v63 = vld [vmem:[#allocation42 + $0x68] sm:$0xff] }
 0xd71   :  { %v5879_v0 = vpack.c.bf16 %v2828_v63, %v2827_v60 }
 0xd72   :  { %5213 = vmatmul.mubr.msk.f32.vlgmr.msra.gmra.mrb[46].mxu0 %vm724_vm5, %v2426_v3 }
 0xd73   :  { %5838 = vmatpush3.bf16.msra.mxu0 %v5837_v2  ;;  %5246 = vmatprep.mubr.msk.f32.mxu0 %vm6914_vm0, %v6915_v6 }
 0xd74   :  { %5839 = vmatprep.subr.bf16.mxu0 %v6913_v5 }
 0xd77   :  { %5841 = vmatpush3.bf16.msra.mxu0 %v5840_v9  ;;  %v4479_v9 = vld [vmem:[%s7854_s17] ss:$0 sm:$0xff] }
 0xd78   :  { %5842 = vmatprep.subr.bf16.mxu0 %v6913_v5 }
 0xd7b   :  { %5844 = vmatpush3.bf16.msra.mxu0 %v5843_v56 }
 0xd7c   :  { %5845 = vmatprep.subr.bf16.mxu0 %v6913_v5 }
 0xd7f   :  { %5847 = vmatpush3.bf16.msra.mxu0 %v5846_v61  ;;  %v5882_v61 = vpack.c.bf16 %v2830_v18, %v2829_v16  ;;  %v3066_v16 = vld [vmem:[#allocation39 + $0x68] sm:$0xff] }
 0xd80   :  { %5860 = vmatprep.subr.bf16.mxu0 %v6913_v5 }
 0xd82   :  { %5247 = vmatmul.mubr.msk.f32.vlgmr.msra.gmra.mrb[48].mxu0 %vm724_vm5, %v2604_v19 }
 0xd83   :  { %5300 = vmatprep.mubr.msk.f32.mxu0 %vm6914_vm0, %v6915_v6  ;;  %5862 = vmatpush3.bf16.msra.mxu0 %v5861_v62 }
 0xd84   :  { %5863 = vmatprep.subr.bf16.mxu0 %v6913_v5 }
 0xd87   :  { %5865 = vmatpush3.bf16.msra.mxu0 %v5864_v45 }
 0xd88   :  { %5866 = vmatprep.subr.bf16.mxu0 %v6913_v5 }
 0xd8b   :  { %5868 = vmatpush3.bf16.msra.mxu0 %v5867_v48 }
 0xd8c   :  { %5869 = vmatprep.subr.bf16.mxu0 %v6913_v5 }
 0xd8f   :  { %5871 = vmatpush3.bf16.msra.mxu0 %v5870_v52 }
 0xd90   :  { %5872 = vmatprep.subr.bf16.mxu0 %v6913_v5 }
 0xd93   :  { %5874 = vmatpush3.bf16.msra.mxu0 %v5873_v54 }
 0xd94   :  { %5875 = vmatprep.subr.bf16.mxu0 %v6913_v5 }
 0xd97   :  { %5877 = vmatpush3.bf16.msra.mxu0 %v5876_v59 }
 0xd98   :  { %5878 = vmatprep.subr.bf16.mxu0 %v6913_v5 }
 0xd9b   :  { %5880 = vmatpush3.bf16.msra.mxu0 %v5879_v0 }
 0xd9c   :  { %5881 = vmatprep.subr.bf16.mxu0 %v6913_v5 }
 0xd9f   :  { %5883 = vmatpush3.bf16.msra.mxu0 %v5882_v61  ;;  %v3067_v61 = vld [vmem:[#allocation39 + $0x70] sm:$0xff] }
 0xda0   :  { %5908 = vmatprep.subr.bf16.mxu0 %v6913_v5 }
 0xe45   :  { %v7589_v21 = vpop.f32.mrb[46].mxu0 }
 0xe46   :  { %v5214_v23 = vpop.f32.mrb[47].mxu0 }
 0xe55   :  { %v2691_v1 = vpop.f32.mrb[48].mxu0 }
 0xe56   :  { %v2692_v26 = vadd.f32 %v4477_v25, %v2691_v1  ;;  %v5248_v7 = vpop.f32.mrb[49].mxu0 }
 0xe57   :  { %v4483_v7 = vld [vmem:[%s7856_s8] ss:$0 sm:$0xff] }
 0xe58   :  { %v2695_v27 = vadd.f32 %v2692_v26, %v2604_v19  ;;  %v4481_v19 = vld [vmem:[#allocation41] ss:$0 sm:$0xff] }
 0xe5a   :  { %v2698_v30 = vsel %vm724_vm5, %v2695_v27, 0.0 }
 0xe5b   :  { %2699 = vadd.xlane.f32.xlu0 %v2698_v30 }
 0xee8   :  { %v2700_v12 = vpop.xlane.xlu0 %2699 }
 0xee9   :  { %v2702_v31 = vmul.f32 0.015625, %v2700_v12 }
 0xeeb   :  { %v7592_v32 = vsub.f32 %v2695_v27, %v2702_v31 }
 0xeed   :  { %v2704_v17 = vmul.f32 %v7592_v32, %v7592_v32 }
 0xeef   :  { %v2705_v33 = vsel %vm724_vm5, %v2704_v17, 0.0 }
 0xef0   :  { %2706 = vadd.xlane.f32.xlu1 %v2705_v33 }
 0xf7d   :  { %v2707_v2 = vpop.xlane.xlu1 %2706 }
 0xf7e   :  { %v2708_v3 = vmul.f32 0.015625, %v2707_v2 }
 0xf80   :  { %v2709_v22 = vadd.f32 1e-05, %v2708_v3 }
 0xf82   :  { %6200 = vrsqrt.f32 %v2709_v22  ;;  %v3061_v22 = vld [vmem:[#allocation39 + $0x40] sm:$0xff] }
 0xf8c   :  { %v6201_v8 = vpop.eup %6200 }
 0xf8d   :  { %v2711_v11 = vmul.f32 %v6201_v8, %v7592_v32  ;;  %v3062_v8 = vld [vmem:[#allocation39 + $0x48] sm:$0xff] }
 0xf8f   :  { %v2718_v56 = vmul.f32 %v4479_v9, %v2711_v11  ;;  %v5897_v9 = vpack.c.bf16 %v3062_v8, %v3061_v22  ;;  %v3063_v11 = vld [vmem:[#allocation39 + $0x50] sm:$0xff] }
 0xf91   :  { %v2725_v14 = vadd.f32 %v4480_v13, %v2718_v56  ;;  %v3064_v13 = vld [vmem:[#allocation39 + $0x58] sm:$0xff] }
 0xf92   :  { %v5900_v56 = vpack.c.bf16 %v3064_v13, %v3063_v11  ;;  %v3279_v11 = vld [vmem:[#allocation36 + $0x80] sm:$0xff]  ;;  %v3280_v13 = vld [vmem:[#allocation36 + $0x88] sm:$0xff] }
 0xf93   :  { %5266 = vmatmul.mubr.msk.f32.vlgmr.msra.gmra.mrb[40].mxu1 %vm724_vm5, %v2725_v14 }
 0xf94   :  { %5319 = vmatprep.mubr.msk.f32.mxu1 %vm6914_vm0, %v6915_v6  ;;  %5886 = vmatpush3.bf16.msra.mxu1 %v5885_v38  ;;  %v3163_v38 = vld [vmem:[#allocation42 + $0xd8] sm:$0xff] }
 0xf95   :  { %5887 = vmatprep.subr.bf16.mxu1 %v6913_v5  ;;  %v5924_v10 = vpack.c.bf16 %v3163_v38, %v3162_v37 }
 0xf98   :  { %5889 = vmatpush3.bf16.msra.mxu1 %v5888_v20  ;;  %v3165_v20 = vld [vmem:[#allocation42 + $0xe8] sm:$0xff] }
 0xf99   :  { %5890 = vmatprep.subr.bf16.mxu1 %v6913_v5  ;;  %v5927_v29 = vpack.c.bf16 %v3165_v20, %v3164_v15 }
 0xf9c   :  { %5892 = vmatpush3.bf16.msra.mxu1 %v5891_v40 }
 0xf9d   :  { %5893 = vmatprep.subr.bf16.mxu1 %v6913_v5 }
 0xfa0   :  { %5895 = vmatpush3.bf16.msra.mxu1 %v5894_v43  ;;  %v4490_v43 = vld [vmem:[%s7854_s17 + $0x1] ss:$0 sm:$0xff] }
 0xfa1   :  { %5896 = vmatprep.subr.bf16.mxu1 %v6913_v5 }
0x1066   :  { %v2810_v23 = vpop.f32.mrb[40].mxu1 }
0x1067   :  { %v2811_v25 = vadd.f32 %v4481_v19, %v2810_v23  ;;  %v5267_v1 = vpop.f32.mrb[41].mxu1  ;;  %v3068_v19 = vld [vmem:[#allocation39 + $0x78] sm:$0xff] }
0x1068   :  { %v5906_v23 = vpack.c.bf16 %v3068_v19, %v3067_v61  ;;  %v3153_v1 = vld [vmem:[#allocation42 + $0x88] sm:$0xff]  ;;  %v3283_v61 = vld [vmem:[#allocation36 + $0xa0] sm:$0xff]  ;;  %v3284_v19 = vld [vmem:[#allocation36 + $0xa8] sm:$0xff] }
0x1069   :  { %v2814_v26 = vmax.f32 %v2811_v25, 0.0  ;;  %v3152_v25 = vld [vmem:[#allocation42 + $0x80] sm:$0xff] }
0x106b   :  { %5301 = vmatmul.mubr.f32.vlgmr.msra.gmra.mrb[50].mxu0 %v2814_v26  ;;  %v3154_v26 = vld [vmem:[#allocation42 + $0x90] sm:$0xff] }
0x106c   :  { %5373 = vmatprep.mubr.msk.f32.mxu0 %vm6914_vm0, %v6915_v6 }
0x113e   :  { %v2904_v27 = vpop.f32.mrb[50].mxu0 }
0x113f   :  { %v2905_v30 = vadd.f32 %v4483_v7, %v2904_v27  ;;  %v5302_v12 = vpop.f32.mrb[51].mxu0  ;;  %v5909_v7 = vpack.c.bf16 %v3153_v1, %v3152_v25  ;;  %v3155_v27 = vld [vmem:[#allocation42 + $0x98] sm:$0xff]  ;;  %v3285_v25 = vld [vmem:[#allocation36 + $0xb0] sm:$0xff]  ;;  %v3286_v1 = vld [vmem:[#allocation36 + $0xb8] sm:$0xff] }
0x1140   :  { %v3156_v12 = vld [vmem:[#allocation42 + $0xa0] sm:$0xff] }
0x1141   :  { %v2908_v31 = vadd.f32 %v2905_v30, %v2725_v14  ;;  %v3065_v14 = vld [vmem:[#allocation39 + $0x60] sm:$0xff]  ;;  %5910 = vmatpush3.bf16.msra.mxu0 %v5909_v7  ;;  %v5912_v30 = vpack.c.bf16 %v3155_v27, %v3154_v26  ;;  %v5942_v26 = vpack.c.bf16 %v3286_v1, %v3285_v25 }
0x1142   :  { %v5903_v18 = vpack.c.bf16 %v3066_v16, %v3065_v14  ;;  %5911 = vmatprep.subr.bf16.mxu0 %v6913_v5  ;;  %v3281_v14 = vld [vmem:[#allocation36 + $0x90] sm:$0xff]  ;;  %v3282_v16 = vld [vmem:[#allocation36 + $0x98] sm:$0xff] }
0x1143   :  { %v2911_v32 = vsel %vm724_vm5, %v2908_v31, 0.0 }
0x1144   :  { %2912 = vadd.xlane.f32.xlu0 %v2911_v32 }
0x1145   :  { %5913 = vmatpush3.bf16.msra.mxu0 %v5912_v30 }
0x1146   :  { %5914 = vmatprep.subr.bf16.mxu0 %v6913_v5 }
0x11d1   :  { %v2913_v17 = vpop.xlane.xlu0 %2912 }
0x11d2   :  { %v2914_v33 = vmul.f32 0.015625, %v2913_v17  ;;  %v3158_v17 = vld [vmem:[#allocation42 + $0xb0] sm:$0xff] }
0x11d4   :  { %v2915_v34 = vsub.f32 %v2908_v31, %v2914_v33  ;;  %v3157_v31 = vld [vmem:[#allocation42 + $0xa8] sm:$0xff]  ;;  %v3159_v33 = vld [vmem:[#allocation42 + $0xb8] sm:$0xff] }
0x11d5   :  { %v5915_v32 = vpack.c.bf16 %v3157_v31, %v3156_v12  ;;  %v4498_v31 = vld [vmem:[%s7857_s14 + $0x1] ss:$0 sm:$0xff] }
0x11d6   :  { %v2916_v35 = vmul.f32 %v2915_v34, %v2915_v34 }
0x11d7   :  { %5916 = vmatpush3.bf16.msra.mxu0 %v5915_v32 }
0x11d8   :  { %v2917_v36 = vsel %vm724_vm5, %v2916_v35, 0.0  ;;  %5917 = vmatprep.subr.bf16.mxu0 %v6913_v5  ;;  %v3160_v35 = vld [vmem:[#allocation42 + $0xc0] sm:$0xff] }
0x11d9   :  { %2918 = vadd.xlane.f32.xlu0 %v2917_v36  ;;  %v3161_v36 = vld [vmem:[#allocation42 + $0xc8] sm:$0xff] }
0x11da   :  { %v5921_v4 = vpack.c.bf16 %v3161_v36, %v3160_v35  ;;  %v4500_v35 = vld [vmem:[#allocation38 + $0x2] ss:$0 sm:$0xff] }
0x1266   :  { %v2919_v62 = vpop.xlane.xlu0 %2918 }
0x1267   :  { %v2920_v44 = vmul.f32 0.015625, %v2919_v62 }
0x1269   :  { %v2921_v45 = vadd.f32 1e-05, %v2920_v44  ;;  %v4491_v44 = vld [vmem:[%s7855_s25 + $0x1] ss:$0 sm:$0xff] }
0x126b   :  { %6202 = vrsqrt.f32 %v2921_v45 }
0x1275   :  { %v6203_v46 = vpop.eup %6202 }
0x1276   :  { %v2923_v48 = vmul.f32 %v6203_v46, %v2915_v34  ;;  %v5918_v34 = vpack.c.bf16 %v3159_v33, %v3158_v17  ;;  %v4499_v17 = vld [vmem:[%s7858_s26 + $0x1] ss:$0 sm:$0xff] }
0x1278   :  { %v2930_v51 = vmul.f32 %v4484_v47, %v2923_v48  ;;  %5919 = vmatpush3.bf16.msra.mxu0 %v5918_v34  ;;  %v3166_v47 = vld [vmem:[#allocation42 + $0xf0] sm:$0xff]  ;;  %v3167_v48 = vld [vmem:[#allocation42 + $0xf8] sm:$0xff] }
0x1279   :  { %5920 = vmatprep.subr.bf16.mxu0 %v6913_v5 }
0x127a   :  { %v2937_v52 = vadd.f32 %v4485_v50, %v2930_v51  ;;  %v5930_v50 = vpack.c.bf16 %v3167_v48, %v3166_v47  ;;  %v4492_v51 = vld [vmem:[#allocation41 + $0x1] ss:$0 sm:$0xff]  ;;  %v3406_v47 = vld [vmem:[#allocation39 + $0xa8] sm:$0xff] }
0x127c   :  { %5320 = vmatmul.mubr.msk.f32.vlgmr.msra.gmra.mrb[42].mxu1 %vm724_vm5, %v2937_v52  ;;  %5922 = vmatpush3.bf16.msra.mxu0 %v5921_v4 }
0x127d   :  { %5338 = vmatprep.mubr.msk.f32.mxu1 %vm6914_vm0, %v6915_v6  ;;  %5898 = vmatpush3.bf16.msra.mxu1 %v5897_v9 }
0x127e   :  { %5899 = vmatprep.subr.bf16.mxu1 %v6913_v5  ;;  %5923 = vmatprep.subr.bf16.mxu0 %v6913_v5 }
0x1280   :  { %5925 = vmatpush3.bf16.msra.mxu0 %v5924_v10 }
0x1281   :  { %5901 = vmatpush3.bf16.msra.mxu1 %v5900_v56  ;;  %5926 = vmatprep.subr.bf16.mxu0 %v6913_v5  ;;  %v5933_v56 = vpack.c.bf16 %v3280_v13, %v3279_v11  ;;  %v3502_v13 = vld [vmem:[#allocation42 + $0x150] sm:$0xff] }
0x1282   :  { %5902 = vmatprep.subr.bf16.mxu1 %v6913_v5 }
0x1284   :  { %5928 = vmatpush3.bf16.msra.mxu0 %v5927_v29 }
0x1285   :  { %5904 = vmatpush3.bf16.msra.mxu1 %v5903_v18  ;;  %5929 = vmatprep.subr.bf16.mxu0 %v6913_v5  ;;  %v5936_v18 = vpack.c.bf16 %v3282_v16, %v3281_v14  ;;  %v3504_v16 = vld [vmem:[#allocation42 + $0x160] sm:$0xff] }
0x1286   :  { %5905 = vmatprep.subr.bf16.mxu1 %v6913_v5 }
0x1288   :  { %5931 = vmatpush3.bf16.msra.mxu0 %v5930_v50  ;;  %v3407_v50 = vld [vmem:[#allocation39 + $0xb0] sm:$0xff] }
0x1289   :  { %5907 = vmatpush3.bf16.msra.mxu1 %v5906_v23  ;;  %5956 = vmatprep.subr.bf16.mxu0 %v6913_v5  ;;  %v5939_v23 = vpack.c.bf16 %v3284_v19, %v3283_v61 }
0x128a   :  { %5932 = vmatprep.subr.bf16.mxu1 %v6913_v5 }
0x134f   :  { %v3024_v53 = vpop.f32.mrb[42].mxu1 }
0x1350   :  { %v3025_v54 = vadd.f32 %v4486_v28, %v3024_v53  ;;  %v5321_v55 = vpop.f32.mrb[43].mxu1 }
0x1351   :  { %v4495_v55 = vld [vmem:[%s7856_s8 + $0x1] ss:$0 sm:$0xff] }
0x1352   :  { %v3028_v58 = vadd.f32 %v3025_v54, %v2937_v52 }
0x1354   :  { %v3033_v59 = vsel %vm724_vm5, %v3028_v58, 0.0 }
0x1355   :  { %3034 = vadd.xlane.f32.xlu1 %v3033_v59 }
0x13e2   :  { %v3035_v60 = vpop.xlane.xlu1 %3034 }
0x13e3   :  { %v3036_v63 = vmul.f32 0.015625, %v3035_v60 }
0x13e5   :  { %v7630_v0 = vsub.f32 %v3028_v58, %v3036_v63 }
0x13e7   :  { %v3038_v2 = vmul.f32 %v7630_v0, %v7630_v0 }
0x13e9   :  { %v3039_v3 = vsel %vm724_vm5, %v3038_v2, 0.0 }
0x13ea   :  { %3040 = vadd.xlane.f32.xlu0 %v3039_v3 }
0x1477   :  { %v3041_v39 = vpop.xlane.xlu0 %3040 }
0x1478   :  { %v3042_v40 = vmul.f32 0.015625, %v3041_v39 }
0x147a   :  { %v3043_v41 = vadd.f32 1e-05, %v3042_v40 }
0x147c   :  { %6204 = vrsqrt.f32 %v3043_v41  ;;  %v3401_v41 = vld [vmem:[#allocation39 + $0x80] sm:$0xff] }
0x1486   :  { %v6205_v42 = vpop.eup %6204 }
0x1487   :  { %v3045_v62 = vmul.f32 %v6205_v42, %v7630_v0  ;;  %v3402_v42 = vld [vmem:[#allocation39 + $0x88] sm:$0xff] }
0x1489   :  { %v3052_v45 = vmul.f32 %v4490_v43, %v3045_v62  ;;  %v5945_v43 = vpack.c.bf16 %v3402_v42, %v3401_v41  ;;  %v3403_v62 = vld [vmem:[#allocation39 + $0x90] sm:$0xff] }
0x148b   :  { %v3059_v46 = vadd.f32 %v4491_v44, %v3052_v45  ;;  %v3404_v44 = vld [vmem:[#allocation39 + $0x98] sm:$0xff] }
0x148c   :  { %v5948_v45 = vpack.c.bf16 %v3404_v44, %v3403_v62  ;;  %v3619_v62 = vld [vmem:[#allocation36 + $0xc0] sm:$0xff]  ;;  %v3620_v44 = vld [vmem:[#allocation36 + $0xc8] sm:$0xff] }
0x148d   :  { %5339 = vmatmul.mubr.msk.f32.vlgmr.msra.gmra.mrb[44].mxu1 %vm724_vm5, %v3059_v46 }
0x148e   :  { %5392 = vmatprep.mubr.msk.f32.mxu1 %vm6914_vm0, %v6915_v6  ;;  %5934 = vmatpush3.bf16.msra.mxu1 %v5933_v56  ;;  %v3503_v56 = vld [vmem:[#allocation42 + $0x158] sm:$0xff] }
0x148f   :  { %5935 = vmatprep.subr.bf16.mxu1 %v6913_v5  ;;  %v5972_v14 = vpack.c.bf16 %v3503_v56, %v3502_v13 }
0x1492   :  { %5937 = vmatpush3.bf16.msra.mxu1 %v5936_v18  ;;  %v3505_v18 = vld [vmem:[#allocation42 + $0x168] sm:$0xff] }
0x1493   :  { %5938 = vmatprep.subr.bf16.mxu1 %v6913_v5  ;;  %v5975_v61 = vpack.c.bf16 %v3505_v18, %v3504_v16 }
0x1496   :  { %5940 = vmatpush3.bf16.msra.mxu1 %v5939_v23 }
0x1497   :  { %5941 = vmatprep.subr.bf16.mxu1 %v6913_v5 }
0x149a   :  { %5943 = vmatpush3.bf16.msra.mxu1 %v5942_v26  ;;  %v4504_v26 = vld [vmem:[%s7854_s17 + $0x2] ss:$0 sm:$0xff] }
0x149b   :  { %5944 = vmatprep.subr.bf16.mxu1 %v6913_v5 }
0x1560   :  { %v3146_v52 = vpop.f32.mrb[44].mxu1 }
0x1561   :  { %v3147_v28 = vadd.f32 %v4492_v51, %v3146_v52  ;;  %v5340_v53 = vpop.f32.mrb[45].mxu1  ;;  %v3408_v51 = vld [vmem:[#allocation39 + $0xb8] sm:$0xff] }
0x1562   :  { %v5954_v52 = vpack.c.bf16 %v3408_v51, %v3407_v50  ;;  %v3493_v53 = vld [vmem:[#allocation42 + $0x108] sm:$0xff]  ;;  %v3623_v50 = vld [vmem:[#allocation36 + $0xe0] sm:$0xff]  ;;  %v3624_v51 = vld [vmem:[#allocation36 + $0xe8] sm:$0xff] }
0x1563   :  { %v3150_v54 = vmax.f32 %v3147_v28, 0.0  ;;  %v3492_v28 = vld [vmem:[#allocation42 + $0x100] sm:$0xff] }
0x1565   :  { %5374 = vmatmul.mubr.f32.vlgmr.msra.gmra.mrb[52].mxu0 %v3150_v54  ;;  %v3494_v54 = vld [vmem:[#allocation42 + $0x110] sm:$0xff] }
0x1566   :  { %5446 = vmatprep.mubr.msk.f32.mxu0 %vm6914_vm0, %v6915_v6 }
0x1638   :  { %v3242_v58 = vpop.f32.mrb[52].mxu0 }
0x1639   :  { %v3243_v59 = vadd.f32 %v4495_v55, %v3242_v58  ;;  %v5375_v60 = vpop.f32.mrb[53].mxu0  ;;  %v5957_v55 = vpack.c.bf16 %v3493_v53, %v3492_v28  ;;  %v3495_v58 = vld [vmem:[#allocation42 + $0x118] sm:$0xff]  ;;  %v3625_v28 = vld [vmem:[#allocation36 + $0xf0] sm:$0xff]  ;;  %v3626_v53 = vld [vmem:[#allocation36 + $0xf8] sm:$0xff] }
0x163a   :  { %v3496_v60 = vld [vmem:[#allocation42 + $0x120] sm:$0xff] }
0x163b   :  { %v3246_v63 = vadd.f32 %v3243_v59, %v3059_v46  ;;  %v3405_v46 = vld [vmem:[#allocation39 + $0xa0] sm:$0xff]  ;;  %5958 = vmatpush3.bf16.msra.mxu0 %v5957_v55  ;;  %v5960_v59 = vpack.c.bf16 %v3495_v58, %v3494_v54  ;;  %v5990_v54 = vpack.c.bf16 %v3626_v53, %v3625_v28 }
0x163c   :  { %v5951_v48 = vpack.c.bf16 %v3406_v47, %v3405_v46  ;;  %5959 = vmatprep.subr.bf16.mxu0 %v6913_v5  ;;  %v3621_v46 = vld [vmem:[#allocation36 + $0xd0] sm:$0xff]  ;;  %v3622_v47 = vld [vmem:[#allocation36 + $0xd8] sm:$0xff] }
0x163d   :  { %v3251_v0 = vsel %vm724_vm5, %v3246_v63, 0.0 }
0x163e   :  { %3252 = vadd.xlane.f32.xlu1 %v3251_v0 }
0x163f   :  { %5961 = vmatpush3.bf16.msra.mxu0 %v5960_v59 }
0x1640   :  { %5962 = vmatprep.subr.bf16.mxu0 %v6913_v5 }
0x16cb   :  { %v3253_v2 = vpop.xlane.xlu1 %3252 }
0x16cc   :  { %v3254_v3 = vmul.f32 0.015625, %v3253_v2  ;;  %v3498_v2 = vld [vmem:[#allocation42 + $0x130] sm:$0xff] }
0x16ce   :  { %v3255_v22 = vsub.f32 %v3246_v63, %v3254_v3  ;;  %v3497_v63 = vld [vmem:[#allocation42 + $0x128] sm:$0xff]  ;;  %v3499_v3 = vld [vmem:[#allocation42 + $0x138] sm:$0xff] }
0x16cf   :  { %v5963_v0 = vpack.c.bf16 %v3497_v63, %v3496_v60  ;;  %v4512_v63 = vld [vmem:[%s7857_s14 + $0x2] ss:$0 sm:$0xff] }
0x16d0   :  { %v3256_v8 = vmul.f32 %v3255_v22, %v3255_v22 }
0x16d1   :  { %5964 = vmatpush3.bf16.msra.mxu0 %v5963_v0 }
0x16d2   :  { %v3257_v9 = vsel %vm724_vm5, %v3256_v8, 0.0  ;;  %5965 = vmatprep.subr.bf16.mxu0 %v6913_v5  ;;  %v3500_v8 = vld [vmem:[#allocation42 + $0x140] sm:$0xff] }
0x16d3   :  { %3258 = vadd.xlane.f32.xlu0 %v3257_v9  ;;  %v3501_v9 = vld [vmem:[#allocation42 + $0x148] sm:$0xff] }
0x16d4   :  { %v5969_v11 = vpack.c.bf16 %v3501_v9, %v3500_v8  ;;  %v4514_v8 = vld [vmem:[#allocation38 + $0x3] ss:$0 sm:$0xff] }
0x1760   :  { %v3259_v7 = vpop.xlane.xlu0 %3258 }
0x1761   :  { %v3260_v27 = vmul.f32 0.015625, %v3259_v7 }
0x1763   :  { %v3261_v30 = vadd.f32 1e-05, %v3260_v27  ;;  %v4505_v27 = vld [vmem:[%s7855_s25 + $0x2] ss:$0 sm:$0xff] }
0x1765   :  { %6206 = vrsqrt.f32 %v3261_v30 }
0x176f   :  { %v6207_v12 = vpop.eup %6206 }
0x1770   :  { %v3263_v32 = vmul.f32 %v6207_v12, %v3255_v22  ;;  %v5966_v22 = vpack.c.bf16 %v3499_v3, %v3498_v2  ;;  %v4513_v2 = vld [vmem:[%s7858_s26 + $0x2] ss:$0 sm:$0xff] }
0x1772   :  { %v3270_v33 = vmul.f32 %v4498_v31, %v3263_v32  ;;  %5967 = vmatpush3.bf16.msra.mxu0 %v5966_v22  ;;  %v3506_v31 = vld [vmem:[#allocation42 + $0x170] sm:$0xff]  ;;  %v3507_v32 = vld [vmem:[#allocation42 + $0x178] sm:$0xff] }
0x1773   :  { %5968 = vmatprep.subr.bf16.mxu0 %v6913_v5 }
0x1774   :  { %v3277_v34 = vadd.f32 %v4499_v17, %v3270_v33  ;;  %v5978_v17 = vpack.c.bf16 %v3507_v32, %v3506_v31  ;;  %v4506_v33 = vld [vmem:[#allocation41 + $0x2] ss:$0 sm:$0xff]  ;;  %v3746_v31 = vld [vmem:[#allocation39 + $0xe8] sm:$0xff] }
0x1776   :  { %5393 = vmatmul.mubr.msk.f32.vlgmr.msra.gmra.mrb[46].mxu1 %vm724_vm5, %v3277_v34  ;;  %5970 = vmatpush3.bf16.msra.mxu0 %v5969_v11 }
0x1777   :  { %5411 = vmatprep.mubr.msk.f32.mxu1 %vm6914_vm0, %v6915_v6  ;;  %5946 = vmatpush3.bf16.msra.mxu1 %v5945_v43 }
0x1778   :  { %5947 = vmatprep.subr.bf16.mxu1 %v6913_v5  ;;  %5971 = vmatprep.subr.bf16.mxu0 %v6913_v5 }
0x177a   :  { %5973 = vmatpush3.bf16.msra.mxu0 %v5972_v14 }
0x177b   :  { %5949 = vmatpush3.bf16.msra.mxu1 %v5948_v45  ;;  %5974 = vmatprep.subr.bf16.mxu0 %v6913_v5  ;;  %v5981_v45 = vpack.c.bf16 %v3620_v44, %v3619_v62  ;;  %v3842_v44 = vld [vmem:[#allocation42 + $0x1d0] sm:$0xff] }
0x177c   :  { %5950 = vmatprep.subr.bf16.mxu1 %v6913_v5 }
0x177e   :  { %5976 = vmatpush3.bf16.msra.mxu0 %v5975_v61 }
0x177f   :  { %5952 = vmatpush3.bf16.msra.mxu1 %v5951_v48  ;;  %5977 = vmatprep.subr.bf16.mxu0 %v6913_v5  ;;  %v5984_v48 = vpack.c.bf16 %v3622_v47, %v3621_v46  ;;  %v3844_v47 = vld [vmem:[#allocation42 + $0x1e0] sm:$0xff] }
0x1780   :  { %5953 = vmatprep.subr.bf16.mxu1 %v6913_v5 }
0x1782   :  { %5979 = vmatpush3.bf16.msra.mxu0 %v5978_v17  ;;  %v3747_v17 = vld [vmem:[#allocation39 + $0xf0] sm:$0xff] }
0x1783   :  { %5955 = vmatpush3.bf16.msra.mxu1 %v5954_v52  ;;  %6004 = vmatprep.subr.bf16.mxu0 %v6913_v5  ;;  %v5987_v52 = vpack.c.bf16 %v3624_v51, %v3623_v50 }
0x1784   :  { %5980 = vmatprep.subr.bf16.mxu1 %v6913_v5 }
0x1849   :  { %v3364_v36 = vpop.f32.mrb[46].mxu1 }
0x184a   :  { %v3365_v4 = vadd.f32 %v4500_v35, %v3364_v36  ;;  %v5394_v37 = vpop.f32.mrb[47].mxu1 }
0x184b   :  { %v4509_v37 = vld [vmem:[%s7856_s8 + $0x2] ss:$0 sm:$0xff] }
0x184c   :  { %v3368_v38 = vadd.f32 %v3365_v4, %v3277_v34 }
0x184e   :  { %v3373_v10 = vsel %vm724_vm5, %v3368_v38, 0.0 }
0x184f   :  { %3374 = vadd.xlane.f32.xlu1 %v3373_v10 }
0x18dc   :  { %v3375_v15 = vpop.xlane.xlu1 %3374 }
0x18dd   :  { %v3376_v20 = vmul.f32 0.015625, %v3375_v15 }
0x18df   :  { %v7668_v29 = vsub.f32 %v3368_v38, %v3376_v20 }
0x18e1   :  { %v3378_v39 = vmul.f32 %v7668_v29, %v7668_v29 }
0x18e3   :  { %v3379_v40 = vsel %vm724_vm5, %v3378_v39, 0.0 }
0x18e4   :  { %3380 = vadd.xlane.f32.xlu0 %v3379_v40 }
0x1971   :  { %v3381_v19 = vpop.xlane.xlu0 %3380 }
0x1972   :  { %v3382_v23 = vmul.f32 0.015625, %v3381_v19 }
0x1974   :  { %v3383_v25 = vadd.f32 1e-05, %v3382_v23 }
0x1976   :  { %6208 = vrsqrt.f32 %v3383_v25  ;;  %v3741_v25 = vld [vmem:[#allocation39 + $0xc0] sm:$0xff] }
0x1980   :  { %v6209_v1 = vpop.eup %6208 }
0x1981   :  { %v3385_v7 = vmul.f32 %v6209_v1, %v7668_v29  ;;  %v3742_v1 = vld [vmem:[#allocation39 + $0xc8] sm:$0xff] }
0x1983   :  { %v3392_v30 = vmul.f32 %v4504_v26, %v3385_v7  ;;  %v5993_v26 = vpack.c.bf16 %v3742_v1, %v3741_v25  ;;  %v3743_v7 = vld [vmem:[#allocation39 + $0xd0] sm:$0xff]  ;;  %v4453_v25 = vld [vmem:[#allocation3] ss:$0 sm:$0xff] }
0x1985   :  { %v3399_v12 = vadd.f32 %v4505_v27, %v3392_v30  ;;  %v3744_v27 = vld [vmem:[#allocation39 + $0xd8] sm:$0xff] }
0x1986   :  { %v5996_v30 = vpack.c.bf16 %v3744_v27, %v3743_v7 }
0x1987   :  { %5412 = vmatmul.mubr.msk.f32.vlgmr.msra.gmra.mrb[48].mxu1 %vm724_vm5, %v3399_v12 }
0x1988   :  { %5465 = vmatprep.mubr.msk.f32.mxu1 %vm6914_vm0, %v6915_v6  ;;  %5982 = vmatpush3.bf16.msra.mxu1 %v5981_v45  ;;  %v3843_v45 = vld [vmem:[#allocation42 + $0x1d8] sm:$0xff] }
0x1989   :  { %5983 = vmatprep.subr.bf16.mxu1 %v6913_v5  ;;  %v6020_v46 = vpack.c.bf16 %v3843_v45, %v3842_v44  ;;  %v3964_v44 = vld [vmem:[#allocation44 + $0x30] sm:$0xff]  ;;  %v3965_v45 = vld [vmem:[#allocation44 + $0x38] sm:$0xff] }
0x198c   :  { %5985 = vmatpush3.bf16.msra.mxu1 %v5984_v48  ;;  %v3845_v48 = vld [vmem:[#allocation42 + $0x1e8] sm:$0xff] }
0x198d   :  { %5986 = vmatprep.subr.bf16.mxu1 %v6913_v5  ;;  %v6023_v50 = vpack.c.bf16 %v3845_v48, %v3844_v47  ;;  %v4471_v47 = vld [vmem:[#allocation4] ss:$0 sm:$0xff] }
0x198e   :  { %v2512_v48 = vadd.f32 %v4471_v47, %v7589_v21 }
0x1990   :  { %5988 = vmatpush3.bf16.msra.mxu1 %v5987_v52 }
0x1991   :  { %5989 = vmatprep.subr.bf16.mxu1 %v6913_v5 }
0x1994   :  { %5991 = vmatpush3.bf16.msra.mxu1 %v5990_v54  ;;  %v4518_v54 = vld [vmem:[%s7854_s17 + $0x3] ss:$0 sm:$0xff] }
0x1995   :  { %5992 = vmatprep.subr.bf16.mxu1 %v6913_v5 }
0x1a5a   :  { %v3486_v34 = vpop.f32.mrb[48].mxu1 }
0x1a5b   :  { %v3487_v35 = vadd.f32 %v4506_v33, %v3486_v34  ;;  %v5413_v36 = vpop.f32.mrb[49].mxu1  ;;  %v3748_v33 = vld [vmem:[#allocation39 + $0xf8] sm:$0xff] }
0x1a5c   :  { %v6002_v34 = vpack.c.bf16 %v3748_v33, %v3747_v17  ;;  %v3833_v36 = vld [vmem:[#allocation42 + $0x188] sm:$0xff] }
0x1a5d   :  { %v3490_v4 = vmax.f32 %v3487_v35, 0.0  ;;  %v3832_v35 = vld [vmem:[#allocation42 + $0x180] sm:$0xff] }
0x1a5f   :  { %5447 = vmatmul.mubr.f32.vlgmr.msra.gmra.mrb[54].mxu0 %v3490_v4  ;;  %v3834_v4 = vld [vmem:[#allocation42 + $0x190] sm:$0xff] }
0x1a60   :  { %5519 = vmatprep.mubr.msk.f32.mxu0 %vm6914_vm0, %v6915_v6 }
0x1b32   :  { %v3582_v38 = vpop.f32.mrb[54].mxu0 }
0x1b33   :  { %v3583_v10 = vadd.f32 %v4509_v37, %v3582_v38  ;;  %v5448_v15 = vpop.f32.mrb[55].mxu0  ;;  %v6005_v37 = vpack.c.bf16 %v3833_v36, %v3832_v35  ;;  %v3835_v38 = vld [vmem:[#allocation42 + $0x198] sm:$0xff] }
0x1b34   :  { %v3836_v15 = vld [vmem:[#allocation42 + $0x1a0] sm:$0xff] }
0x1b35   :  { %v3586_v20 = vadd.f32 %v3583_v10, %v3399_v12  ;;  %v3745_v12 = vld [vmem:[#allocation39 + $0xe0] sm:$0xff]  ;;  %6006 = vmatpush3.bf16.msra.mxu0 %v6005_v37  ;;  %v6008_v10 = vpack.c.bf16 %v3835_v38, %v3834_v4 }
0x1b36   :  { %v5999_v32 = vpack.c.bf16 %v3746_v31, %v3745_v12  ;;  %6007 = vmatprep.subr.bf16.mxu0 %v6913_v5 }
0x1b37   :  { %v3591_v29 = vsel %vm724_vm5, %v3586_v20, 0.0 }
0x1b38   :  { %3592 = vadd.xlane.f32.xlu1 %v3591_v29 }
0x1b39   :  { %6009 = vmatpush3.bf16.msra.mxu0 %v6008_v10 }
0x1b3a   :  { %6010 = vmatprep.subr.bf16.mxu0 %v6913_v5 }
0x1bc5   :  { %v3593_v39 = vpop.xlane.xlu1 %3592 }
0x1bc6   :  { %v3594_v40 = vmul.f32 0.015625, %v3593_v39  ;;  %v3838_v39 = vld [vmem:[#allocation42 + $0x1b0] sm:$0xff] }
0x1bc8   :  { %v3595_v41 = vsub.f32 %v3586_v20, %v3594_v40  ;;  %v3837_v20 = vld [vmem:[#allocation42 + $0x1a8] sm:$0xff]  ;;  %v3839_v40 = vld [vmem:[#allocation42 + $0x1b8] sm:$0xff] }
0x1bc9   :  { %v6011_v29 = vpack.c.bf16 %v3837_v20, %v3836_v15  ;;  %v3958_v15 = vld [vmem:[#allocation44] sm:$0xff]  ;;  %v3959_v20 = vld [vmem:[#allocation44 + $0x8] sm:$0xff] }
0x1bca   :  { %v3596_v42 = vmul.f32 %v3595_v41, %v3595_v41 }
0x1bcb   :  { %6012 = vmatpush3.bf16.msra.mxu0 %v6011_v29  ;;  %v6029_v29 = vpack.c.bf16 %v3959_v20, %v3958_v15 }
0x1bcc   :  { %v3597_v43 = vsel %vm724_vm5, %v3596_v42, 0.0  ;;  %6013 = vmatprep.subr.bf16.mxu0 %v6913_v5  ;;  %v3840_v42 = vld [vmem:[#allocation42 + $0x1c0] sm:$0xff] }
0x1bcd   :  { %3598 = vadd.xlane.f32.xlu0 %v3597_v43  ;;  %v3841_v43 = vld [vmem:[#allocation42 + $0x1c8] sm:$0xff] }
0x1bce   :  { %v6017_v62 = vpack.c.bf16 %v3841_v43, %v3840_v42  ;;  %v3962_v42 = vld [vmem:[#allocation44 + $0x20] sm:$0xff]  ;;  %v3963_v43 = vld [vmem:[#allocation44 + $0x28] sm:$0xff] }
0x1c5a   :  { %v3599_v55 = vpop.xlane.xlu0 %3598 }
0x1c5b   :  { %v3600_v58 = vmul.f32 0.015625, %v3599_v55 }
0x1c5d   :  { %v3601_v59 = vadd.f32 1e-05, %v3600_v58  ;;  %v4519_v58 = vld [vmem:[%s7855_s25 + $0x3] ss:$0 sm:$0xff] }
0x1c5f   :  { %6210 = vrsqrt.f32 %v3601_v59 }
0x1c69   :  { %v6211_v60 = vpop.eup %6210 }
0x1c6a   :  { %v3603_v0 = vmul.f32 %v6211_v60, %v3595_v41  ;;  %v6014_v41 = vpack.c.bf16 %v3839_v40, %v3838_v39  ;;  %v3960_v39 = vld [vmem:[#allocation44 + $0x10] sm:$0xff]  ;;  %v3961_v40 = vld [vmem:[#allocation44 + $0x18] sm:$0xff] }
0x1c6c   :  { %v3610_v3 = vmul.f32 %v4512_v63, %v3603_v0  ;;  %6015 = vmatpush3.bf16.msra.mxu0 %v6014_v41  ;;  %v3846_v63 = vld [vmem:[#allocation42 + $0x1f0] sm:$0xff]  ;;  %v3847_v0 = vld [vmem:[#allocation42 + $0x1f8] sm:$0xff]  ;;  %v6032_v41 = vpack.c.bf16 %v3961_v40, %v3960_v39 }
0x1c6d   :  { %6016 = vmatprep.subr.bf16.mxu0 %v6913_v5 }
0x1c6e   :  { %v3617_v22 = vadd.f32 %v4513_v2, %v3610_v3  ;;  %v6026_v2 = vpack.c.bf16 %v3847_v0, %v3846_v63  ;;  %v4520_v3 = vld [vmem:[#allocation41 + $0x3] ss:$0 sm:$0xff]  ;;  %v4526_v63 = vld [vmem:[%s7857_s14 + $0x3] ss:$0 sm:$0xff] }
0x1c70   :  { %5466 = vmatmul.mubr.msk.f32.vlgmr.msra.gmra.mrb[50].mxu1 %vm724_vm5, %v3617_v22  ;;  %6018 = vmatpush3.bf16.msra.mxu0 %v6017_v62  ;;  %v6035_v62 = vpack.c.bf16 %v3963_v43, %v3962_v42 }
0x1c71   :  { %5484 = vmatprep.mubr.msk.f32.mxu1 %vm6914_vm0, %v6915_v6  ;;  %5994 = vmatpush3.bf16.msra.mxu1 %v5993_v26  ;;  %v1838_v26 = vadd.f32 %v4453_v25, %v7536_v49  ;;  %v4139_v25 = vld [vmem:[%s7861_s16] sm:$0xff] }
0x1c72   :  { %5995 = vmatprep.subr.bf16.mxu1 %v6913_v5  ;;  %6019 = vmatprep.subr.bf16.mxu0 %v6913_v5 }
0x1c73   :  { %v4455_v27 = vmul.f32 -1.442695, %v1838_v26 }
0x1c74   :  { %6021 = vmatpush3.bf16.msra.mxu0 %v6020_v46  ;;  %v6038_v46 = vpack.c.bf16 %v3965_v45, %v3964_v44  ;;  %v4230_v44 = vld [vmem:[#allocation45 + $0x18] sm:$0xff] }
0x1c75   :  { %5997 = vmatpush3.bf16.msra.mxu1 %v5996_v30  ;;  %6022 = vmatprep.subr.bf16.mxu0 %v6913_v5 }
0x1c76   :  { %5998 = vmatprep.subr.bf16.mxu1 %v6913_v5 }
0x1c78   :  { %6024 = vmatpush3.bf16.msra.mxu0 %v6023_v50  ;;  %v4473_v50 = vmul.f32 -1.442695, %v2512_v48 }
0x1c79   :  { %6000 = vmatpush3.bf16.msra.mxu1 %v5999_v32  ;;  %6025 = vmatprep.subr.bf16.mxu0 %v6913_v5 }
0x1c7a   :  { %6001 = vmatprep.subr.bf16.mxu1 %v6913_v5 }
0x1c7c   :  { %6027 = vmatpush3.bf16.msra.mxu0 %v6026_v2  ;;  %v4052_v2 = vld [vmem:[%s7860_s15] sm:$0xff] }
0x1c7d   :  { %6003 = vmatpush3.bf16.msra.mxu1 %v6002_v34  ;;  %6050 = vmatprep.subr.bf16.mxu0 %v6913_v5 }
0x1c7e   :  { %6028 = vmatprep.subr.bf16.mxu1 %v6913_v5 }
0x1d43   :  { %v3704_v9 = vpop.f32.mrb[50].mxu1 }
0x1d44   :  { %v3705_v11 = vadd.f32 %v4514_v8, %v3704_v9  ;;  %v5467_v13 = vpop.f32.mrb[51].mxu1 }
0x1d45   :  { %v4523_v13 = vld [vmem:[%s7856_s8 + $0x3] ss:$0 sm:$0xff] }
0x1d46   :  { %v3708_v56 = vadd.f32 %v3705_v11, %v3617_v22 }
0x1d48   :  { %v3713_v14 = vsel %vm724_vm5, %v3708_v56, 0.0 }
0x1d49   :  { %3714 = vadd.xlane.f32.xlu1 %v3713_v14 }
0x1dd6   :  { %v3715_v16 = vpop.xlane.xlu1 %3714 }
0x1dd7   :  { %v3716_v18 = vmul.f32 0.015625, %v3715_v16 }
0x1dd9   :  { %v7706_v61 = vsub.f32 %v3708_v56, %v3716_v18 }
0x1ddb   :  { %v3718_v19 = vmul.f32 %v7706_v61, %v7706_v61 }
0x1ddd   :  { %v3719_v23 = vsel %vm724_vm5, %v3718_v19, 0.0  ;;  %v7734_v19 = vld [vmem:[%s7859_s12] ss:$0 sm:$0xff] }
0x1dde   :  { %3720 = vadd.xlane.f32.xlu0 %v3719_v23  ;;  %v4411_v23 = vld [vmem:[#allocation2] ss:$0 sm:$0xff] }
0x1ddf   :  { %v795_v1 = vadd.f32 %v4411_v23, %v7409_v57  ;;  %v6237_v23 = vld [vmem:[%s7851_s21] sm:$0xff] }
0x1de1   :  { %v4413_v7 = vmul.f32 -1.442695, %v795_v1  ;;  %v4140_v1 = vld [vmem:[%s7861_s16 + $0x8] sm:$0xff] }
0x1de2   :  { %v6051_v26 = vpack.c.bf16 %v4140_v1, %v4139_v25 }
0x1e6b   :  { %v3721_v51 = vpop.xlane.xlu0 %3720 }
0x1e6c   :  { %v3722_v52 = vmul.f32 0.015625, %v3721_v51 }
0x1e6e   :  { %v3723_v28 = vadd.f32 1e-05, %v3722_v52 }
0x1e70   :  { %6212 = vrsqrt.f32 %v3723_v28 }
0x1e71   :  { %6214 = vpow2.f32 %v4413_v7  ;;  %v4142_v7 = vld [vmem:[%s7861_s16 + $0x18] sm:$0xff] }
0x1e72   :  { %6216 = vpow2.f32 %v4455_v27  ;;  %v6054_v27 = vpack.c.bf16 %v4142_v7, %v4141_v24 }
0x1e7a   :  { %v6213_v53 = vpop.eup %6212 }
0x1e7b   :  { %v3725_v55 = vmul.f32 %v6213_v53, %v7706_v61  ;;  %v6215_v30 = vpop.eup %6214 }
0x1e7c   :  { %v6217_v12 = vpop.eup %6216  ;;  %v801_v31 = vadd.f32 1.0, %v6215_v30  ;;  %v4143_v30 = vld [vmem:[%s7861_s16 + $0x20] sm:$0xff] }
0x1e7d   :  { %v3732_v59 = vmul.f32 %v4518_v54, %v3725_v55  ;;  %v1844_v32 = vadd.f32 1.0, %v6217_v12  ;;  %v4144_v12 = vld [vmem:[%s7861_s16 + $0x28] sm:$0xff] }
0x1e7e   :  { %6218 = vrcp.f32 %v801_v31  ;;  %v6057_v31 = vpack.c.bf16 %v4144_v12, %v4143_v30 }
0x1e7f   :  { %v3739_v60 = vadd.f32 %v4519_v58, %v3732_v59  ;;  %6220 = vrcp.f32 %v1844_v32  ;;  %v4146_v32 = vld [vmem:[%s7861_s16 + $0x38] sm:$0xff] }
0x1e80   :  { %6222 = vpow2.f32 %v4473_v50 }
0x1e81   :  { %5485 = vmatmul.mubr.msk.f32.vlgmr.msra.gmra.mrb[52].mxu1 %vm724_vm5, %v3739_v60 }
0x1e82   :  { %5538 = vmatprep.mubr.msk.f32.mxu1 %vm6914_vm0, %v6915_v6  ;;  %6030 = vmatpush3.bf16.msra.mxu1 %v6029_v29 }
0x1e83   :  { %6031 = vmatprep.subr.bf16.mxu1 %v6913_v5 }
0x1e86   :  { %6033 = vmatpush3.bf16.msra.mxu1 %v6032_v41 }
0x1e87   :  { %6034 = vmatprep.subr.bf16.mxu1 %v6913_v5 }
0x1e88   :  { %v6219_v34 = vpop.eup %6218 }
0x1e89   :  { %v6221_v36 = vpop.eup %6220  ;;  %v4324_v57 = vmul.f32 %v6219_v34, %v7734_v19  ;;  %v4228_v34 = vld [vmem:[#allocation45 + $0x8] sm:$0xff] }
0x1e8a   :  { %6036 = vmatpush3.bf16.msra.mxu1 %v6035_v62  ;;  %v6223_v51 = vpop.eup %6222  ;;  %v4229_v62 = vld [vmem:[#allocation45 + $0x10] sm:$0xff] }
0x1e8b   :  { %6037 = vmatprep.subr.bf16.mxu1 %v6913_v5  ;;  %v2518_v52 = vadd.f32 1.0, %v6223_v51  ;;  %v6066_v45 = vpack.c.bf16 %v4230_v44, %v4229_v62  ;;  %v4536_v51 = vld [vmem:[#allocation6] ss:$0 sm:$0xff] }
0x1e8d   :  { %6224 = vrcp.f32 %v2518_v52 }
0x1e8e   :  { %6039 = vmatpush3.bf16.msra.mxu1 %v6038_v46  ;;  %v4534_v46 = vld [vmem:[%s7863_s22] ss:$0 sm:$0xff] }
0x1e8f   :  { %6040 = vmatprep.subr.bf16.mxu1 %v6913_v5 }
0x1e97   :  { %v6225_v55 = vpop.eup %6224 }
0x1f54   :  { %v3826_v22 = vpop.f32.mrb[52].mxu1 }
0x1f55   :  { %v3827_v8 = vadd.f32 %v4520_v3, %v3826_v22  ;;  %v5486_v9 = vpop.f32.mrb[53].mxu1  ;;  %v4053_v3 = vld [vmem:[%s7860_s15 + $0x8] sm:$0xff]  ;;  %v4527_v22 = vld [vmem:[%s7858_s26 + $0x3] ss:$0 sm:$0xff] }
0x1f56   :  { %v6041_v9 = vpack.c.bf16 %v4053_v3, %v4052_v2 }
0x1f57   :  { %v3830_v11 = vmax.f32 %v3827_v8, 0.0 }
0x1f59   :  { %5520 = vmatmul.mubr.f32.vlgmr.msra.gmra.mrb[56].mxu0 %v3830_v11 }
0x1f5a   :  { %5572 = vmatprep.mubr.msk.f32.mxu0 %vm6914_vm0, %v6915_v6  ;;  %6052 = vmatpush3.bf16.msra.mxu0 %v6051_v26 }
0x1f5b   :  { %6053 = vmatprep.subr.bf16.mxu0 %v6913_v5 }
0x1f5e   :  { %6055 = vmatpush3.bf16.msra.mxu0 %v6054_v27 }
0x1f5f   :  { %6056 = vmatprep.subr.bf16.mxu0 %v6913_v5 }
0x1f62   :  { %6058 = vmatpush3.bf16.msra.mxu0 %v6057_v31 }
0x1f63   :  { %6059 = vmatprep.subr.bf16.mxu0 %v6913_v5 }
0x202c   :  { %v3922_v56 = vpop.f32.mrb[56].mxu0 }
0x202d   :  { %v3923_v14 = vadd.f32 %v4523_v13, %v3922_v56  ;;  %v5521_v16 = vpop.f32.mrb[57].mxu0  ;;  %v4054_v13 = vld [vmem:[%s7860_s15 + $0x10] sm:$0xff]  ;;  %v4055_v56 = vld [vmem:[%s7860_s15 + $0x18] sm:$0xff] }
0x202e   :  { %v4056_v16 = vld [vmem:[%s7860_s15 + $0x20] sm:$0xff] }
0x202f   :  { %v3926_v18 = vadd.f32 %v3923_v14, %v3739_v60  ;;  %v6044_v14 = vpack.c.bf16 %v4055_v56, %v4054_v13 }
0x2031   :  { %v3931_v61 = vsel %vm724_vm5, %v3926_v18, 0.0 }
0x2032   :  { %3932 = vadd.xlane.f32.xlu1 %v3931_v61 }
0x2043   :  { %4325 = vrot.lane.b32.xlu1 %v7734_v19, %s6918_s24 }
0x2047   :  { %4335 = vrot.lane.b32.xlu1 %v7734_v19, %s6920_s10 }
0x204b   :  { %4340 = vrot.lane.b32.xlu1 %v7734_v19, %s6921_s13 }
0x20bf   :  { %v3933_v17 = vpop.xlane.xlu1 %3932 }
0x20c0   :  { %v3934_v33 = vmul.f32 0.015625, %v3933_v17 }
0x20c2   :  { %v3935_v35 = vsub.f32 %v3926_v18, %v3934_v33  ;;  %v4057_v18 = vld [vmem:[%s7860_s15 + $0x28] sm:$0x3] }
0x20c3   :  { %v4326_v4 = vpop.permute.xlu1 %4325  ;;  %v6047_v61 = vpack.c.bf16 %v4057_v18, %v4056_v16  ;;  %v4227_v33 = vld [vmem:[#allocation45] sm:$0xff] }
0x20c4   :  { %v4328_v37 = vmul.f32 %v6221_v36, %v4326_v4  ;;  %v3936_v49 = vmul.f32 %v3935_v35, %v3935_v35  ;;  %v4528_v36 = vld [vmem:[#allocation5] ss:$0 sm:$0xff] }
0x20c6   :  { %v4329_v38 = vadd.f32 %v4328_v37, %v4324_v57  ;;  %v3937_v10 = vsel %vm724_vm5, %v3936_v49, 0.0 }
0x20c7   :  { %3938 = vadd.xlane.f32.xlu0 %v3937_v10  ;;  %v4336_v41 = vpop.permute.xlu1 %4335 }
0x20dd   :  { %4330 = vrot.lane.b32.xlu0 %v7734_v19, %s6919_s30 }
0x2154   :  { %v3939_v28 = vpop.xlane.xlu0 %3938 }
0x2155   :  { %v3940_v53 = vmul.f32 0.015625, %v3939_v28 }
0x2157   :  { %v3941_v54 = vadd.f32 1e-05, %v3940_v53 }
0x2158   :  { %v4331_v58 = vpop.permute.xlu0 %4330 }
0x2159   :  { %6226 = vrsqrt.f32 %v3941_v54  ;;  %v4333_v59 = vmul.f32 %v6225_v55, %v4331_v58 }
0x215b   :  { %v7748_v60 = vadd.f32 %v4333_v59, %v4329_v38  ;;  %v4531_v38 = vld [vmem:[%s7862_s18] ss:$0 sm:$0xff]  ;;  %v4341_v59 = vpop.permute.xlu1 %4340 }
0x2163   :  { %v6227_v21 = vpop.eup %6226 }
0x2164   :  { %v3943_v0 = vmul.f32 %v6227_v21, %v3935_v35  ;;  %v6063_v35 = vpack.c.bf16 %v4228_v34, %v4227_v33 }
0x2166   :  { %v3950_v8 = vmul.f32 %v4526_v63, %v3943_v0 }
0x2168   :  { %v3957_v11 = vadd.f32 %v4527_v22, %v3950_v8 }
0x216a   :  { %5539 = vmatmul.mubr.msk.f32.vlgmr.msra.gmra.mrb[54].mxu1 %vm724_vm5, %v3957_v11 }
0x216b   :  { %6042 = vmatpush3.bf16.msra.mxu1 %v6041_v9  ;;  %5553 = vmatprep.mubr.msk.f32.mxu1 %vm6914_vm0, %v6915_v6 }
0x216c   :  { %6043 = vmatprep.subr.bf16.mxu1 %v6913_v5 }
0x216f   :  { %6045 = vmatpush3.bf16.msra.mxu1 %v6044_v14 }
0x2170   :  { %6046 = vmatprep.subr.bf16.mxu1 %v6913_v5 }
0x2173   :  { %6049 = vmatpush3.bf16.msk.msra.mxu1 %vm7344_vm3, %v6047_v61 }
0x2174   :  { %6062 = vmatprep.subr.bf16.mxu1 %v6913_v5 }
0x2176   :  { %5554 = vmatmul.mubr.msk.f32.vlgmr.msra.gmra.mrb[56].mxu1 %vm536_vm4, %v6237_v23 }
0x2177   :  { %5583 = vmatprep.mubr.msk.f32.mxu1 %vm6914_vm0, %v6915_v6  ;;  %v4145_v6 = vld [vmem:[%s7861_s16 + $0x30] sm:$0xff]  ;;  %6064 = vmatpush3.bf16.msra.mxu1 %v6063_v35 }
0x2178   :  { %v6060_v17 = vpack.c.bf16 %v4146_v32, %v4145_v6  ;;  %6065 = vmatprep.subr.bf16.mxu1 %v6913_v5 }
0x217a   :  { %6061 = vmatpush3.bf16.msra.mxu0 %v6060_v17 }
0x217b   :  { %6067 = vmatpush3.bf16.msra.mxu1 %v6066_v45 }
0x223d   :  { %v4042_v4 = vpop.f32.mrb[54].mxu1 }
0x223e   :  { %v4043_v57 = vadd.f32 %v4528_v36, %v4042_v4  ;;  %v5540_v37 = vpop.f32.mrb[55].mxu1 }
0x2240   :  { %v4530_v49 = vmul.f32 -1.442695, %v4043_v57 }
0x2242   :  { %6228 = vpow2.f32 %v4530_v49 }
0x2249   :  { %v4134_v10 = vpop.f32.mrb[56].mxu1 }
0x224a   :  { %v4135_v15 = vadd.f32 %v4531_v38, %v4134_v10  ;;  %v5555_v20 = vpop.f32.mrb[57].mxu1 }
0x224c   :  { %v6229_v29 = vpop.eup %6228  ;;  %v4138_v39 = vmax.f32 %v4135_v15, 0.0 }
0x224d   :  { %v4049_v40 = vadd.f32 1.0, %v6229_v29 }
0x224e   :  { %5573 = vmatmul.mubr.msk.f32.vlgmr.msra.gmra.mrb[58].mxu0 %vm724_vm5, %v4138_v39 }
0x224f   :  { %6230 = vrcp.f32 %v4049_v40 }
0x2259   :  { %v6231_v42 = vpop.eup %6230 }
0x225a   :  { %v4338_v5 = vmul.f32 %v6231_v42, %v4336_v41 }
0x225c   :  { %v4339_v43 = vadd.f32 %v4338_v5, %v7748_v60 }
0x2321   :  { %v4223_v47 = vpop.f32.mrb[58].mxu0 }
0x2322   :  { %v4224_v48 = vadd.f32 %v4534_v46, %v4223_v47  ;;  %v5574_v50 = vpop.f32.mrb[59].mxu0 }
0x2324   :  { %5584 = vmatmul.mubr.msk.f32.vlgmr.msra.gmra.mrb[58].mxu1 %vm1767_vm6, %v4224_v48 }
0x23f7   :  { %v4307_v52 = vpop.f32.mrb[58].mxu1 }
0x23f8   :  { %v4308_v28 = vadd.f32 %v4536_v51, %v4307_v52  ;;  %v5585_v53 = vpop.f32.mrb[59].mxu1 }
0x23fa   :  { %v4538_v54 = vmul.f32 -1.442695, %v4308_v28 }
0x23fc   :  { %6232 = vpow2.f32 %v4538_v54 }
0x2406   :  { %v6233_v55 = vpop.eup %6232 }
0x2407   :  { %v4314_v58 = vadd.f32 1.0, %v6233_v55 }
0x2409   :  { %6234 = vrcp.f32 %v4314_v58 }
0x2413   :  { %v6235_v60 = vpop.eup %6234 }
0x2414   :  { %v4343_v21 = vmul.f32 %v6235_v60, %v4341_v59 }
0x2416   :  { %v4344_v19 = vadd.f32 %v4343_v21, %v4339_v43 }
0x2418   :  { %4346 = vst.msk [vmem:[%s7118_s11] sm:$0xff] %vm4345_vm7, %v4344_v19 }
0x2419   :  { %4351 = vsyncpa [#allocation8], 1 }
0x241a   :  { %4352 = vsyncpa [#allocation10], 1 }
0x241b   :  { %4353 = vsyncpa [#allocation13], 1 }
0x241c   :  { %4354 = vsyncpa [#allocation16], 1 }
0x241d   :  { %4355 = vsyncpa [#allocation19], 1 }
0x241e   :  { %4356 = vsyncpa [#allocation22], 1 }
0x241f   :  { %4357 = vsyncpa [#allocation25], 1 }
0x2420   :  { %4358 = vsyncpa [#allocation28], 1 }
0x2421   :  { %4359 = vsyncpa [#allocation31], 1 }
0x2422   :  { %4360 = vsyncpa [#allocation34], 1 }
0x2423   :  { %4361 = vsyncpa [#allocation37], 1 }
0x2424   :  { %4362 = vsyncpa [#allocation40], 1 }
0x2425   :  { %4363 = vsyncpa [#allocation43], 1 }
0x2426   :  { %4364 = vsyncpa [#allocation46], 1 }

</bundles_post_ra>
